<compile_context>
chip_gen: v7x
topology: tpu7x:2x2x1
jax: 0.10.0
libtpu: 0.0.40
codegen_flags: <defaults>
</compile_context>

<pallas_src>
import functools

import jax
import jax.numpy as jnp
from jax.experimental import pallas as pl

K_CHEB = 5  # ChebConv K=5 as in the module


# ----------------------------- Pallas kernels -----------------------------

def gcn_convs_kernel(x_ref, l_ref, w1_ref, b1_ref, w2_ref, b2_ref, o_ref):
    """Fused: ChebConv(1,H,K=5) -> ReLU -> ChebConv(H,H,K=5) -> ReLU.

    x_ref:  [N, 1]     node features
    l_ref:  [N, N]     dense scaled Laplacian L_hat = 2L/lambda_max - I
    w1_ref: [K, 1, H]   b1_ref: [1, H]
    w2_ref: [K, H, H]   b2_ref: [1, H]
    o_ref:  [N, H]
    """
    L = l_ref[...]

    def cheb_relu(h, w_ref, b_ref):
        # The T_k recurrence on the node axis must stay sequential.  The per-order
        # projections are accumulated with individual dots: concatenating the 1/8-lane
        # wide T_k tiles along the minor dim to form a single matmul is a Mosaic
        # lowering risk, and at N=32 the extra MXU pushes are nowhere near the
        # bottleneck (the run is launch/DMA bound).
        cin = h.shape[1]
        tx0 = h
        tx1 = jnp.dot(L, tx0, preferred_element_type=jnp.float32)
        if cin == 1:
            # Degenerate contraction dim of 1 -> VPU broadcast-multiply, skip the MXU.
            out = tx0 * w_ref[0] + tx1 * w_ref[1]
        else:
            out = jnp.dot(tx0, w_ref[0], preferred_element_type=jnp.float32)
            out = out + jnp.dot(tx1, w_ref[1], preferred_element_type=jnp.float32)
        for k in range(2, K_CHEB):
            tx2 = 2.0 * jnp.dot(L, tx1, preferred_element_type=jnp.float32) - tx0
            if cin == 1:
                out = out + tx2 * w_ref[k]
            else:
                out = out + jnp.dot(tx2, w_ref[k], preferred_element_type=jnp.float32)
            tx0, tx1 = tx1, tx2
        return jnp.maximum(out + b_ref[...], 0.0)

    h1 = cheb_relu(x_ref[...], w1_ref, b1_ref)
    o_ref[...] = cheb_relu(h1, w2_ref, b2_ref)


def head_kernel(h_ref, xb_ref,
                l1w_ref, l1b_ref, l2w_ref, l2b_ref,
                m0w_ref, m0b_ref, m1w_ref, m1b_ref,
                m2w_ref, m2b_ref, mow_ref, mob_ref,
                owh_ref, owm_ref, ob_ref, o_ref):
    """Fused GCN head + MLP branch + output layer.

    h_ref:  [B, input_size*H]  flattened conv features
    xb_ref: [B, input_size]    raw node features reshaped per graph (MLP input)
    all linear weights are pre-transposed to [in, out]; biases are [1, out];
    the out-layer weight is pre-split into the GCN half (owh) and MLP half (owm).
    o_ref:  [B, out_size]
    """
    def linear(x, w_ref, b_ref):
        return jnp.dot(x, w_ref[...], preferred_element_type=jnp.float32) + b_ref[...]

    def relu(v):
        return jnp.maximum(v, 0.0)

    def elu(v):
        # exp(min(v,0)) - 1 keeps the unselected branch finite (no inf for large v).
        # TODO(synk): use jnp.expm1 once an expm1 Mosaic lowering is guaranteed.
        return jnp.where(v > 0.0, v, jnp.exp(jnp.minimum(v, 0.0)) - 1.0)

    # GCN branch head
    g = relu(linear(h_ref[...], l1w_ref, l1b_ref))      # [B, 1000]
    g = relu(linear(g, l2w_ref, l2b_ref))                # [B, 50]

    # MLP branch (ELU activations; eval-mode dropout is a no-op)
    m = elu(linear(xb_ref[...], m0w_ref, m0b_ref))       # [B, 350]
    m = elu(linear(m, m1w_ref, m1b_ref))                 # [B, 350]
    m = elu(linear(m, m2w_ref, m2b_ref))                 # [B, 350]
    m = linear(m, mow_ref, mob_ref)                      # [B, 50]

    # concat([g, m]) @ W_out^T + b  ==  g @ W_h + m @ W_m + b   (weight pre-split)
    y = (jnp.dot(g, owh_ref[...], preferred_element_type=jnp.float32)
         + jnp.dot(m, owm_ref[...], preferred_element_type=jnp.float32)
         + ob_ref[...])
    o_ref[...] = jnp.clip(y, 0.0, 110.0)


# ----------------------------- Pallas wrappers -----------------------------

def _full_spec(shape):
    nd = len(shape)
    return pl.BlockSpec(shape, lambda i, _nd=nd: (0,) * _nd)


def gcn_convs(x, l_hat, w1, b1, w2, b2):
    n, _ = x.shape
    hidden = w1.shape[-1]
    args = (x, l_hat, w1, b1, w2, b2)
    return pl.pallas_call(
        gcn_convs_kernel,
        out_shape=jax.ShapeDtypeStruct((n, hidden), jnp.float32),
        grid=(1,),
        in_specs=[_full_spec(a.shape) for a in args],
        out_specs=_full_spec((n, hidden)),
    )(*args)


def gcn_head_and_mlp(h_flat, x_batch, kp):
    b = h_flat.shape[0]
    out_size = kp["out_b"].shape[-1]
    args = (h_flat, x_batch,
            kp["lin1_wt"], kp["lin1_b"], kp["lin2_wt"], kp["lin2_b"],
            kp["mlp_w0t"], kp["mlp_b0"], kp["mlp_w1t"], kp["mlp_b1"],
            kp["mlp_w2t"], kp["mlp_b2"], kp["mlp_out_wt"], kp["mlp_out_b"],
            kp["out_wht"], kp["out_wmt"], kp["out_b"])
    return pl.pallas_call(
        head_kernel,
        out_shape=jax.ShapeDtypeStruct((b, out_size), jnp.float32),
        grid=(1,),
        in_specs=[_full_spec(a.shape) for a in args],
        out_specs=_full_spec((b, out_size)),
    )(*args)


# ----------------------------- JAX glue: graph operator -----------------------------

def build_cheb_operator(edge_index, num_nodes, lambda_max=2.0):
    """Dense L_hat = (2/lambda_max) * (I - D^-1/2 A D^-1/2) - I  (PyG ChebConv, sym norm).

    NOTE: dense L_hat is O(N^2); at large N tile it over a node grid or use the
    block-diagonal [B, ns, ns] per-graph structure instead (v7x VMEM is 64 MiB).
    At N=32 it is 4 KB and irrelevant.
    """
    row, col = edge_index[0], edge_index[1]
    A = jnp.zeros((num_nodes, num_nodes), jnp.float32).at[row, col].add(1.0)
    deg = A.sum(axis=1)
    dinv = jnp.where(deg > 0, 1.0 / jnp.sqrt(jnp.maximum(deg, 1e-12)), 0.0)
    A_norm = dinv[:, None] * A * dinv[None, :]
    L = jnp.eye(num_nodes, dtype=jnp.float32) - A_norm
    return (2.0 / lambda_max) * L - jnp.eye(num_nodes, dtype=jnp.float32)


# ----------------------------- Parameters -----------------------------

def init_params(key, hidden, input_size, out_size):
    """Parameters in PyTorch nn.Linear layout ([out_features, in_features])."""
    lin_input_size = input_size * hidden  # final_pool == 'None'

    def nrm(k, shape, fan_in):
        return jax.random.normal(k, shape, jnp.float32) / jnp.sqrt(jnp.float32(fan_in))

    ks = jax.random.split(key, 16)
    return {
        # ChebConv(1, hidden, K=5)
        "conv1_w": nrm(ks[0], (K_CHEB, 1, hidden), 1 * K_CHEB),
        "conv1_b": jnp.zeros((hidden,), jnp.float32),
        # ChebConv(hidden, hidden, K=5)
        "conv2_w": nrm(ks[1], (K_CHEB, hidden, hidden), hidden * K_CHEB),
        "conv2_b": jnp.zeros((hidden,), jnp.float32),
        # gcn_lin1: Linear(lin_input_size, 1000)
        "lin1_w": nrm(ks[2], (1000, lin_input_size), lin_input_size),
        "lin1_b": nrm(ks[3], (1000,), lin_input_size),
        # gcn_lin2: Linear(1000, 50)
        "lin2_w": nrm(ks[4], (50, 1000), 1000),
        "lin2_b": nrm(ks[5], (50,), 1000),
        # MLP h_sizes=[input_size, 350, 350, 350], out_size=50
        "mlp_w0": nrm(ks[6], (350, input_size), input_size),
        "mlp_b0": nrm(ks[7], (350,), input_size),
        "mlp_w1": nrm(ks[8], (350, 350), 350),
        "mlp_b1": nrm(ks[9], (350,), 350),
        "mlp_w2": nrm(ks[10], (350, 350), 350),
        "mlp_b2": nrm(ks[11], (350,), 350),
        "mlp_out_w": nrm(ks[12], (50, 350), 350),
        "mlp_out_b": nrm(ks[13], (50,), 350),
        # out: Linear(100, out_size)
        "out_w": nrm(ks[14], (out_size, 100), 100),
        "out_b": nrm(ks[15], (out_size,), 100),
    }


def prepare_params(p):
    """One-time layout prep (OFF the hot path): transpose Linear weights to [in, out],
    reshape biases to [1, out], split the out-layer weight into GCN/MLP halves."""
    f32 = jnp.float32
    return {
        "conv1_w": p["conv1_w"].astype(f32),
        "conv1_b": p["conv1_b"].reshape(1, -1).astype(f32),
        "conv2_w": p["conv2_w"].astype(f32),
        "conv2_b": p["conv2_b"].reshape(1, -1).astype(f32),
        "lin1_wt": p["lin1_w"].T.astype(f32),
        "lin1_b": p["lin1_b"].reshape(1, -1).astype(f32),
        "lin2_wt": p["lin2_w"].T.astype(f32),
        "lin2_b": p["lin2_b"].reshape(1, -1).astype(f32),
        "mlp_w0t": p["mlp_w0"].T.astype(f32),
        "mlp_b0": p["mlp_b0"].reshape(1, -1).astype(f32),
        "mlp_w1t": p["mlp_w1"].T.astype(f32),
        "mlp_b1": p["mlp_b1"].reshape(1, -1).astype(f32),
        "mlp_w2t": p["mlp_w2"].T.astype(f32),
        "mlp_b2": p["mlp_b2"].reshape(1, -1).astype(f32),
        "mlp_out_wt": p["mlp_out_w"].T.astype(f32),
        "mlp_out_b": p["mlp_out_b"].reshape(1, -1).astype(f32),
        # concat order in the forward is (gcn_features[0:50], mlp_features[50:100])
        "out_wht": p["out_w"][:, :50].T.astype(f32),   # [50, out_size]
        "out_wmt": p["out_w"][:, 50:].T.astype(f32),   # [50, out_size]
        "out_b": p["out_b"].reshape(1, -1).astype(f32),
    }


# ----------------------------- Forward pass -----------------------------

def trac_gcn_forward(kparams, x, l_hat, batch_size, input_size, hidden):
    # Fused kernel 1: ChebConv -> ReLU -> ChebConv -> ReLU (final_pool == 'None')
    h = gcn_convs(x, l_hat,
                  kparams["conv1_w"], kparams["conv1_b"],
                  kparams["conv2_w"], kparams["conv2_b"])          # [N, H]

    # Free row-major bitcasts in XLA glue (kept outside the kernel on purpose:
    # lane-compacting in-kernel reshapes are a Mosaic lowering risk).
    h_flat = h.reshape(batch_size, input_size * hidden)             # [B, input_size*H]
    x_batch = x.reshape(batch_size, input_size)                     # [B, input_size]

    # Fused kernel 2: lin1+ReLU, lin2+ReLU, MLP (3x ELU + out), folded concat,
    # out Linear, clamp(0, 110).  Eval-mode dropout is a no-op.
    return gcn_head_and_mlp(h_flat, x_batch, kparams)               # [B, out_size]


# ----------------------------- Main -----------------------------

if __name__ == "__main__":
    hidden_channels = 8
    input_size = 16     # nodes per patient graph
    out_size = 6
    batch_size = 2
    num_nodes = batch_size * input_size

    key = jax.random.PRNGKey(0)
    k_x, k_p = jax.random.split(key)

    # Node features: one scalar feature per node (ChebConv in_channels = 1)
    x = jax.random.normal(k_x, (num_nodes, 1), jnp.float32)

    # Batch vector (node -> graph id); the torch module uses it only for reshape semantics
    batch = jnp.repeat(jnp.arange(batch_size, dtype=jnp.int32), input_size)

    # Simple undirected ring graph per patient, block-diagonal over the batch
    src, dst = [], []
    for g in range(batch_size):
        off = g * input_size
        for i in range(input_size):
            j = (i + 1) % input_size
            src += [off + i, off + j]
            dst += [off + j, off + i]
    edge_index = jnp.array([src, dst], dtype=jnp.int32)              # [2, 2*B*input_size]
    edge_attr = jnp.ones((edge_index.shape[1],), jnp.float32)        # unused (ChebConv called w/o weights)

    l_hat = build_cheb_operator(edge_index, num_nodes, lambda_max=2.0)

    params = init_params(k_p, hidden_channels, input_size, out_size)
    kparams = jax.block_until_ready(prepare_params(params))          # one-time, off the hot path

    fwd = jax.jit(
        functools.partial(
            trac_gcn_forward,
            batch_size=batch_size,
            input_size=input_size,
            hidden=hidden_channels,
        )
    )
    out = jax.block_until_ready(fwd(kparams, x, l_hat))

    assert out.shape == (batch_size, out_size), out.shape
    assert bool(jnp.all(out >= 0.0)) and bool(jnp.all(out <= 110.0))
    print("KERNEL_OK")
</pallas_src>

<mosaic_0001>
module attributes {stable_mosaic.version = 11 : i64} {
  func.func @gcn_convs_kernel(%arg0: i32, %arg1: memref<32x1xf32, #tpu.memory_space<vmem>>, %arg2: memref<32x32xf32, #tpu.memory_space<vmem>>, %arg3: memref<5x1x8xf32, #tpu.memory_space<vmem>>, %arg4: memref<1x8xf32, #tpu.memory_space<vmem>>, %arg5: memref<5x8x8xf32, #tpu.memory_space<vmem>>, %arg6: memref<1x8xf32, #tpu.memory_space<vmem>>, %arg7: memref<32x8xf32, #tpu.memory_space<vmem>>) attributes {dimension_semantics = [#tpu.dimension_semantics<arbitrary>], iteration_bounds = array<i64: 1>, scalar_prefetch = 0 : i64, scratch_operands = 0 : i64, tpu.core_type = #tpu.core_type<tc>, window_params = [{pipeline_mode = #tpu.pipeline_mode<synchronous>, transform_indices = @transform_0, window_bounds = array<i64: 32, 1>}, {pipeline_mode = #tpu.pipeline_mode<synchronous>, transform_indices = @transform_1, window_bounds = array<i64: 32, 32>}, {pipeline_mode = #tpu.pipeline_mode<synchronous>, transform_indices = @transform_2, window_bounds = array<i64: 5, 1, 8>}, {pipeline_mode = #tpu.pipeline_mode<synchronous>, transform_indices = @transform_3, window_bounds = array<i64: 1, 8>}, {pipeline_mode = #tpu.pipeline_mode<synchronous>, transform_indices = @transform_4, window_bounds = array<i64: 5, 8, 8>}, {pipeline_mode = #tpu.pipeline_mode<synchronous>, transform_indices = @transform_5, window_bounds = array<i64: 1, 8>}, {pipeline_mode = #tpu.pipeline_mode<synchronous>, transform_indices = @transform_6, window_bounds = array<i64: 32, 8>}]} {
    %c0 = arith.constant 0 : index
    %c0_0 = arith.constant 0 : index
    %0 = vector.load %arg2[%c0, %c0_0] : memref<32x32xf32, #tpu.memory_space<vmem>>, vector<32x32xf32>
    %c0_1 = arith.constant 0 : index
    %c0_2 = arith.constant 0 : index
    %1 = vector.load %arg1[%c0_1, %c0_2] : memref<32x1xf32, #tpu.memory_space<vmem>>, vector<32x1xf32>
    %cst = arith.constant dense<0.000000e+00> : vector<32x1xf32>
    %2 = tpu.matmul %0, %1, %cst {dimension_numbers = #tpu.dot_dimension_numbers<[1], [0], [0], [1], [0, 0, 1, 1], [], []>} : vector<32x32xf32>, vector<32x1xf32>, vector<32x1xf32> -> vector<32x1xf32>
    %c0_3 = arith.constant 0 : index
    %c0_4 = arith.constant 0 : index
    %c0_5 = arith.constant 0 : index
    %3 = vector.load %arg3[%c0_3, %c0_4, %c0_5] : memref<5x1x8xf32, #tpu.memory_space<vmem>>, vector<1x1x8xf32>
    %4 = vector.shape_cast %3 : vector<1x1x8xf32> to vector<1x8xf32>
    %5 = vector.broadcast %1 : vector<32x1xf32> to vector<32x8xf32>
    %6 = vector.broadcast %4 : vector<1x8xf32> to vector<32x8xf32>
    %7 = arith.mulf %5, %6 : vector<32x8xf32>
    %c1 = arith.constant 1 : index
    %c0_6 = arith.constant 0 : index
    %c0_7 = arith.constant 0 : index
    %8 = vector.load %arg3[%c1, %c0_6, %c0_7] : memref<5x1x8xf32, #tpu.memory_space<vmem>>, vector<1x1x8xf32>
    %9 = vector.shape_cast %8 : vector<1x1x8xf32> to vector<1x8xf32>
    %10 = vector.broadcast %2 : vector<32x1xf32> to vector<32x8xf32>
    %11 = vector.broadcast %9 : vector<1x8xf32> to vector<32x8xf32>
    %12 = arith.mulf %10, %11 : vector<32x8xf32>
    %13 = arith.addf %7, %12 : vector<32x8xf32>
    %cst_8 = arith.constant dense<0.000000e+00> : vector<32x1xf32>
    %14 = tpu.matmul %0, %2, %cst_8 {dimension_numbers = #tpu.dot_dimension_numbers<[1], [0], [0], [1], [0, 0, 1, 1], [], []>} : vector<32x32xf32>, vector<32x1xf32>, vector<32x1xf32> -> vector<32x1xf32>
    %cst_9 = arith.constant 2.000000e+00 : f32
    %15 = vector.broadcast %cst_9 : f32 to vector<32x1xf32>
    %16 = arith.mulf %15, %14 : vector<32x1xf32>
    %17 = arith.subf %16, %1 : vector<32x1xf32>
    %c2 = arith.constant 2 : index
    %c0_10 = arith.constant 0 : index
    %c0_11 = arith.constant 0 : index
    %18 = vector.load %arg3[%c2, %c0_10, %c0_11] : memref<5x1x8xf32, #tpu.memory_space<vmem>>, vector<1x1x8xf32>
    %19 = vector.shape_cast %18 : vector<1x1x8xf32> to vector<1x8xf32>
    %20 = vector.broadcast %17 : vector<32x1xf32> to vector<32x8xf32>
    %21 = vector.broadcast %19 : vector<1x8xf32> to vector<32x8xf32>
    %22 = arith.mulf %20, %21 : vector<32x8xf32>
    %23 = arith.addf %13, %22 : vector<32x8xf32>
    %cst_12 = arith.constant dense<0.000000e+00> : vector<32x1xf32>
    %24 = tpu.matmul %0, %17, %cst_12 {dimension_numbers = #tpu.dot_dimension_numbers<[1], [0], [0], [1], [0, 0, 1, 1], [], []>} : vector<32x32xf32>, vector<32x1xf32>, vector<32x1xf32> -> vector<32x1xf32>
    %cst_13 = arith.constant 2.000000e+00 : f32
    %25 = vector.broadcast %cst_13 : f32 to vector<32x1xf32>
    %26 = arith.mulf %25, %24 : vector<32x1xf32>
    %27 = arith.subf %26, %2 : vector<32x1xf32>
    %c3 = arith.constant 3 : index
    %c0_14 = arith.constant 0 : index
    %c0_15 = arith.constant 0 : index
    %28 = vector.load %arg3[%c3, %c0_14, %c0_15] : memref<5x1x8xf32, #tpu.memory_space<vmem>>, vector<1x1x8xf32>
    %29 = vector.shape_cast %28 : vector<1x1x8xf32> to vector<1x8xf32>
    %30 = vector.broadcast %27 : vector<32x1xf32> to vector<32x8xf32>
    %31 = vector.broadcast %29 : vector<1x8xf32> to vector<32x8xf32>
    %32 = arith.mulf %30, %31 : vector<32x8xf32>
    %33 = arith.addf %23, %32 : vector<32x8xf32>
    %cst_16 = arith.constant dense<0.000000e+00> : vector<32x1xf32>
    %34 = tpu.matmul %0, %27, %cst_16 {dimension_numbers = #tpu.dot_dimension_numbers<[1], [0], [0], [1], [0, 0, 1, 1], [], []>} : vector<32x32xf32>, vector<32x1xf32>, vector<32x1xf32> -> vector<32x1xf32>
    %cst_17 = arith.constant 2.000000e+00 : f32
    %35 = vector.broadcast %cst_17 : f32 to vector<32x1xf32>
    %36 = arith.mulf %35, %34 : vector<32x1xf32>
    %37 = arith.subf %36, %17 : vector<32x1xf32>
    %c4 = arith.constant 4 : index
    %c0_18 = arith.constant 0 : index
    %c0_19 = arith.constant 0 : index
    %38 = vector.load %arg3[%c4, %c0_18, %c0_19] : memref<5x1x8xf32, #tpu.memory_space<vmem>>, vector<1x1x8xf32>
    %39 = vector.shape_cast %38 : vector<1x1x8xf32> to vector<1x8xf32>
    %40 = vector.broadcast %37 : vector<32x1xf32> to vector<32x8xf32>
    %41 = vector.broadcast %39 : vector<1x8xf32> to vector<32x8xf32>
    %42 = arith.mulf %40, %41 : vector<32x8xf32>
    %43 = arith.addf %33, %42 : vector<32x8xf32>
    %c0_20 = arith.constant 0 : index
    %c0_21 = arith.constant 0 : index
    %44 = vector.load %arg4[%c0_20, %c0_21] : memref<1x8xf32, #tpu.memory_space<vmem>>, vector<1x8xf32>
    %45 = vector.broadcast %44 : vector<1x8xf32> to vector<32x8xf32>
    %46 = arith.addf %43, %45 : vector<32x8xf32>
    %cst_22 = arith.constant 0.000000e+00 : f32
    %47 = vector.broadcast %cst_22 : f32 to vector<32x8xf32>
    %48 = arith.maximumf %46, %47 : vector<32x8xf32>
    %cst_23 = arith.constant dense<0.000000e+00> : vector<32x8xf32>
    %49 = tpu.matmul %0, %48, %cst_23 {dimension_numbers = #tpu.dot_dimension_numbers<[1], [0], [0], [1], [0, 0, 1, 1], [], []>} : vector<32x32xf32>, vector<32x8xf32>, vector<32x8xf32> -> vector<32x8xf32>
    %c0_24 = arith.constant 0 : index
    %c0_25 = arith.constant 0 : index
    %c0_26 = arith.constant 0 : index
    %50 = vector.load %arg5[%c0_24, %c0_25, %c0_26] : memref<5x8x8xf32, #tpu.memory_space<vmem>>, vector<1x8x8xf32>
    %51 = vector.shape_cast %50 : vector<1x8x8xf32> to vector<8x8xf32>
    %cst_27 = arith.constant dense<0.000000e+00> : vector<32x8xf32>
    %52 = tpu.matmul %48, %51, %cst_27 {dimension_numbers = #tpu.dot_dimension_numbers<[1], [0], [0], [1], [0, 0, 1, 1], [], []>} : vector<32x8xf32>, vector<8x8xf32>, vector<32x8xf32> -> vector<32x8xf32>
    %c1_28 = arith.constant 1 : index
    %c0_29 = arith.constant 0 : index
    %c0_30 = arith.constant 0 : index
    %53 = vector.load %arg5[%c1_28, %c0_29, %c0_30] : memref<5x8x8xf32, #tpu.memory_space<vmem>>, vector<1x8x8xf32>
    %54 = vector.shape_cast %53 : vector<1x8x8xf32> to vector<8x8xf32>
    %cst_31 = arith.constant dense<0.000000e+00> : vector<32x8xf32>
    %55 = tpu.matmul %49, %54, %cst_31 {dimension_numbers = #tpu.dot_dimension_numbers<[1], [0], [0], [1], [0, 0, 1, 1], [], []>} : vector<32x8xf32>, vector<8x8xf32>, vector<32x8xf32> -> vector<32x8xf32>
    %56 = arith.addf %52, %55 : vector<32x8xf32>
    %cst_32 = arith.constant dense<0.000000e+00> : vector<32x8xf32>
    %57 = tpu.matmul %0, %49, %cst_32 {dimension_numbers = #tpu.dot_dimension_numbers<[1], [0], [0], [1], [0, 0, 1, 1], [], []>} : vector<32x32xf32>, vector<32x8xf32>, vector<32x8xf32> -> vector<32x8xf32>
    %cst_33 = arith.constant 2.000000e+00 : f32
    %58 = vector.broadcast %cst_33 : f32 to vector<32x8xf32>
    %59 = arith.mulf %58, %57 : vector<32x8xf32>
    %60 = arith.subf %59, %48 : vector<32x8xf32>
    %c2_34 = arith.constant 2 : index
    %c0_35 = arith.constant 0 : index
    %c0_36 = arith.constant 0 : index
    %61 = vector.load %arg5[%c2_34, %c0_35, %c0_36] : memref<5x8x8xf32, #tpu.memory_space<vmem>>, vector<1x8x8xf32>
    %62 = vector.shape_cast %61 : vector<1x8x8xf32> to vector<8x8xf32>
    %cst_37 = arith.constant dense<0.000000e+00> : vector<32x8xf32>
    %63 = tpu.matmul %60, %62, %cst_37 {dimension_numbers = #tpu.dot_dimension_numbers<[1], [0], [0], [1], [0, 0, 1, 1], [], []>} : vector<32x8xf32>, vector<8x8xf32>, vector<32x8xf32> -> vector<32x8xf32>
    %64 = arith.addf %56, %63 : vector<32x8xf32>
    %cst_38 = arith.constant dense<0.000000e+00> : vector<32x8xf32>
    %65 = tpu.matmul %0, %60, %cst_38 {dimension_numbers = #tpu.dot_dimension_numbers<[1], [0], [0], [1], [0, 0, 1, 1], [], []>} : vector<32x32xf32>, vector<32x8xf32>, vector<32x8xf32> -> vector<32x8xf32>
    %cst_39 = arith.constant 2.000000e+00 : f32
    %66 = vector.broadcast %cst_39 : f32 to vector<32x8xf32>
    %67 = arith.mulf %66, %65 : vector<32x8xf32>
    %68 = arith.subf %67, %49 : vector<32x8xf32>
    %c3_40 = arith.constant 3 : index
    %c0_41 = arith.constant 0 : index
    %c0_42 = arith.constant 0 : index
    %69 = vector.load %arg5[%c3_40, %c0_41, %c0_42] : memref<5x8x8xf32, #tpu.memory_space<vmem>>, vector<1x8x8xf32>
    %70 = vector.shape_cast %69 : vector<1x8x8xf32> to vector<8x8xf32>
    %cst_43 = arith.constant dense<0.000000e+00> : vector<32x8xf32>
    %71 = tpu.matmul %68, %70, %cst_43 {dimension_numbers = #tpu.dot_dimension_numbers<[1], [0], [0], [1], [0, 0, 1, 1], [], []>} : vector<32x8xf32>, vector<8x8xf32>, vector<32x8xf32> -> vector<32x8xf32>
    %72 = arith.addf %64, %71 : vector<32x8xf32>
    %cst_44 = arith.constant dense<0.000000e+00> : vector<32x8xf32>
    %73 = tpu.matmul %0, %68, %cst_44 {dimension_numbers = #tpu.dot_dimension_numbers<[1], [0], [0], [1], [0, 0, 1, 1], [], []>} : vector<32x32xf32>, vector<32x8xf32>, vector<32x8xf32> -> vector<32x8xf32>
    %cst_45 = arith.constant 2.000000e+00 : f32
    %74 = vector.broadcast %cst_45 : f32 to vector<32x8xf32>
    %75 = arith.mulf %74, %73 : vector<32x8xf32>
    %76 = arith.subf %75, %60 : vector<32x8xf32>
    %c4_46 = arith.constant 4 : index
    %c0_47 = arith.constant 0 : index
    %c0_48 = arith.constant 0 : index
    %77 = vector.load %arg5[%c4_46, %c0_47, %c0_48] : memref<5x8x8xf32, #tpu.memory_space<vmem>>, vector<1x8x8xf32>
    %78 = vector.shape_cast %77 : vector<1x8x8xf32> to vector<8x8xf32>
    %cst_49 = arith.constant dense<0.000000e+00> : vector<32x8xf32>
    %79 = tpu.matmul %76, %78, %cst_49 {dimension_numbers = #tpu.dot_dimension_numbers<[1], [0], [0], [1], [0, 0, 1, 1], [], []>} : vector<32x8xf32>, vector<8x8xf32>, vector<32x8xf32> -> vector<32x8xf32>
    %80 = arith.addf %72, %79 : vector<32x8xf32>
    %c0_50 = arith.constant 0 : index
    %c0_51 = arith.constant 0 : index
    %81 = vector.load %arg6[%c0_50, %c0_51] : memref<1x8xf32, #tpu.memory_space<vmem>>, vector<1x8xf32>
    %82 = vector.broadcast %81 : vector<1x8xf32> to vector<32x8xf32>
    %83 = arith.addf %80, %82 : vector<32x8xf32>
    %cst_52 = arith.constant 0.000000e+00 : f32
    %84 = vector.broadcast %cst_52 : f32 to vector<32x8xf32>
    %85 = arith.maximumf %83, %84 : vector<32x8xf32>
    %c0_53 = arith.constant 0 : index
    %c0_54 = arith.constant 0 : index
    %86 = vector.load %arg7[%c0_53, %c0_54] : memref<32x8xf32, #tpu.memory_space<vmem>>, vector<32x8xf32>
    tpu.vector_store %arg7[%c0_53, %c0_54], %85 {strides = array<i32>} : memref<32x8xf32, #tpu.memory_space<vmem>>, vector<32x8xf32>,
    return
  }
  func.func @transform_0(%arg0: i32) -> (i32, i32) {
    %c0_i32 = arith.constant 0 : i32
    %c0_i32_0 = arith.constant 0 : i32
    %c0_i32_1 = arith.constant 0 : i32
    return %c0_i32, %c0_i32_0 : i32, i32
  }
  func.func @transform_1(%arg0: i32) -> (i32, i32) {
    %c0_i32 = arith.constant 0 : i32
    %c0_i32_0 = arith.constant 0 : i32
    %c0_i32_1 = arith.constant 0 : i32
    return %c0_i32, %c0_i32_0 : i32, i32
  }
  func.func @transform_2(%arg0: i32) -> (i32, i32, i32) {
    %c0_i32 = arith.constant 0 : i32
    %c0_i32_0 = arith.constant 0 : i32
    %c0_i32_1 = arith.constant 0 : i32
    %c0_i32_2 = arith.constant 0 : i32
    return %c0_i32, %c0_i32_0, %c0_i32_1 : i32, i32, i32
  }
  func.func @transform_3(%arg0: i32) -> (i32, i32) {
    %c0_i32 = arith.constant 0 : i32
    %c0_i32_0 = arith.constant 0 : i32
    %c0_i32_1 = arith.constant 0 : i32
    return %c0_i32, %c0_i32_0 : i32, i32
  }
  func.func @transform_4(%arg0: i32) -> (i32, i32, i32) {
    %c0_i32 = arith.constant 0 : i32
    %c0_i32_0 = arith.constant 0 : i32
    %c0_i32_1 = arith.constant 0 : i32
    %c0_i32_2 = arith.constant 0 : i32
    return %c0_i32, %c0_i32_0, %c0_i32_1 : i32, i32, i32
  }
  func.func @transform_5(%arg0: i32) -> (i32, i32) {
    %c0_i32 = arith.constant 0 : i32
    %c0_i32_0 = arith.constant 0 : i32
    %c0_i32_1 = arith.constant 0 : i32
    return %c0_i32, %c0_i32_0 : i32, i32
  }
  func.func @transform_6(%arg0: i32) -> (i32, i32) {
    %c0_i32 = arith.constant 0 : i32
    %c0_i32_0 = arith.constant 0 : i32
    %c0_i32_1 = arith.constant 0 : i32
    return %c0_i32, %c0_i32_0 : i32, i32
  }
}

module attributes {stable_mosaic.version = 11 : i64} {
  func.func @head_kernel(%arg0: i32, %arg1: memref<2x128xf32, #tpu.memory_space<vmem>>, %arg2: memref<2x16xf32, #tpu.memory_space<vmem>>, %arg3: memref<128x1000xf32, #tpu.memory_space<vmem>>, %arg4: memref<1x1000xf32, #tpu.memory_space<vmem>>, %arg5: memref<1000x50xf32, #tpu.memory_space<vmem>>, %arg6: memref<1x50xf32, #tpu.memory_space<vmem>>, %arg7: memref<16x350xf32, #tpu.memory_space<vmem>>, %arg8: memref<1x350xf32, #tpu.memory_space<vmem>>, %arg9: memref<350x350xf32, #tpu.memory_space<vmem>>, %arg10: memref<1x350xf32, #tpu.memory_space<vmem>>, %arg11: memref<350x350xf32, #tpu.memory_space<vmem>>, %arg12: memref<1x350xf32, #tpu.memory_space<vmem>>, %arg13: memref<350x50xf32, #tpu.memory_space<vmem>>, %arg14: memref<1x50xf32, #tpu.memory_space<vmem>>, %arg15: memref<50x6xf32, #tpu.memory_space<vmem>>, %arg16: memref<50x6xf32, #tpu.memory_space<vmem>>, %arg17: memref<1x6xf32, #tpu.memory_space<vmem>>, %arg18: memref<2x6xf32, #tpu.memory_space<vmem>>) attributes {dimension_semantics = [#tpu.dimension_semantics<arbitrary>], iteration_bounds = array<i64: 1>, scalar_prefetch = 0 : i64, scratch_operands = 0 : i64, tpu.core_type = #tpu.core_type<tc>, window_params = [{pipeline_mode = #tpu.pipeline_mode<synchronous>, transform_indices = @transform_0, window_bounds = array<i64: 2, 128>}, {pipeline_mode = #tpu.pipeline_mode<synchronous>, transform_indices = @transform_1, window_bounds = array<i64: 2, 16>}, {pipeline_mode = #tpu.pipeline_mode<synchronous>, transform_indices = @transform_2, window_bounds = array<i64: 128, 1000>}, {pipeline_mode = #tpu.pipeline_mode<synchronous>, transform_indices = @transform_3, window_bounds = array<i64: 1, 1000>}, {pipeline_mode = #tpu.pipeline_mode<synchronous>, transform_indices = @transform_4, window_bounds = array<i64: 1000, 50>}, {pipeline_mode = #tpu.pipeline_mode<synchronous>, transform_indices = @transform_5, window_bounds = array<i64: 1, 50>}, {pipeline_mode = #tpu.pipeline_mode<synchronous>, transform_indices = @transform_6, window_bounds = array<i64: 16, 350>}, {pipeline_mode = #tpu.pipeline_mode<synchronous>, transform_indices = @transform_7, window_bounds = array<i64: 1, 350>}, {pipeline_mode = #tpu.pipeline_mode<synchronous>, transform_indices = @transform_8, window_bounds = array<i64: 350, 350>}, {pipeline_mode = #tpu.pipeline_mode<synchronous>, transform_indices = @transform_9, window_bounds = array<i64: 1, 350>}, {pipeline_mode = #tpu.pipeline_mode<synchronous>, transform_indices = @transform_10, window_bounds = array<i64: 350, 350>}, {pipeline_mode = #tpu.pipeline_mode<synchronous>, transform_indices = @transform_11, window_bounds = array<i64: 1, 350>}, {pipeline_mode = #tpu.pipeline_mode<synchronous>, transform_indices = @transform_12, window_bounds = array<i64: 350, 50>}, {pipeline_mode = #tpu.pipeline_mode<synchronous>, transform_indices = @transform_13, window_bounds = array<i64: 1, 50>}, {pipeline_mode = #tpu.pipeline_mode<synchronous>, transform_indices = @transform_14, window_bounds = array<i64: 50, 6>}, {pipeline_mode = #tpu.pipeline_mode<synchronous>, transform_indices = @transform_15, window_bounds = array<i64: 50, 6>}, {pipeline_mode = #tpu.pipeline_mode<synchronous>, transform_indices = @transform_16, window_bounds = array<i64: 1, 6>}, {pipeline_mode = #tpu.pipeline_mode<synchronous>, transform_indices = @transform_17, window_bounds = array<i64: 2, 6>}]} {
    %c0 = arith.constant 0 : index
    %c0_0 = arith.constant 0 : index
    %0 = vector.load %arg1[%c0, %c0_0] : memref<2x128xf32, #tpu.memory_space<vmem>>, vector<2x128xf32>
    %c0_1 = arith.constant 0 : index
    %c0_2 = arith.constant 0 : index
    %1 = vector.load %arg3[%c0_1, %c0_2] : memref<128x1000xf32, #tpu.memory_space<vmem>>, vector<128x1000xf32>
    %cst = arith.constant dense<0.000000e+00> : vector<2x1000xf32>
    %2 = tpu.matmul %0, %1, %cst {dimension_numbers = #tpu.dot_dimension_numbers<[1], [0], [0], [1], [0, 0, 1, 1], [], []>} : vector<2x128xf32>, vector<128x1000xf32>, vector<2x1000xf32> -> vector<2x1000xf32>
    %c0_3 = arith.constant 0 : index
    %c0_4 = arith.constant 0 : index
    %3 = vector.load %arg4[%c0_3, %c0_4] : memref<1x1000xf32, #tpu.memory_space<vmem>>, vector<1x1000xf32>
    %4 = vector.broadcast %3 : vector<1x1000xf32> to vector<2x1000xf32>
    %5 = arith.addf %2, %4 : vector<2x1000xf32>
    %cst_5 = arith.constant 0.000000e+00 : f32
    %6 = vector.broadcast %cst_5 : f32 to vector<2x1000xf32>
    %7 = arith.maximumf %5, %6 : vector<2x1000xf32>
    %c0_6 = arith.constant 0 : index
    %c0_7 = arith.constant 0 : index
    %8 = vector.load %arg5[%c0_6, %c0_7] : memref<1000x50xf32, #tpu.memory_space<vmem>>, vector<1000x50xf32>
    %cst_8 = arith.constant dense<0.000000e+00> : vector<2x50xf32>
    %9 = tpu.matmul %7, %8, %cst_8 {dimension_numbers = #tpu.dot_dimension_numbers<[1], [0], [0], [1], [0, 0, 1, 1], [], []>} : vector<2x1000xf32>, vector<1000x50xf32>, vector<2x50xf32> -> vector<2x50xf32>
    %c0_9 = arith.constant 0 : index
    %c0_10 = arith.constant 0 : index
    %10 = vector.load %arg6[%c0_9, %c0_10] : memref<1x50xf32, #tpu.memory_space<vmem>>, vector<1x50xf32>
    %11 = vector.broadcast %10 : vector<1x50xf32> to vector<2x50xf32>
    %12 = arith.addf %9, %11 : vector<2x50xf32>
    %cst_11 = arith.constant 0.000000e+00 : f32
    %13 = vector.broadcast %cst_11 : f32 to vector<2x50xf32>
    %14 = arith.maximumf %12, %13 : vector<2x50xf32>
    %c0_12 = arith.constant 0 : index
    %c0_13 = arith.constant 0 : index
    %15 = vector.load %arg2[%c0_12, %c0_13] : memref<2x16xf32, #tpu.memory_space<vmem>>, vector<2x16xf32>
    %c0_14 = arith.constant 0 : index
    %c0_15 = arith.constant 0 : index
    %16 = vector.load %arg7[%c0_14, %c0_15] : memref<16x350xf32, #tpu.memory_space<vmem>>, vector<16x350xf32>
    %cst_16 = arith.constant dense<0.000000e+00> : vector<2x350xf32>
    %17 = tpu.matmul %15, %16, %cst_16 {dimension_numbers = #tpu.dot_dimension_numbers<[1], [0], [0], [1], [0, 0, 1, 1], [], []>} : vector<2x16xf32>, vector<16x350xf32>, vector<2x350xf32> -> vector<2x350xf32>
    %c0_17 = arith.constant 0 : index
    %c0_18 = arith.constant 0 : index
    %18 = vector.load %arg8[%c0_17, %c0_18] : memref<1x350xf32, #tpu.memory_space<vmem>>, vector<1x350xf32>
    %19 = vector.broadcast %18 : vector<1x350xf32> to vector<2x350xf32>
    %20 = arith.addf %17, %19 : vector<2x350xf32>
    %cst_19 = arith.constant 0.000000e+00 : f32
    %21 = vector.broadcast %cst_19 : f32 to vector<2x350xf32>
    %22 = arith.cmpf ogt, %20, %21 : vector<2x350xf32>
    %cst_20 = arith.constant 0.000000e+00 : f32
    %23 = vector.broadcast %cst_20 : f32 to vector<2x350xf32>
    %24 = arith.minimumf %20, %23 : vector<2x350xf32>
    %25 = math.exp %24 : vector<2x350xf32>
    %cst_21 = arith.constant 1.000000e+00 : f32
    %26 = vector.broadcast %cst_21 : f32 to vector<2x350xf32>
    %27 = arith.subf %25, %26 : vector<2x350xf32>
    %28 = arith.select %22, %20, %27 : vector<2x350xi1>, vector<2x350xf32>
    %c0_22 = arith.constant 0 : index
    %c0_23 = arith.constant 0 : index
    %29 = vector.load %arg9[%c0_22, %c0_23] : memref<350x350xf32, #tpu.memory_space<vmem>>, vector<350x350xf32>
    %cst_24 = arith.constant dense<0.000000e+00> : vector<2x350xf32>
    %30 = tpu.matmul %28, %29, %cst_24 {dimension_numbers = #tpu.dot_dimension_numbers<[1], [0], [0], [1], [0, 0, 1, 1], [], []>} : vector<2x350xf32>, vector<350x350xf32>, vector<2x350xf32> -> vector<2x350xf32>
    %c0_25 = arith.constant 0 : index
    %c0_26 = arith.constant 0 : index
    %31 = vector.load %arg10[%c0_25, %c0_26] : memref<1x350xf32, #tpu.memory_space<vmem>>, vector<1x350xf32>
    %32 = vector.broadcast %31 : vector<1x350xf32> to vector<2x350xf32>
    %33 = arith.addf %30, %32 : vector<2x350xf32>
    %cst_27 = arith.constant 0.000000e+00 : f32
    %34 = vector.broadcast %cst_27 : f32 to vector<2x350xf32>
    %35 = arith.cmpf ogt, %33, %34 : vector<2x350xf32>
    %cst_28 = arith.constant 0.000000e+00 : f32
    %36 = vector.broadcast %cst_28 : f32 to vector<2x350xf32>
    %37 = arith.minimumf %33, %36 : vector<2x350xf32>
    %38 = math.exp %37 : vector<2x350xf32>
    %cst_29 = arith.constant 1.000000e+00 : f32
    %39 = vector.broadcast %cst_29 : f32 to vector<2x350xf32>
    %40 = arith.subf %38, %39 : vector<2x350xf32>
    %41 = arith.select %35, %33, %40 : vector<2x350xi1>, vector<2x350xf32>
    %c0_30 = arith.constant 0 : index
    %c0_31 = arith.constant 0 : index
    %42 = vector.load %arg11[%c0_30, %c0_31] : memref<350x350xf32, #tpu.memory_space<vmem>>, vector<350x350xf32>
    %cst_32 = arith.constant dense<0.000000e+00> : vector<2x350xf32>
    %43 = tpu.matmul %41, %42, %cst_32 {dimension_numbers = #tpu.dot_dimension_numbers<[1], [0], [0], [1], [0, 0, 1, 1], [], []>} : vector<2x350xf32>, vector<350x350xf32>, vector<2x350xf32> -> vector<2x350xf32>
    %c0_33 = arith.constant 0 : index
    %c0_34 = arith.constant 0 : index
    %44 = vector.load %arg12[%c0_33, %c0_34] : memref<1x350xf32, #tpu.memory_space<vmem>>, vector<1x350xf32>
    %45 = vector.broadcast %44 : vector<1x350xf32> to vector<2x350xf32>
    %46 = arith.addf %43, %45 : vector<2x350xf32>
    %cst_35 = arith.constant 0.000000e+00 : f32
    %47 = vector.broadcast %cst_35 : f32 to vector<2x350xf32>
    %48 = arith.cmpf ogt, %46, %47 : vector<2x350xf32>
    %cst_36 = arith.constant 0.000000e+00 : f32
    %49 = vector.broadcast %cst_36 : f32 to vector<2x350xf32>
    %50 = arith.minimumf %46, %49 : vector<2x350xf32>
    %51 = math.exp %50 : vector<2x350xf32>
    %cst_37 = arith.constant 1.000000e+00 : f32
    %52 = vector.broadcast %cst_37 : f32 to vector<2x350xf32>
    %53 = arith.subf %51, %52 : vector<2x350xf32>
    %54 = arith.select %48, %46, %53 : vector<2x350xi1>, vector<2x350xf32>
    %c0_38 = arith.constant 0 : index
    %c0_39 = arith.constant 0 : index
    %55 = vector.load %arg13[%c0_38, %c0_39] : memref<350x50xf32, #tpu.memory_space<vmem>>, vector<350x50xf32>
    %cst_40 = arith.constant dense<0.000000e+00> : vector<2x50xf32>
    %56 = tpu.matmul %54, %55, %cst_40 {dimension_numbers = #tpu.dot_dimension_numbers<[1], [0], [0], [1], [0, 0, 1, 1], [], []>} : vector<2x350xf32>, vector<350x50xf32>, vector<2x50xf32> -> vector<2x50xf32>
    %c0_41 = arith.constant 0 : index
    %c0_42 = arith.constant 0 : index
    %57 = vector.load %arg14[%c0_41, %c0_42] : memref<1x50xf32, #tpu.memory_space<vmem>>, vector<1x50xf32>
    %58 = vector.broadcast %57 : vector<1x50xf32> to vector<2x50xf32>
    %59 = arith.addf %56, %58 : vector<2x50xf32>
    %c0_43 = arith.constant 0 : index
    %c0_44 = arith.constant 0 : index
    %60 = vector.load %arg15[%c0_43, %c0_44] : memref<50x6xf32, #tpu.memory_space<vmem>>, vector<50x6xf32>
    %cst_45 = arith.constant dense<0.000000e+00> : vector<2x6xf32>
    %61 = tpu.matmul %14, %60, %cst_45 {dimension_numbers = #tpu.dot_dimension_numbers<[1], [0], [0], [1], [0, 0, 1, 1], [], []>} : vector<2x50xf32>, vector<50x6xf32>, vector<2x6xf32> -> vector<2x6xf32>
    %c0_46 = arith.constant 0 : index
    %c0_47 = arith.constant 0 : index
    %62 = vector.load %arg16[%c0_46, %c0_47] : memref<50x6xf32, #tpu.memory_space<vmem>>, vector<50x6xf32>
    %cst_48 = arith.constant dense<0.000000e+00> : vector<2x6xf32>
    %63 = tpu.matmul %59, %62, %cst_48 {dimension_numbers = #tpu.dot_dimension_numbers<[1], [0], [0], [1], [0, 0, 1, 1], [], []>} : vector<2x50xf32>, vector<50x6xf32>, vector<2x6xf32> -> vector<2x6xf32>
    %64 = arith.addf %61, %63 : vector<2x6xf32>
    %c0_49 = arith.constant 0 : index
    %c0_50 = arith.constant 0 : index
    %65 = vector.load %arg17[%c0_49, %c0_50] : memref<1x6xf32, #tpu.memory_space<vmem>>, vector<1x6xf32>
    %66 = vector.broadcast %65 : vector<1x6xf32> to vector<2x6xf32>
    %67 = arith.addf %64, %66 : vector<2x6xf32>
    %cst_51 = arith.constant 0.000000e+00 : f32
    %cst_52 = arith.constant 1.100000e+02 : f32
    %68 = vector.broadcast %cst_51 : f32 to vector<2x6xf32>
    %69 = arith.maximumf %68, %67 : vector<2x6xf32>
    %70 = vector.broadcast %cst_52 : f32 to vector<2x6xf32>
    %71 = arith.minimumf %70, %69 : vector<2x6xf32>
    %c0_53 = arith.constant 0 : index
    %c0_54 = arith.constant 0 : index
    %72 = vector.load %arg18[%c0_53, %c0_54] : memref<2x6xf32, #tpu.memory_space<vmem>>, vector<2x6xf32>
    tpu.vector_store %arg18[%c0_53, %c0_54], %71 {strides = array<i32>} : memref<2x6xf32, #tpu.memory_space<vmem>>, vector<2x6xf32>,
    return
  }
  func.func @transform_0(%arg0: i32) -> (i32, i32) {
    %c0_i32 = arith.constant 0 : i32
    %c0_i32_0 = arith.constant 0 : i32
    %c0_i32_1 = arith.constant 0 : i32
    return %c0_i32, %c0_i32_0 : i32, i32
  }
  func.func @transform_1(%arg0: i32) -> (i32, i32) {
    %c0_i32 = arith.constant 0 : i32
    %c0_i32_0 = arith.constant 0 : i32
    %c0_i32_1 = arith.constant 0 : i32
    return %c0_i32, %c0_i32_0 : i32, i32
  }
  func.func @transform_2(%arg0: i32) -> (i32, i32) {
    %c0_i32 = arith.constant 0 : i32
    %c0_i32_0 = arith.constant 0 : i32
    %c0_i32_1 = arith.constant 0 : i32
    return %c0_i32, %c0_i32_0 : i32, i32
  }
  func.func @transform_3(%arg0: i32) -> (i32, i32) {
    %c0_i32 = arith.constant 0 : i32
    %c0_i32_0 = arith.constant 0 : i32
    %c0_i32_1 = arith.constant 0 : i32
    return %c0_i32, %c0_i32_0 : i32, i32
  }
  func.func @transform_4(%arg0: i32) -> (i32, i32) {
    %c0_i32 = arith.constant 0 : i32
    %c0_i32_0 = arith.constant 0 : i32
    %c0_i32_1 = arith.constant 0 : i32
    return %c0_i32, %c0_i32_0 : i32, i32
  }
  func.func @transform_5(%arg0: i32) -> (i32, i32) {
    %c0_i32 = arith.constant 0 : i32
    %c0_i32_0 = arith.constant 0 : i32
    %c0_i32_1 = arith.constant 0 : i32
    return %c0_i32, %c0_i32_0 : i32, i32
  }
  func.func @transform_6(%arg0: i32) -> (i32, i32) {
    %c0_i32 = arith.constant 0 : i32
    %c0_i32_0 = arith.constant 0 : i32
    %c0_i32_1 = arith.constant 0 : i32
    return %c0_i32, %c0_i32_0 : i32, i32
  }
  func.func @transform_7(%arg0: i32) -> (i32, i32) {
    %c0_i32 = arith.constant 0 : i32
    %c0_i32_0 = arith.constant 0 : i32
    %c0_i32_1 = arith.constant 0 : i32
    return %c0_i32, %c0_i32_0 : i32, i32
  }
  func.func @transform_8(%arg0: i32) -> (i32, i32) {
    %c0_i32 = arith.constant 0 : i32
    %c0_i32_0 = arith.constant 0 : i32
    %c0_i32_1 = arith.constant 0 : i32
    return %c0_i32, %c0_i32_0 : i32, i32
  }
  func.func @transform_9(%arg0: i32) -> (i32, i32) {
    %c0_i32 = arith.constant 0 : i32
    %c0_i32_0 = arith.constant 0 : i32
    %c0_i32_1 = arith.constant 0 : i32
    return %c0_i32, %c0_i32_0 : i32, i32
  }
  func.func @transform_10(%arg0: i32) -> (i32, i32) {
    %c0_i32 = arith.constant 0 : i32
    %c0_i32_0 = arith.constant 0 : i32
    %c0_i32_1 = arith.constant 0 : i32
    return %c0_i32, %c0_i32_0 : i32, i32
  }
  func.func @transform_11(%arg0: i32) -> (i32, i32) {
    %c0_i32 = arith.constant 0 : i32
    %c0_i32_0 = arith.constant 0 : i32
    %c0_i32_1 = arith.constant 0 : i32
    return %c0_i32, %c0_i32_0 : i32, i32
  }
  func.func @transform_12(%arg0: i32) -> (i32, i32) {
    %c0_i32 = arith.constant 0 : i32
    %c0_i32_0 = arith.constant 0 : i32
    %c0_i32_1 = arith.constant 0 : i32
    return %c0_i32, %c0_i32_0 : i32, i32
  }
  func.func @transform_13(%arg0: i32) -> (i32, i32) {
    %c0_i32 = arith.constant 0 : i32
    %c0_i32_0 = arith.constant 0 : i32
    %c0_i32_1 = arith.constant 0 : i32
    return %c0_i32, %c0_i32_0 : i32, i32
  }
  func.func @transform_14(%arg0: i32) -> (i32, i32) {
    %c0_i32 = arith.constant 0 : i32
    %c0_i32_0 = arith.constant 0 : i32
    %c0_i32_1 = arith.constant 0 : i32
    return %c0_i32, %c0_i32_0 : i32, i32
  }
  func.func @transform_15(%arg0: i32) -> (i32, i32) {
    %c0_i32 = arith.constant 0 : i32
    %c0_i32_0 = arith.constant 0 : i32
    %c0_i32_1 = arith.constant 0 : i32
    return %c0_i32, %c0_i32_0 : i32, i32
  }
  func.func @transform_16(%arg0: i32) -> (i32, i32) {
    %c0_i32 = arith.constant 0 : i32
    %c0_i32_0 = arith.constant 0 : i32
    %c0_i32_1 = arith.constant 0 : i32
    return %c0_i32, %c0_i32_0 : i32, i32
  }
  func.func @transform_17(%arg0: i32) -> (i32, i32) {
    %c0_i32 = arith.constant 0 : i32
    %c0_i32_0 = arith.constant 0 : i32
    %c0_i32_1 = arith.constant 0 : i32
    return %c0_i32, %c0_i32_0 : i32, i32
  }
}

</mosaic_0001>

<bundles_post_ra>
// kernel: trac_gcn_forward.2
= control target key start
LH: loop header
LB: loop body
LE: loop exit
PB: predicated region body
PF: predicated region fallthrough
CT: control target
= control target key end

     0   :  { %11 = vsyncpa [#allocation3], 0  ;;  %s2280_s0 = inlined_call_operand.vmem [shape: f32[32,1], index: 0, kind: input, shape index: {}]   ;;  %s2281_s1 = inlined_call_operand.vmem [shape: f32[32,32], index: 1, kind: input, shape index: {}]   ;;  %s2282_s2 = inlined_call_operand.hbm [shape: f32[5,1,8], index: 2, kind: input, shape index: {}]   ;;  %s2283_s3 = inlined_call_operand.hbm [shape: f32[1,8], index: 3, kind: input, shape index: {}]   ;;  %s2284_s4 = inlined_call_operand.hbm [shape: f32[5,8,8], index: 4, kind: input, shape index: {}]   ;;  %s2285_s5 = inlined_call_operand.hbm [shape: f32[1,8], index: 5, kind: input, shape index: {}]   ;;  %s2286_s6 = inlined_call_operand.vmem [shape: f32[32,8], index: 6, kind: output, shape index: {}]  }
   0x1   :  { %12 = vsyncpa [#allocation5], 0 }
   0x2   :  { %13 = vsyncpa [#allocation8], 0  ;;  %s2033_s21 = smov [#allocation4]   ;;  %s2034_s23 = smov [#allocation2]  }
   0x3   :  { %s36_s22 = sshll.u32 %s2033_s21, 4  ;;  %s23_s24 = sshll.u32 %s2034_s23, 4  ;;  %s37_s22 = int_to_ptr.vmem [resolvable:$true] %s36_s22  ;;  %s2077_s24 = int_to_ptr.vmem [resolvable:$true] %s23_s24 }
   0x4   :  { %s1939_s27 = scalar_lea.hbm %s2283_s3, 16 }
   0x5   :  { %p1940_p0 = scmp.ne.s32.totalorder %s2283_s3, %s1939_s27  ;;  %p1943_p1 = scmp.lt.u32.totalorder %s1939_s27, %s2283_s3 }
   0x7   :  { %p1945_p2 = pnand %p1943_p1, %p1940_p0 }
   0x9   :  { %1948 = shalt.err (!%p1945_p2)
}
   0xa   :  { %s1949_s8 = scalar_lea.vmem %s37_s22, 16  ;;  %s1953_s9 = scalar_lea.vmem %s37_s22, 32 }
   0xb   :  { %p1950_p3 = scmp.ne.s32.totalorder %s37_s22, %s1949_s8  ;;  %p1954_p4 = scmp.lt.s32.totalorder %s37_s22, %s37_s22 }
   0xc   :  { %p1955_p5 = scmp.lt.s32.totalorder %s1953_s9, %s1949_s8 }
   0xe   :  { %p1956_p6 = por %p1955_p5, %p1954_p4 }
  0x10   :  { %p1957_p7 = pnand %p1956_p6, %p1950_p3 }
  0x12   :  { %1960 = shalt.err (!%p1957_p7)
}
  0x13   :  { %39 = dma.hbm_to_vmem [thread:$0]  %s2283_s3, 16, %s37_s22, [#allocation5]  }
  0x14   :  { %s1961_s14 = scalar_lea.hbm %s2282_s2, 80 }
  0x15   :  { %p1962_p8 = scmp.ne.s32.totalorder %s2282_s2, %s1961_s14  ;;  %p1965_p9 = scmp.lt.u32.totalorder %s1961_s14, %s2282_s2 }
  0x17   :  { %p1967_p10 = pnand %p1965_p9, %p1962_p8 }
  0x19   :  { %1970 = shalt.err (!%p1967_p10)
}
  0x1a   :  { %s1971_s19 = scalar_lea.vmem %s2077_s24, 80  ;;  %s1975_s3 = scalar_lea.vmem %s2077_s24, 96 }
  0x1b   :  { %p1972_p11 = scmp.ne.s32.totalorder %s2077_s24, %s1971_s19  ;;  %p1976_p12 = scmp.lt.s32.totalorder %s2077_s24, %s2077_s24 }
  0x1c   :  { %p1977_p13 = scmp.lt.s32.totalorder %s1975_s3, %s1971_s19 }
  0x1e   :  { %p1978_p0 = por %p1977_p13, %p1976_p12 }
  0x20   :  { %p1979_p1 = pnand %p1978_p0, %p1972_p11 }
  0x22   :  { %1982 = shalt.err (!%p1979_p1)
}
  0x23   :  { %s2035_s20 = smov 16   ;;  %s2036_s21 = smov 1  }
  0x24   :  { %29 = dma.hbm_to_vmem [thread:$0]  %s2282_s2, 80, %s2077_s24, [#allocation3], %s2035_s20, %s2035_s20, %s2036_s21  }
  0x25   :  { %s2037_s25 = smov [#allocation6]   ;;  %s1983_s29 = scalar_lea.hbm %s2284_s4, 640 }
  0x26   :  { %s45_s26 = sshll.u32 %s2037_s25, 4  ;;  %p1984_p2 = scmp.ne.s32.totalorder %s2284_s4, %s1983_s29  ;;  %s46_s26 = int_to_ptr.vmem [resolvable:$true] %s45_s26 }
  0x27   :  { %p1987_p3 = scmp.lt.u32.totalorder %s1983_s29, %s2284_s4 }
  0x29   :  { %p1989_p4 = pnand %p1987_p3, %p1984_p2 }
  0x2b   :  { %1992 = shalt.err (!%p1989_p4)
}
  0x2c   :  { %s1993_s10 = scalar_lea.vmem %s46_s26, 640  ;;  %p1998_p6 = scmp.lt.s32.totalorder %s46_s26, %s46_s26 }
  0x2d   :  { %p1994_p5 = scmp.ne.s32.totalorder %s46_s26, %s1993_s10  ;;  %p1999_p7 = scmp.lt.s32.totalorder %s1993_s10, %s1993_s10 }
  0x2f   :  { %p2000_p8 = por %p1999_p7, %p1998_p6 }
  0x31   :  { %p2001_p9 = pnand %p2000_p8, %p1994_p5 }
  0x33   :  { %2004 = shalt.err (!%p2001_p9)
}
  0x34   :  { %s2038_s2 = smov 128   ;;  %s2039_s24 = smov 8  }
  0x35   :  { %51 = dma.hbm_to_vmem [thread:$0]  %s2284_s4, 640, %s46_s26, [#allocation5], %s2038_s2, %s2038_s2, %s2039_s24  }
  0x36   :  { %s2040_s13 = smov [#allocation7]   ;;  %s2005_s17 = scalar_lea.hbm %s2285_s5, 16 }
  0x37   :  { %s58_s14 = sshll.u32 %s2040_s13, 4  ;;  %p2006_p10 = scmp.ne.s32.totalorder %s2285_s5, %s2005_s17  ;;  %s59_s14 = int_to_ptr.vmem [resolvable:$true] %s58_s14 }
  0x38   :  { %p2009_p11 = scmp.lt.u32.totalorder %s2005_s17, %s2285_s5 }
  0x3a   :  { %p2011_p12 = pnand %p2009_p11, %p2006_p10 }
  0x3c   :  { %2014 = shalt.err (!%p2011_p12)
}
  0x3d   :  { %s2015_s21 = scalar_lea.vmem %s59_s14, 16  ;;  %s2019_s4 = scalar_lea.vmem %s59_s14, 32 }
  0x3e   :  { %p2016_p13 = scmp.ne.s32.totalorder %s59_s14, %s2015_s21  ;;  %p2020_p0 = scmp.lt.s32.totalorder %s59_s14, %s59_s14 }
  0x3f   :  { %p2021_p1 = scmp.lt.s32.totalorder %s2019_s4, %s2015_s21 }
  0x41   :  { %p2022_p2 = por %p2021_p1, %p2020_p0 }
  0x43   :  { %p2023_p3 = pnand %p2022_p2, %p2016_p13 }
  0x45   :  { %2026 = shalt.err (!%p2023_p3)
}
  0x46   :  { %61 = dma.hbm_to_vmem [thread:$0]  %s2285_s5, 16, %s59_s14, [#allocation8]  }
  0x47   :  { %2027 = dma.done.wait [#allocation3], 80  }
  0x48   :  { %2028 = vsyncadd [#allocation3], 4294967216 }
  0x49   :  { %2029 = dma.done.wait [#allocation5], 656  }
  0x4a   :  { %2030 = vsyncadd [#allocation5], 4294966640 }
  0x4b   :  { %2031 = dma.done.wait [#allocation8], 16  }
  0x4c   :  { %2032 = vsyncadd [#allocation8], 4294967280  ;;  %v2041_v0 = vmov 0   ;;  %vm82_vm0 = vcmask 261120   ;;  %v78_v1 = vld [vmem:[%s2280_s0] sm:$0xff]  ;;  %v79_v2 = vld [vmem:[%s2280_s0 + $0x8] sm:$0xff] }
  0x4d   :  { %1937 = vset.pattern.permute.xlu0 %v2041_v0  ;;  %1938 = vset.pattern.permute.xlu1 %v2041_v0  ;;  %v80_v3 = vld [vmem:[%s2280_s0 + $0x10] sm:$0xff]  ;;  %v1846_v4 = vpack.c.bf16 %v79_v2, %v78_v1  ;;  %v81_v5 = vld [vmem:[%s2280_s0 + $0x18] sm:$0xff]  ;;  %v2148_v6 = vld [vmem:[%s2281_s1] sm:$0xff]  ;;  %vm737_vm1 = vcmask 64512  }
  0x4e   :  { %183 = vperm.xlu0 %1937, %v78_v1   ;;  %v1850_v7 = vpack.c.bf16 %v81_v5, %v80_v3  ;;  %1702 = vmatprep.mubr.msk.f32.mxu0 %vm82_vm0, %v2148_v6  ;;  %v2157_v8 = vld [vmem:[%s2281_s1 + $0x8] sm:$0xff]  ;;  %v2162_v9 = vld [vmem:[%s2281_s1 + $0x10] sm:$0xff]  ;;  %v2171_v10 = vld [vmem:[%s2281_s1 + $0x18] sm:$0xff] }
  0x4f   :  { %198 = vperm.xlu1 %1938, %v81_v5   ;;  %1847 = vmatprep.subr.bf16.mxu0 %v1846_v4 }
  0x50   :  { %1716 = vmatprep.mubr.msk.f32.mxu1 %vm82_vm0, %v2148_v6  ;;  %1849 = vmatpush3.bf16.msra.mxu0 %v1846_v4 }
  0x51   :  { %1851 = vmatprep.subr.bf16.mxu0 %v1850_v7 }
  0x52   :  { %188 = vperm.xlu0 %1937, %v79_v2  }
  0x54   :  { %1853 = vmatpush3.bf16.msra.mxu0 %v1850_v7  ;;  %v1551_v7 = vld [vmem:[#allocation2 + $0x1] ss:$0 sm:$0xff] }
  0x56   :  { %193 = vperm.xlu0 %1937, %v80_v3  }
  0x57   :  { %1703 = vmatmul.mubr.msk.f32.vlgmr.msra.gmra.mrb[0].mxu0 %vm82_vm0, %v2157_v8 }
  0x58   :  { %1705 = vmatprep.mubr.msk.f32.mxu0 %vm82_vm0, %v2162_v9 }
  0x5b   :  { %1706 = vmatmul.mubr.msk.f32.gmra.mrb[2].mxu0 %vm82_vm0, %v2171_v10 }
  0x5c   :  { %1730 = vmatprep.mubr.msk.f32.mxu0 %vm82_vm0, %v2148_v6 }
  0xcd   :  { %v184_v58 = vpop.permute.xlu0 %183 }
  0xce   :  { %v199_v57 = vpop.permute.xlu1 %198 }
  0xd1   :  { %v189_v60 = vpop.permute.xlu0 %188 }
  0xd5   :  { %v194_v62 = vpop.permute.xlu0 %193 }
 0x12a   :  { %v1704_v11 = vpop.f32.mrb[0].mxu0 }
 0x12b   :  { %220 = vperm.xlu1 %1938, %v1704_v11   ;;  %v161_v12 = vpop.f32.mrb[1].mxu0 }
 0x12c   :  { %v1854_v13 = vpack.c.bf16 %v1704_v11, %v161_v12 }
 0x12e   :  { %v1707_v14 = vpop.f32.mrb[2].mxu0  ;;  %1855 = vmatprep.subr.bf16.mxu1 %v1854_v13 }
 0x12f   :  { %215 = vperm.xlu1 %1938, %v161_v12   ;;  %v171_v15 = vpop.f32.mrb[3].mxu0  ;;  %1857 = vmatpush3.bf16.msra.mxu1 %v1854_v13  ;;  %v1556_v13 = vld [vmem:[#allocation2 + $0x2] ss:$0 sm:$0xff] }
 0x130   :  { %v1858_v16 = vpack.c.bf16 %v1707_v14, %v171_v15  ;;  %225 = vperm.xlu0 %1937, %v171_v15  }
 0x132   :  { %1859 = vmatprep.subr.bf16.mxu1 %v1858_v16 }
 0x133   :  { %230 = vperm.xlu1 %1938, %v1707_v14   ;;  %1861 = vmatpush3.bf16.msra.mxu1 %v1858_v16 }
 0x136   :  { %1717 = vmatmul.mubr.msk.f32.vlgmr.msra.gmra.mrb[0].mxu1 %vm82_vm0, %v2157_v8 }
 0x137   :  { %1719 = vmatprep.mubr.msk.f32.mxu1 %vm82_vm0, %v2162_v9 }
 0x13a   :  { %1720 = vmatmul.mubr.msk.f32.gmra.mrb[2].mxu1 %vm82_vm0, %v2171_v10 }
 0x13b   :  { %1744 = vmatprep.mubr.msk.f32.mxu1 %vm82_vm0, %v2148_v6 }
 0x1aa   :  { %v221_v59 = vpop.permute.xlu1 %220 }
 0x1ae   :  { %v216_v61 = vpop.permute.xlu1 %215 }
 0x1af   :  { %v226_v0 = vpop.permute.xlu0 %225 }
 0x1b2   :  { %v231_v63 = vpop.permute.xlu1 %230 }
 0x209   :  { %v1718_v17 = vpop.f32.mrb[0].mxu1 }
 0x20a   :  { %v333_v18 = vmul.f32 2.0, %v1718_v17  ;;  %v313_v19 = vpop.f32.mrb[1].mxu1  ;;  %v239_v17 = vmul.f32 %v1551_v7, %v216_v61 }
 0x20b   :  { %v332_v20 = vmul.f32 2.0, %v313_v19 }
 0x20c   :  { %v337_v21 = vsub.f32 %v333_v18, %v79_v2  ;;  %v1561_v18 = vld [vmem:[#allocation2 + $0x3] ss:$0 sm:$0xff] }
 0x20d   :  { %v336_v22 = vsub.f32 %v332_v20, %v78_v1  ;;  %v1721_v23 = vpop.f32.mrb[2].mxu1 }
 0x20e   :  { %v335_v24 = vmul.f32 2.0, %v1721_v23  ;;  %349 = vperm.xlu1 %1938, %v337_v21   ;;  %v323_v25 = vpop.f32.mrb[3].mxu1 }
 0x20f   :  { %v334_v26 = vmul.f32 2.0, %v323_v25  ;;  %344 = vperm.xlu0 %1937, %v336_v22   ;;  %v1862_v27 = vpack.c.bf16 %v337_v21, %v336_v22 }
 0x210   :  { %v339_v28 = vsub.f32 %v335_v24, %v81_v5  ;;  %v1550_v5 = vld [vmem:[#allocation2] ss:$0 sm:$0xff]  ;;  %v242_v24 = vmul.f32 %v1551_v7, %v231_v63 }
 0x211   :  { %v338_v29 = vsub.f32 %v334_v26, %v80_v3  ;;  %1863 = vmatprep.subr.bf16.mxu0 %v1862_v27  ;;  %v207_v16 = vmul.f32 %v1550_v5, %v184_v58 }
 0x212   :  { %1865 = vmatpush3.bf16.msra.mxu0 %v1862_v27  ;;  %359 = vperm.xlu1 %1938, %v339_v28   ;;  %v209_v27 = vmul.f32 %v1550_v5, %v194_v62 }
 0x213   :  { %354 = vperm.xlu0 %1937, %v338_v29   ;;  %v1866_v30 = vpack.c.bf16 %v339_v28, %v338_v29 }
 0x215   :  { %1867 = vmatprep.subr.bf16.mxu0 %v1866_v30 }
 0x216   :  { %1869 = vmatpush3.bf16.msra.mxu0 %v1866_v30 }
 0x219   :  { %1731 = vmatmul.mubr.msk.f32.vlgmr.msra.gmra.mrb[4].mxu0 %vm82_vm0, %v2157_v8 }
 0x21a   :  { %1733 = vmatprep.mubr.msk.f32.mxu0 %vm82_vm0, %v2162_v9 }
 0x21d   :  { %1734 = vmatmul.mubr.msk.f32.gmra.mrb[6].mxu0 %vm82_vm0, %v2171_v10 }
 0x21e   :  { %1758 = vmatprep.mubr.msk.f32.mxu0 %vm82_vm0, %v2148_v6 }
 0x28d   :  { %v350_v1 = vpop.permute.xlu1 %349 }
 0x28e   :  { %v345_v2 = vpop.permute.xlu0 %344  ;;  %v369_v19 = vmul.f32 %v1556_v13, %v350_v1 }
 0x28f   :  { %v368_v20 = vmul.f32 %v1556_v13, %v345_v2 }
 0x291   :  { %v360_v3 = vpop.permute.xlu1 %359 }
 0x292   :  { %v355_v4 = vpop.permute.xlu0 %354 }
 0x2ec   :  { %v1732_v31 = vpop.f32.mrb[4].mxu0 }
 0x2ed   :  { %v462_v32 = vmul.f32 2.0, %v1732_v31  ;;  %v442_v33 = vpop.f32.mrb[5].mxu0  ;;  %v1566_v31 = vld [vmem:[#allocation2 + $0x4] ss:$0 sm:$0xff] }
 0x2ee   :  { %v461_v34 = vmul.f32 2.0, %v442_v33  ;;  %v371_v33 = vmul.f32 %v1556_v13, %v360_v3 }
 0x2ef   :  { %v466_v35 = vsub.f32 %v462_v32, %v1704_v11 }
 0x2f0   :  { %v465_v36 = vsub.f32 %v461_v34, %v161_v12  ;;  %v1735_v37 = vpop.f32.mrb[6].mxu0 }
 0x2f1   :  { %v464_v38 = vmul.f32 2.0, %v1735_v37  ;;  %478 = vperm.xlu1 %1938, %v466_v35   ;;  %v452_v39 = vpop.f32.mrb[7].mxu0 }
 0x2f2   :  { %v463_v40 = vmul.f32 2.0, %v452_v39  ;;  %473 = vperm.xlu0 %1937, %v465_v36   ;;  %v1870_v41 = vpack.c.bf16 %v466_v35, %v465_v36  ;;  %v370_v35 = vmul.f32 %v1556_v13, %v355_v4 }
 0x2f3   :  { %v468_v42 = vsub.f32 %v464_v38, %v1707_v14  ;;  %v208_v14 = vmul.f32 %v1550_v5, %v189_v60 }
 0x2f4   :  { %v467_v43 = vsub.f32 %v463_v40, %v171_v15  ;;  %1871 = vmatprep.subr.bf16.mxu1 %v1870_v41  ;;  %v240_v15 = vmul.f32 %v1551_v7, %v221_v59 }
 0x2f5   :  { %1873 = vmatpush3.bf16.msra.mxu1 %v1870_v41  ;;  %488 = vperm.xlu1 %1938, %v468_v42  }
 0x2f6   :  { %483 = vperm.xlu0 %1937, %v467_v43   ;;  %v1874_v44 = vpack.c.bf16 %v468_v42, %v467_v43  ;;  %v244_v23 = vadd.f32 %v240_v15, %v208_v14 }
 0x2f8   :  { %1875 = vmatprep.subr.bf16.mxu1 %v1874_v44  ;;  %v373_v32 = vadd.f32 %v369_v19, %v244_v23 }
 0x2f9   :  { %1877 = vmatpush3.bf16.msra.mxu1 %v1874_v44 }
 0x2fc   :  { %1745 = vmatmul.mubr.msk.f32.vlgmr.msra.gmra.mrb[4].mxu1 %vm82_vm0, %v2157_v8 }
 0x2fd   :  { %1747 = vmatprep.mubr.msk.f32.mxu1 %vm82_vm0, %v2162_v9 }
 0x300   :  { %1748 = vmatmul.mubr.msk.f32.gmra.mrb[6].mxu1 %vm82_vm0, %v2171_v10 }
 0x370   :  { %v479_v11 = vpop.permute.xlu1 %478 }
 0x371   :  { %v474_v12 = vpop.permute.xlu0 %473  ;;  %v498_v25 = vmul.f32 %v1561_v18, %v479_v11 }
 0x372   :  { %v497_v30 = vmul.f32 %v1561_v18, %v474_v12 }
 0x373   :  { %v502_v38 = vadd.f32 %v498_v25, %v373_v32  ;;  %v1222_v32 = vld [vmem:[#allocation6 + $0x18] sm:$0xff] }
 0x375   :  { %v484_v26 = vpop.permute.xlu0 %483 }
 0x376   :  { %v499_v44 = vmul.f32 %v1561_v18, %v484_v26 }
 0x3cf   :  { %v1746_v45 = vpop.f32.mrb[4].mxu1 }
 0x3d0   :  { %v591_v46 = vmul.f32 2.0, %v1746_v45  ;;  %v571_v47 = vpop.f32.mrb[5].mxu1  ;;  %v1567_v45 = vld [vmem:[#allocation4] ss:$0 sm:$0xff] }
 0x3d1   :  { %v590_v48 = vmul.f32 2.0, %v571_v47 }
 0x3d2   :  { %v595_v49 = vsub.f32 %v591_v46, %v337_v21  ;;  %v489_v21 = vpop.permute.xlu1 %488 }
 0x3d3   :  { %v594_v50 = vsub.f32 %v590_v48, %v336_v22  ;;  %v1749_v51 = vpop.f32.mrb[6].mxu1  ;;  %v210_v22 = vmul.f32 %v1550_v5, %v199_v57  ;;  %v500_v39 = vmul.f32 %v1561_v18, %v489_v21  ;;  %v736_v5 = vld [vmem:[#allocation6 + $0x8] sm:$0xff] }
 0x3d4   :  { %v593_v52 = vmul.f32 2.0, %v1749_v51  ;;  %607 = vperm.xlu1 %1938, %v595_v49   ;;  %v581_v53 = vpop.f32.mrb[7].mxu1  ;;  %1764 = vmatprep.subr.mxu1 %v736_v5 }
 0x3d5   :  { %v592_v54 = vmul.f32 2.0, %v581_v53  ;;  %602 = vperm.xlu0 %1937, %v594_v50   ;;  %v246_v37 = vadd.f32 %v242_v24, %v210_v22  ;;  %1765 = vmatpush3.msra.mxu1 %v736_v5 }
 0x3d6   :  { %v597_v55 = vsub.f32 %v593_v52, %v339_v28  ;;  %v243_v28 = vadd.f32 %v239_v17, %v207_v16  ;;  %v1026_v17 = vld [vmem:[#allocation6 + $0x10] sm:$0xff] }
 0x3d7   :  { %v596_v56 = vsub.f32 %v592_v54, %v338_v29  ;;  %v241_v29 = vmul.f32 %v1551_v7, %v226_v0  ;;  %v375_v47 = vadd.f32 %v371_v33, %v246_v37  ;;  %v734_v7 = vld [vmem:[#allocation6] sm:$0xff] }
 0x3d8   :  { %617 = vperm.xlu1 %1938, %v597_v55   ;;  %v372_v34 = vadd.f32 %v368_v20, %v243_v28  ;;  %1772 = vmatprep.subr.mxu1 %v734_v7 }
 0x3d9   :  { %612 = vperm.xlu0 %1937, %v596_v56   ;;  %v245_v42 = vadd.f32 %v241_v29, %v209_v27  ;;  %v504_v52 = vadd.f32 %v500_v39, %v375_v47 }
 0x3da   :  { %v501_v43 = vadd.f32 %v497_v30, %v372_v34 }
 0x3db   :  { %v374_v49 = vadd.f32 %v370_v35, %v245_v42 }
 0x3dd   :  { %v503_v56 = vadd.f32 %v499_v44, %v374_v49 }
 0x453   :  { %v608_v36 = vpop.permute.xlu1 %607 }
 0x454   :  { %v627_v40 = vmul.f32 %v1566_v31, %v608_v36  ;;  %v603_v41 = vpop.permute.xlu0 %602 }
 0x455   :  { %v626_v46 = vmul.f32 %v1566_v31, %v603_v41 }
 0x456   :  { %v631_v48 = vadd.f32 %v627_v40, %v502_v38 }
 0x457   :  { %v630_v50 = vadd.f32 %v626_v46, %v501_v43  ;;  %v618_v51 = vpop.permute.xlu1 %617  ;;  %v1418_v46 = vld [vmem:[#allocation6 + $0x20] sm:$0xff] }
 0x458   :  { %v642_v53 = vadd.f32 %v1567_v45, %v631_v48  ;;  %v629_v54 = vmul.f32 %v1566_v31, %v618_v51  ;;  %v613_v55 = vpop.permute.xlu0 %612 }
 0x459   :  { %v641_v57 = vadd.f32 %v1567_v45, %v630_v50  ;;  %v628_v58 = vmul.f32 %v1566_v31, %v613_v55 }
 0x45a   :  { %v646_v59 = vmax.f32 %v642_v53, 0.0  ;;  %v633_v60 = vadd.f32 %v629_v54, %v504_v52 }
 0x45b   :  { %v645_v61 = vmax.f32 %v641_v57, 0.0  ;;  %v632_v62 = vadd.f32 %v628_v58, %v503_v56 }
 0x45c   :  { %v644_v63 = vadd.f32 %v1567_v45, %v633_v60 }
 0x45d   :  { %v643_v0 = vadd.f32 %v1567_v45, %v632_v62  ;;  %v1878_v1 = vpack.c.bf16 %v646_v59, %v645_v61 }
 0x45e   :  { %v648_v2 = vmax.f32 %v644_v63, 0.0 }
 0x45f   :  { %v647_v3 = vmax.f32 %v643_v0, 0.0  ;;  %1879 = vmatprep.subr.bf16.mxu0 %v1878_v1 }
 0x460   :  { %1881 = vmatpush3.bf16.msra.mxu0 %v1878_v1 }
 0x461   :  { %v1882_v4 = vpack.c.bf16 %v648_v2, %v647_v3 }
 0x463   :  { %1883 = vmatprep.subr.bf16.mxu0 %v1882_v4 }
 0x464   :  { %1885 = vmatpush3.bf16.msra.mxu0 %v1882_v4 }
 0x467   :  { %1759 = vmatmul.mubr.msk.f32.vlgmr.msra.gmra.mrb[8].mxu0 %vm82_vm0, %v2157_v8 }
 0x468   :  { %1761 = vmatprep.mubr.msk.f32.mxu0 %vm82_vm0, %v2162_v9 }
 0x46b   :  { %1762 = vmatmul.mubr.msk.f32.gmra.mrb[10].mxu0 %vm82_vm0, %v2171_v10 }
 0x46c   :  { %1788 = vmatprep.mubr.msk.f32.mxu0 %vm82_vm0, %v2148_v6 }
 0x53a   :  { %v1760_v11 = vpop.f32.mrb[8].mxu0 }
 0x53b   :  { %v715_v12 = vpop.f32.mrb[9].mxu0 }
 0x53c   :  { %v1886_v13 = vpack.c.bf16 %v1760_v11, %v715_v12  ;;  %1766 = vmatprep.mubr.msk.f32.mxu1 %vm737_vm1, %v715_v12 }
 0x53d   :  { %1767 = vmatmul.mubr.msk.f32.vlgmr.msra.gmra.mrb[8].mxu1 %vm737_vm1, %v1760_v11 }
 0x53e   :  { %v1763_v14 = vpop.f32.mrb[10].mxu0  ;;  %1887 = vmatprep.subr.bf16.mxu0 %v1886_v13  ;;  %1773 = vmatpush3.msra.mxu1 %v734_v7 }
 0x53f   :  { %v725_v15 = vpop.f32.mrb[11].mxu0  ;;  %1889 = vmatpush3.bf16.msra.mxu0 %v1886_v13  ;;  %1794 = vmatprep.subr.mxu1 %v1026_v17 }
 0x540   :  { %v1890_v16 = vpack.c.bf16 %v1763_v14, %v725_v15  ;;  %1769 = vmatprep.mubr.msk.f32.mxu1 %vm737_vm1, %v725_v15 }
 0x541   :  { %1770 = vmatmul.mubr.msk.f32.gmra.mrb[10].mxu1 %vm737_vm1, %v1763_v14 }
 0x542   :  { %1774 = vmatprep.mubr.msk.f32.mxu1 %vm737_vm1, %v645_v61  ;;  %1891 = vmatprep.subr.bf16.mxu0 %v1890_v16 }
 0x543   :  { %1893 = vmatpush3.bf16.msra.mxu0 %v1890_v16 }
 0x545   :  { %1775 = vmatmul.mubr.msk.f32.vlgmr.msra.gmra.mrb[8].mxu1 %vm737_vm1, %v646_v59 }
 0x546   :  { %1777 = vmatprep.mubr.msk.f32.mxu1 %vm737_vm1, %v647_v3  ;;  %1789 = vmatmul.mubr.msk.f32.vlgmr.msra.gmra.mrb[12].mxu0 %vm82_vm0, %v2157_v8 }
 0x547   :  { %1791 = vmatprep.mubr.msk.f32.mxu0 %vm82_vm0, %v2162_v9  ;;  %1795 = vmatpush3.msra.mxu1 %v1026_v17 }
 0x548   :  { %1816 = vmatprep.subr.mxu1 %v1222_v32 }
 0x549   :  { %1778 = vmatmul.mubr.msk.f32.gmra.mrb[10].mxu1 %vm737_vm1, %v648_v2 }
 0x54a   :  { %1792 = vmatmul.mubr.msk.f32.gmra.mrb[14].mxu0 %vm82_vm0, %v2171_v10 }
 0x54b   :  { %1810 = vmatprep.mubr.msk.f32.mxu0 %vm82_vm0, %v2148_v6 }
 0x619   :  { %v1790_v18 = vpop.f32.mrb[12].mxu0 }
 0x61a   :  { %v1018_v19 = vmul.f32 2.0, %v1790_v18  ;;  %v998_v20 = vpop.f32.mrb[13].mxu0 }
 0x61b   :  { %v1017_v21 = vmul.f32 2.0, %v998_v20 }
 0x61c   :  { %v2223_v22 = vsub.f32 %v1018_v19, %v646_v59  ;;  %v1604_v59 = vld [vmem:[#allocation7] ss:$0 sm:$0xff] }
 0x61d   :  { %v2225_v23 = vsub.f32 %v1017_v21, %v645_v61  ;;  %v1793_v24 = vpop.f32.mrb[14].mxu0 }
 0x61e   :  { %v1020_v25 = vmul.f32 2.0, %v1793_v24  ;;  %v1008_v26 = vpop.f32.mrb[15].mxu0 }
 0x61f   :  { %v1019_v27 = vmul.f32 2.0, %v1008_v26  ;;  %1796 = vmatprep.mubr.msk.f32.mxu1 %vm737_vm1, %v2225_v23  ;;  %v1894_v28 = vpack.c.bf16 %v2223_v22, %v2225_v23 }
 0x620   :  { %v2231_v29 = vsub.f32 %v1020_v25, %v648_v2  ;;  %1797 = vmatmul.mubr.msk.f32.vlgmr.msra.gmra.mrb[8].mxu1 %vm737_vm1, %v2223_v22 }
 0x621   :  { %v1023_v30 = vsub.f32 %v1019_v27, %v647_v3  ;;  %1895 = vmatprep.subr.bf16.mxu0 %v1894_v28  ;;  %1817 = vmatpush3.msra.mxu1 %v1222_v32 }
 0x622   :  { %1897 = vmatpush3.bf16.msra.mxu0 %v1894_v28  ;;  %1910 = vmatprep.subr.mxu1 %v1418_v46 }
 0x623   :  { %1799 = vmatprep.mubr.msk.f32.mxu1 %vm737_vm1, %v1023_v30  ;;  %v1898_v31 = vpack.c.bf16 %v2231_v29, %v1023_v30 }
 0x624   :  { %1800 = vmatmul.mubr.msk.f32.gmra.mrb[10].mxu1 %vm737_vm1, %v2231_v29 }
 0x625   :  { %1899 = vmatprep.subr.bf16.mxu0 %v1898_v31 }
 0x626   :  { %1901 = vmatpush3.bf16.msra.mxu0 %v1898_v31 }
 0x629   :  { %1811 = vmatmul.mubr.msk.f32.vlgmr.msra.gmra.mrb[16].mxu0 %vm82_vm0, %v2157_v8 }
 0x62a   :  { %1813 = vmatprep.mubr.msk.f32.mxu0 %vm82_vm0, %v2162_v9 }
 0x62d   :  { %1814 = vmatmul.mubr.msk.f32.gmra.mrb[18].mxu0 %vm82_vm0, %v2171_v10 }
 0x62e   :  { %1832 = vmatprep.mubr.msk.f32.mxu0 %vm82_vm0, %v2148_v6 }
 0x6fc   :  { %v1812_v33 = vpop.f32.mrb[16].mxu0 }
 0x6fd   :  { %v1214_v34 = vmul.f32 2.0, %v1812_v33  ;;  %v1194_v35 = vpop.f32.mrb[17].mxu0 }
 0x6fe   :  { %v1213_v36 = vmul.f32 2.0, %v1194_v35 }
 0x6ff   :  { %v1218_v37 = vsub.f32 %v1214_v34, %v1760_v11 }
 0x700   :  { %v1217_v38 = vsub.f32 %v1213_v36, %v715_v12  ;;  %v1815_v39 = vpop.f32.mrb[18].mxu0 }
 0x701   :  { %v1216_v40 = vmul.f32 2.0, %v1815_v39  ;;  %v1204_v41 = vpop.f32.mrb[19].mxu0 }
 0x702   :  { %v1215_v42 = vmul.f32 2.0, %v1204_v41  ;;  %1818 = vmatprep.mubr.msk.f32.mxu1 %vm737_vm1, %v1217_v38  ;;  %v1902_v43 = vpack.c.bf16 %v1218_v37, %v1217_v38 }
 0x703   :  { %v1220_v44 = vsub.f32 %v1216_v40, %v1763_v14  ;;  %1819 = vmatmul.mubr.msk.f32.vlgmr.msra.gmra.mrb[8].mxu1 %vm737_vm1, %v1218_v37 }
 0x704   :  { %v1219_v6 = vsub.f32 %v1215_v42, %v725_v15  ;;  %1903 = vmatprep.subr.bf16.mxu0 %v1902_v43  ;;  %1911 = vmatpush3.msra.mxu1 %v1418_v46 }
 0x705   :  { %1905 = vmatpush3.bf16.msra.mxu0 %v1902_v43 }
 0x706   :  { %1821 = vmatprep.mubr.msk.f32.mxu1 %vm737_vm1, %v1219_v6  ;;  %v1906_v45 = vpack.c.bf16 %v1220_v44, %v1219_v6 }
 0x707   :  { %1822 = vmatmul.mubr.msk.f32.gmra.mrb[10].mxu1 %vm737_vm1, %v1220_v44 }
 0x708   :  { %1907 = vmatprep.subr.bf16.mxu0 %v1906_v45 }
 0x709   :  { %1909 = vmatpush3.bf16.msra.mxu0 %v1906_v45 }
 0x70a   :  { %1838 = vmatprep.subr.mxu0 %v1418_v46 }
 0x70c   :  { %1833 = vmatmul.mubr.msk.f32.vlgmr.msra.gmra.mrb[20].mxu0 %vm82_vm0, %v2157_v8 }
 0x70d   :  { %1835 = vmatprep.mubr.msk.f32.mxu0 %vm82_vm0, %v2162_v9  ;;  %1839 = vmatpush3.msra.mxu0 %v1418_v46 }
 0x710   :  { %1836 = vmatmul.mubr.msk.f32.gmra.mrb[22].mxu0 %vm82_vm0, %v2171_v10 }
 0x7d6   :  { %v1820_v47 = vpop.f32.mrb[8].mxu1 }
 0x7d7   :  { %v1301_v48 = vpop.f32.mrb[9].mxu1 }
 0x7df   :  { %v1834_v49 = vpop.f32.mrb[20].mxu0 }
 0x7e0   :  { %v1410_v50 = vmul.f32 2.0, %v1834_v49  ;;  %v1390_v51 = vpop.f32.mrb[21].mxu0 }
 0x7e1   :  { %v1409_v52 = vmul.f32 2.0, %v1390_v51 }
 0x7e2   :  { %v1414_v54 = vsub.f32 %v1410_v50, %v2223_v22 }
 0x7e3   :  { %v1413_v53 = vsub.f32 %v1409_v52, %v2225_v23  ;;  %v1837_v8 = vpop.f32.mrb[22].mxu0 }
 0x7e4   :  { %v1412_v9 = vmul.f32 2.0, %v1837_v8  ;;  %v1400_v55 = vpop.f32.mrb[23].mxu0 }
 0x7e5   :  { %v1411_v56 = vmul.f32 2.0, %v1400_v55  ;;  %1840 = vmatprep.mubr.msk.f32.mxu0 %vm737_vm1, %v1413_v53 }
 0x7e6   :  { %1841 = vmatmul.mubr.msk.f32.vlgmr.msra.gmra.mrb[24].mxu0 %vm737_vm1, %v1414_v54  ;;  %v1416_v57 = vsub.f32 %v1412_v9, %v2231_v29 }
 0x7e7   :  { %v1415_v10 = vsub.f32 %v1411_v56, %v1023_v30 }
 0x7e9   :  { %1843 = vmatprep.mubr.msk.f32.mxu1 %vm737_vm1, %v1415_v10 }
 0x7ea   :  { %1844 = vmatmul.mubr.msk.f32.vlgmr.msra.gmra.mrb[10].mxu1 %vm737_vm1, %v1416_v57 }
 0x8b9   :  { %v1842_v58 = vpop.f32.mrb[24].mxu0 }
 0x8ba   :  { %v1912_v60 = vadd.f32 %v1842_v58, %v1820_v47  ;;  %v1497_v61 = vpop.f32.mrb[25].mxu0 }
 0x8bb   :  { %v1913_v62 = vadd.f32 %v1497_v61, %v1301_v48 }
 0x8bc   :  { %v1528_v63 = vadd.f32 %v1912_v60, %v1604_v59 }
 0x8bd   :  { %v1527_v0 = vadd.f32 %v1913_v62, %v1604_v59  ;;  %v1845_v1 = vpop.f32.mrb[10].mxu1 }
 0x8be   :  { %v1532_v2 = vmax.f32 %v1528_v63, 0.0  ;;  %v1530_v3 = vadd.f32 %v1845_v1, %v1604_v59  ;;  %v1507_v4 = vpop.f32.mrb[11].mxu1 }
 0x8bf   :  { %v1531_v5 = vmax.f32 %v1527_v0, 0.0  ;;  %v1529_v7 = vadd.f32 %v1604_v59, %v1507_v4 }
 0x8c0   :  { %1536 = vst.msk [vmem:[%s2286_s6 + $0x8] sm:$0xff] %vm737_vm1, %v1532_v2  ;;  %v1534_v11 = vmax.f32 %v1530_v3, 0.0 }
 0x8c1   :  { %1535 = vst.msk [vmem:[%s2286_s6] sm:$0xff] %vm737_vm1, %v1531_v5  ;;  %v1533_v12 = vmax.f32 %v1529_v7, 0.0 }
 0x8c2   :  { %1538 = vst.msk [vmem:[%s2286_s6 + $0x18] sm:$0xff] %vm737_vm1, %v1534_v11 }
 0x8c3   :  { %1537 = vst.msk [vmem:[%s2286_s6 + $0x10] sm:$0xff] %vm737_vm1, %v1533_v12 }
 0x8c4   :  { %1543 = vsyncpa [#allocation3], 1 }
 0x8c5   :  { %1544 = vsyncpa [#allocation5], 1 }
 0x8c6   :  { %1545 = vsyncpa [#allocation8], 1 }

// kernel: trac_gcn_forward.3
= control target key start
LH: loop header
LB: loop body
LE: loop exit
PB: predicated region body
PF: predicated region fallthrough
CT: control target
= control target key end

     0   :  { %s5566_s0 = inlined_call_operand.vmem [shape: f32[2,128], index: 0, kind: input, shape index: {}]   ;;  %s5567_s1 = inlined_call_operand.vmem [shape: f32[2,16], index: 1, kind: input, shape index: {}]   ;;  %s5568_s2 = inlined_call_operand.vmem [shape: f32[128,1000], index: 2, kind: input, shape index: {}]   ;;  %s5569_s3 = inlined_call_operand.vmem [shape: f32[1,1000], index: 3, kind: input, shape index: {}]   ;;  %s5570_s4 = inlined_call_operand.vmem [shape: f32[1000,50], index: 4, kind: input, shape index: {}]   ;;  %s5571_s5 = inlined_call_operand.vmem [shape: f32[1,50], index: 5, kind: input, shape index: {}]   ;;  %s5572_s6 = inlined_call_operand.vmem [shape: f32[16,350], index: 6, kind: input, shape index: {}]   ;;  %s5573_s7 = inlined_call_operand.vmem [shape: f32[1,350], index: 7, kind: input, shape index: {}]   ;;  %s5574_s8 = inlined_call_operand.vmem [shape: f32[350,350], index: 8, kind: input, shape index: {}]   ;;  %s5575_s9 = inlined_call_operand.vmem [shape: f32[1,350], index: 9, kind: input, shape index: {}]   ;;  %s5576_s10 = inlined_call_operand.vmem [shape: f32[350,350], index: 10, kind: input, shape index: {}]   ;;  %s5577_s11 = inlined_call_operand.vmem [shape: f32[1,350], index: 11, kind: input, shape index: {}]   ;;  %s5578_s12 = inlined_call_operand.vmem [shape: f32[350,50], index: 12, kind: input, shape index: {}]   ;;  %s5579_s13 = inlined_call_operand.vmem [shape: f32[1,50], index: 13, kind: input, shape index: {}]   ;;  %s5580_s14 = inlined_call_operand.vmem [shape: f32[50,6], index: 14, kind: input, shape index: {}]   ;;  %s5581_s15 = inlined_call_operand.vmem [shape: f32[50,6], index: 15, kind: input, shape index: {}]   ;;  %s5582_s16 = inlined_call_operand.vmem [shape: f32[1,6], index: 16, kind: input, shape index: {}]   ;;  %s5583_s17 = inlined_call_operand.hbm [shape: f32[2,6], index: 17, kind: output, shape index: {}]  }
   0x1   :  { %5584 = sst [smem:[#allocation5_spill]] %s5566_s0 }
   0x2   :  { %5585 = sst [smem:[#allocation6_spill]] %s5567_s1 }
   0x3   :  { %v59_v0 = vld [vmem:[%s5568_s2 + $0x8] sm:$0xff]  ;;  %v61_v2 = vld [vmem:[%s5568_s2 + $0x18] sm:$0xff]  ;;  %v58_v5 = vld [vmem:[%s5568_s2] sm:$0xff]  ;;  %v3539_v7 = vmov 0.0   ;;  %s5586_s27 = sld [smem:[#allocation5_spill]] }
   0x4   :  { %v67_v1 = vld [vmem:[%s5568_s2 + $0x48] sm:$0xff]  ;;  %v69_v4 = vld [vmem:[%s5568_s2 + $0x58] sm:$0xff]  ;;  %v66_v6 = vld [vmem:[%s5568_s2 + $0x40] sm:$0xff]  ;;  %292 = vmatprep.mubr.f32.mxu0 %v3539_v7  ;;  %363 = vmatprep.mubr.f32.mxu1 %v3539_v7 }
   0x5   :  { %v2860_v3 = vpack.c.bf16 %v67_v1, %v59_v0  ;;  %v2892_v8 = vpack.c.bf16 %v69_v4, %v61_v2  ;;  %v2862_v9 = vpack.c.bf16 %v66_v6, %v58_v5  ;;  %v60_v10 = vld [vmem:[%s5568_s2 + $0x10] sm:$0xff]  ;;  %v75_v12 = vld [vmem:[%s5568_s2 + $0x88] sm:$0xff]  ;;  %v77_v15 = vld [vmem:[%s5568_s2 + $0x98] sm:$0xff] }
   0x6   :  { %v68_v11 = vld [vmem:[%s5568_s2 + $0x50] sm:$0xff]  ;;  %v83_v14 = vld [vmem:[%s5568_s2 + $0xc8] sm:$0xff]  ;;  %v85_v16 = vld [vmem:[%s5568_s2 + $0xd8] sm:$0xff] }
   0x7   :  { %2861 = vmatprep.subr.bf16.mxu0 %v2860_v3  ;;  %v2894_v13 = vpack.c.bf16 %v68_v11, %v60_v10  ;;  %2893 = vmatprep.subr.bf16.mxu1 %v2892_v8  ;;  %v2864_v17 = vpack.c.bf16 %v83_v14, %v75_v12  ;;  %v2896_v18 = vpack.c.bf16 %v85_v16, %v77_v15  ;;  %v74_v19 = vld [vmem:[%s5568_s2 + $0x80] sm:$0xff]  ;;  %v76_v21 = vld [vmem:[%s5568_s2 + $0x90] sm:$0xff]  ;;  %v91_v24 = vld [vmem:[%s5568_s2 + $0x108] sm:$0xff] }
   0x8   :  { %2863 = vmatpush1.bf16.msra.mxu0 %v2862_v9  ;;  %v82_v20 = vld [vmem:[%s5568_s2 + $0xc0] sm:$0xff]  ;;  %v84_v23 = vld [vmem:[%s5568_s2 + $0xd0] sm:$0xff]  ;;  %v99_v25 = vld [vmem:[%s5568_s2 + $0x148] sm:$0xff] }
   0x9   :  { %2895 = vmatpush1.bf16.msra.mxu1 %v2894_v13  ;;  %v2866_v22 = vpack.c.bf16 %v82_v20, %v74_v19  ;;  %2865 = vmatprep.subr.bf16.mxu0 %v2864_v17  ;;  %v2898_v26 = vpack.c.bf16 %v84_v23, %v76_v21  ;;  %v2868_v27 = vpack.c.bf16 %v99_v25, %v91_v24  ;;  %v93_v28 = vld [vmem:[%s5568_s2 + $0x118] sm:$0xff]  ;;  %v90_v30 = vld [vmem:[%s5568_s2 + $0x100] sm:$0xff]  ;;  %v92_v33 = vld [vmem:[%s5568_s2 + $0x110] sm:$0xff] }
   0xa   :  { %2897 = vmatprep.subr.bf16.mxu1 %v2896_v18  ;;  %v101_v29 = vld [vmem:[%s5568_s2 + $0x158] sm:$0xff]  ;;  %v98_v32 = vld [vmem:[%s5568_s2 + $0x140] sm:$0xff]  ;;  %v100_v34 = vld [vmem:[%s5568_s2 + $0x150] sm:$0xff] }
   0xb   :  { %v2900_v31 = vpack.c.bf16 %v101_v29, %v93_v28  ;;  %v2870_v35 = vpack.c.bf16 %v98_v32, %v90_v30  ;;  %v107_v36 = vld [vmem:[%s5568_s2 + $0x188] sm:$0xff]  ;;  %v109_v38 = vld [vmem:[%s5568_s2 + $0x198] sm:$0xff]  ;;  %v2902_v39 = vpack.c.bf16 %v100_v34, %v92_v33  ;;  %v106_v42 = vld [vmem:[%s5568_s2 + $0x180] sm:$0xff] }
   0xc   :  { %2867 = vmatpush1.bf16.msra.mxu0 %v2866_v22  ;;  %v115_v37 = vld [vmem:[%s5568_s2 + $0x1c8] sm:$0xff]  ;;  %v117_v41 = vld [vmem:[%s5568_s2 + $0x1d8] sm:$0xff]  ;;  %v114_v43 = vld [vmem:[%s5568_s2 + $0x1c0] sm:$0xff] }
   0xd   :  { %2899 = vmatpush1.bf16.msra.mxu1 %v2898_v26  ;;  %2869 = vmatprep.subr.bf16.mxu0 %v2868_v27  ;;  %v2872_v40 = vpack.c.bf16 %v115_v37, %v107_v36  ;;  %v2904_v44 = vpack.c.bf16 %v117_v41, %v109_v38  ;;  %v108_v45 = vld [vmem:[%s5568_s2 + $0x190] sm:$0xff]  ;;  %v123_v47 = vld [vmem:[%s5568_s2 + $0x208] sm:$0xff]  ;;  %v125_v49 = vld [vmem:[%s5568_s2 + $0x218] sm:$0xff]  ;;  %v2874_v51 = vpack.c.bf16 %v114_v43, %v106_v42 }
   0xe   :  { %2901 = vmatprep.subr.bf16.mxu1 %v2900_v31  ;;  %v116_v46 = vld [vmem:[%s5568_s2 + $0x1d0] sm:$0xff]  ;;  %v131_v48 = vld [vmem:[%s5568_s2 + $0x248] sm:$0xff]  ;;  %v133_v50 = vld [vmem:[%s5568_s2 + $0x258] sm:$0xff] }
   0xf   :  { %v2906_v52 = vpack.c.bf16 %v116_v46, %v108_v45  ;;  %v2876_v53 = vpack.c.bf16 %v131_v48, %v123_v47  ;;  %v122_v54 = vld [vmem:[%s5568_s2 + $0x200] sm:$0xff]  ;;  %v124_v56 = vld [vmem:[%s5568_s2 + $0x210] sm:$0xff]  ;;  %v2908_v57 = vpack.c.bf16 %v133_v50, %v125_v49  ;;  %v139_v59 = vld [vmem:[%s5568_s2 + $0x288] sm:$0xff] }
  0x10   :  { %2871 = vmatpush1.bf16.msra.mxu0 %v2870_v35  ;;  %v130_v55 = vld [vmem:[%s5568_s2 + $0x240] sm:$0xff]  ;;  %v132_v58 = vld [vmem:[%s5568_s2 + $0x250] sm:$0xff]  ;;  %v147_v60 = vld [vmem:[%s5568_s2 + $0x2c8] sm:$0xff] }
  0x11   :  { %2903 = vmatpush1.bf16.msra.mxu1 %v2902_v39  ;;  %2873 = vmatprep.subr.bf16.mxu0 %v2872_v40  ;;  %v141_v61 = vld [vmem:[%s5568_s2 + $0x298] sm:$0xff]  ;;  %v2878_v63 = vpack.c.bf16 %v130_v55, %v122_v54  ;;  %v2910_v0 = vpack.c.bf16 %v132_v58, %v124_v56  ;;  %v2880_v1 = vpack.c.bf16 %v147_v60, %v139_v59  ;;  %v138_v2 = vld [vmem:[%s5568_s2 + $0x280] sm:$0xff]  ;;  %v140_v4 = vld [vmem:[%s5568_s2 + $0x290] sm:$0xff] }
  0x12   :  { %2905 = vmatprep.subr.bf16.mxu1 %v2904_v44  ;;  %v149_v62 = vld [vmem:[%s5568_s2 + $0x2d8] sm:$0xff]  ;;  %v146_v3 = vld [vmem:[%s5568_s2 + $0x2c0] sm:$0xff]  ;;  %v148_v6 = vld [vmem:[%s5568_s2 + $0x2d0] sm:$0xff] }
  0x13   :  { %v2912_v5 = vpack.c.bf16 %v149_v62, %v141_v61  ;;  %v155_v8 = vld [vmem:[%s5568_s2 + $0x308] sm:$0xff]  ;;  %v157_v10 = vld [vmem:[%s5568_s2 + $0x318] sm:$0xff]  ;;  %v2882_v12 = vpack.c.bf16 %v146_v3, %v138_v2  ;;  %v2914_v13 = vpack.c.bf16 %v148_v6, %v140_v4  ;;  %v154_v15 = vld [vmem:[%s5568_s2 + $0x300] sm:$0xff] }
  0x14   :  { %2875 = vmatpush1.bf16.msra.mxu0 %v2874_v51  ;;  %v163_v9 = vld [vmem:[%s5568_s2 + $0x348] sm:$0xff]  ;;  %v165_v11 = vld [vmem:[%s5568_s2 + $0x358] sm:$0xff]  ;;  %v162_v16 = vld [vmem:[%s5568_s2 + $0x340] sm:$0xff] }
  0x15   :  { %2907 = vmatpush1.bf16.msra.mxu1 %v2906_v52  ;;  %2877 = vmatprep.subr.bf16.mxu0 %v2876_v53  ;;  %v2884_v14 = vpack.c.bf16 %v163_v9, %v155_v8  ;;  %v156_v17 = vld [vmem:[%s5568_s2 + $0x310] sm:$0xff]  ;;  %v2916_v18 = vpack.c.bf16 %v165_v11, %v157_v10  ;;  %v171_v20 = vld [vmem:[%s5568_s2 + $0x388] sm:$0xff]  ;;  %v173_v22 = vld [vmem:[%s5568_s2 + $0x398] sm:$0xff]  ;;  %v2886_v24 = vpack.c.bf16 %v162_v16, %v154_v15 }
  0x16   :  { %2909 = vmatprep.subr.bf16.mxu1 %v2908_v57  ;;  %v164_v19 = vld [vmem:[%s5568_s2 + $0x350] sm:$0xff]  ;;  %v179_v21 = vld [vmem:[%s5568_s2 + $0x3c8] sm:$0xff]  ;;  %v181_v23 = vld [vmem:[%s5568_s2 + $0x3d8] sm:$0xff] }
  0x17   :  { %v2918_v25 = vpack.c.bf16 %v164_v19, %v156_v17  ;;  %v2888_v26 = vpack.c.bf16 %v179_v21, %v171_v20  ;;  %v170_v27 = vld [vmem:[%s5568_s2 + $0x380] sm:$0xff]  ;;  %v172_v29 = vld [vmem:[%s5568_s2 + $0x390] sm:$0xff]  ;;  %v2920_v30 = vpack.c.bf16 %v181_v23, %v173_v22  ;;  %v63_v32 = vld [vmem:[%s5568_s2 + $0x28] sm:$0xff] }
  0x18   :  { %2879 = vmatpush1.bf16.msra.mxu0 %v2878_v63  ;;  %v178_v28 = vld [vmem:[%s5568_s2 + $0x3c0] sm:$0xff]  ;;  %v180_v31 = vld [vmem:[%s5568_s2 + $0x3d0] sm:$0xff]  ;;  %v71_v33 = vld [vmem:[%s5568_s2 + $0x68] sm:$0xff] }
  0x19   :  { %2911 = vmatpush1.bf16.msra.mxu1 %v2910_v0  ;;  %2881 = vmatprep.subr.bf16.mxu0 %v2880_v1  ;;  %v2890_v34 = vpack.c.bf16 %v178_v28, %v170_v27  ;;  %v2922_v35 = vpack.c.bf16 %v180_v31, %v172_v29  ;;  %v2924_v36 = vpack.c.bf16 %v71_v33, %v63_v32  ;;  %v62_v37 = vld [vmem:[%s5568_s2 + $0x20] sm:$0xff]  ;;  %v79_v40 = vld [vmem:[%s5568_s2 + $0xa8] sm:$0xff]  ;;  %v65_v42 = vld [vmem:[%s5568_s2 + $0x38] sm:$0xff] }
  0x1a   :  { %2913 = vmatprep.subr.bf16.mxu1 %v2912_v5  ;;  %v70_v38 = vld [vmem:[%s5568_s2 + $0x60] sm:$0xff]  ;;  %v87_v41 = vld [vmem:[%s5568_s2 + $0xe8] sm:$0xff]  ;;  %v73_v43 = vld [vmem:[%s5568_s2 + $0x78] sm:$0xff] }
  0x1b   :  { %v3843_v39 = vld [vmem:[%s5586_s27] sm:$0x3]  ;;  %v64_v44 = vld [vmem:[%s5568_s2 + $0x30] sm:$0xff]  ;;  %v2926_v45 = vpack.c.bf16 %v70_v38, %v62_v37  ;;  %v2956_v48 = vpack.c.bf16 %v73_v43, %v65_v42  ;;  %v2928_v50 = vpack.c.bf16 %v87_v41, %v79_v40  ;;  %v95_v51 = vld [vmem:[%s5568_s2 + $0x128] sm:$0xff] }
  0x1c   :  { %2883 = vmatpush1.bf16.msra.mxu0 %v2882_v12  ;;  %v78_v46 = vld [vmem:[%s5568_s2 + $0xa0] sm:$0xff]  ;;  %v72_v49 = vld [vmem:[%s5568_s2 + $0x70] sm:$0xff]  ;;  %v103_v52 = vld [vmem:[%s5568_s2 + $0x168] sm:$0xff] }
  0x1d   :  { %2915 = vmatpush1.bf16.msra.mxu1 %v2914_v13  ;;  %2885 = vmatprep.subr.bf16.mxu0 %v2884_v14  ;;  %v86_v47 = vld [vmem:[%s5568_s2 + $0xe0] sm:$0xff]  ;;  %v2958_v53 = vpack.c.bf16 %v72_v49, %v64_v44  ;;  %v81_v54 = vld [vmem:[%s5568_s2 + $0xb8] sm:$0xff]  ;;  %v80_v56 = vld [vmem:[%s5568_s2 + $0xb0] sm:$0xff]  ;;  %v2932_v62 = vpack.c.bf16 %v103_v52, %v95_v51 }
  0x1e   :  { %2917 = vmatprep.subr.bf16.mxu1 %v2916_v18  ;;  %v89_v55 = vld [vmem:[%s5568_s2 + $0xf8] sm:$0xff]  ;;  %v88_v57 = vld [vmem:[%s5568_s2 + $0xf0] sm:$0xff]  ;;  %v2930_v61 = vpack.c.bf16 %v86_v47, %v78_v46  ;;  %v94_v63 = vld [vmem:[%s5568_s2 + $0x120] sm:$0xff] }
  0x1f   :  { %v2960_v58 = vpack.c.bf16 %v89_v55, %v81_v54  ;;  %v97_v59 = vld [vmem:[%s5568_s2 + $0x138] sm:$0xff]  ;;  %v102_v0 = vld [vmem:[%s5568_s2 + $0x160] sm:$0xff]  ;;  %v111_v1 = vld [vmem:[%s5568_s2 + $0x1a8] sm:$0xff]  ;;  %v2962_v2 = vpack.c.bf16 %v88_v57, %v80_v56 }
  0x20   :  { %2887 = vmatpush1.bf16.msra.mxu0 %v2886_v24  ;;  %v105_v60 = vld [vmem:[%s5568_s2 + $0x178] sm:$0xff]  ;;  %v119_v3 = vld [vmem:[%s5568_s2 + $0x1e8] sm:$0xff]  ;;  %v96_v5 = vld [vmem:[%s5568_s2 + $0x130] sm:$0xff]  ;;  %v2934_v10 = vpack.c.bf16 %v102_v0, %v94_v63 }
  0x21   :  { %2919 = vmatpush1.bf16.msra.mxu1 %v2918_v25  ;;  %2889 = vmatprep.subr.bf16.mxu0 %v2888_v26  ;;  %v2964_v4 = vpack.c.bf16 %v105_v60, %v97_v59  ;;  %v104_v6 = vld [vmem:[%s5568_s2 + $0x170] sm:$0xff]  ;;  %v113_v8 = vld [vmem:[%s5568_s2 + $0x1b8] sm:$0xff]  ;;  %v2936_v11 = vpack.c.bf16 %v119_v3, %v111_v1  ;;  %v110_v12 = vld [vmem:[%s5568_s2 + $0x1a0] sm:$0xff] }
  0x22   :  { %2921 = vmatprep.subr.bf16.mxu1 %v2920_v30  ;;  %v121_v9 = vld [vmem:[%s5568_s2 + $0x1f8] sm:$0xff]  ;;  %v118_v13 = vld [vmem:[%s5568_s2 + $0x1e0] sm:$0xff]  ;;  %v127_v14 = vld [vmem:[%s5568_s2 + $0x228] sm:$0xff]  ;;  %v2966_v15 = vpack.c.bf16 %v104_v6, %v96_v5 }
  0x23   :  { %v135_v16 = vld [vmem:[%s5568_s2 + $0x268] sm:$0xff]  ;;  %v2968_v17 = vpack.c.bf16 %v121_v9, %v113_v8  ;;  %v112_v18 = vld [vmem:[%s5568_s2 + $0x1b0] sm:$0xff]  ;;  %v129_v20 = vld [vmem:[%s5568_s2 + $0x238] sm:$0xff]  ;;  %v2938_v22 = vpack.c.bf16 %v118_v13, %v110_v12 }
  0x24   :  { %2891 = vmatpush1.bf16.msra.mxu0 %v2890_v34  ;;  %v120_v19 = vld [vmem:[%s5568_s2 + $0x1f0] sm:$0xff]  ;;  %v137_v21 = vld [vmem:[%s5568_s2 + $0x278] sm:$0xff]  ;;  %v2940_v23 = vpack.c.bf16 %v135_v16, %v127_v14  ;;  %v126_v24 = vld [vmem:[%s5568_s2 + $0x220] sm:$0xff] }
  0x25   :  { %2923 = vmatpush1.bf16.msra.mxu1 %v2922_v35  ;;  %2925 = vmatprep.subr.bf16.mxu0 %v2924_v36  ;;  %v134_v25 = vld [vmem:[%s5568_s2 + $0x260] sm:$0xff]  ;;  %v143_v26 = vld [vmem:[%s5568_s2 + $0x2a8] sm:$0xff]  ;;  %v2970_v27 = vpack.c.bf16 %v120_v19, %v112_v18  ;;  %v2972_v29 = vpack.c.bf16 %v137_v21, %v129_v20  ;;  %v128_v30 = vld [vmem:[%s5568_s2 + $0x230] sm:$0xff] }
  0x26   :  { %2957 = vmatprep.subr.bf16.mxu1 %v2956_v48  ;;  %v151_v28 = vld [vmem:[%s5568_s2 + $0x2e8] sm:$0xff]  ;;  %v136_v31 = vld [vmem:[%s5568_s2 + $0x270] sm:$0xff]  ;;  %v145_v32 = vld [vmem:[%s5568_s2 + $0x2b8] sm:$0xff]  ;;  %v2942_v34 = vpack.c.bf16 %v134_v25, %v126_v24 }
  0x27   :  { %293 = vmatmul.mubr.f32.vlgmr.msra.gmra.mrb[0].mxu0 %v3843_v39  ;;  %v153_v33 = vld [vmem:[%s5568_s2 + $0x2f8] sm:$0xff]  ;;  %v2944_v35 = vpack.c.bf16 %v151_v28, %v143_v26  ;;  %v142_v36 = vld [vmem:[%s5568_s2 + $0x2a0] sm:$0xff]  ;;  %v159_v38 = vld [vmem:[%s5568_s2 + $0x328] sm:$0xff]  ;;  %v2974_v40 = vpack.c.bf16 %v136_v31, %v128_v30 }
  0x28   :  { %364 = vmatmul.mubr.f32.vlgmr.msra.gmra.mrb[0].mxu1 %v3843_v39  ;;  %2927 = vmatpush1.bf16.msra.mxu0 %v2926_v45  ;;  %v150_v37 = vld [vmem:[%s5568_s2 + $0x2e0] sm:$0xff]  ;;  %v167_v41 = vld [vmem:[%s5568_s2 + $0x368] sm:$0xff]  ;;  %v2976_v42 = vpack.c.bf16 %v153_v33, %v145_v32  ;;  %v144_v43 = vld [vmem:[%s5568_s2 + $0x2b0] sm:$0xff] }
  0x29   :  { %2929 = vmatprep.subr.bf16.mxu0 %v2928_v50  ;;  %2959 = vmatpush1.bf16.msra.mxu1 %v2958_v53  ;;  %v152_v44 = vld [vmem:[%s5568_s2 + $0x2f0] sm:$0xff]  ;;  %v161_v45 = vld [vmem:[%s5568_s2 + $0x338] sm:$0xff]  ;;  %v2946_v47 = vpack.c.bf16 %v150_v37, %v142_v36  ;;  %v2948_v48 = vpack.c.bf16 %v167_v41, %v159_v38  ;;  %v158_v49 = vld [vmem:[%s5568_s2 + $0x320] sm:$0xff] }
  0x2a   :  { %2961 = vmatprep.subr.bf16.mxu1 %v2960_v58  ;;  %434 = vmatprep.mubr.f32.mxu0 %v3539_v7  ;;  %v169_v46 = vld [vmem:[%s5568_s2 + $0x378] sm:$0xff]  ;;  %v166_v50 = vld [vmem:[%s5568_s2 + $0x360] sm:$0xff]  ;;  %v175_v51 = vld [vmem:[%s5568_s2 + $0x3a8] sm:$0xff]  ;;  %v2978_v52 = vpack.c.bf16 %v152_v44, %v144_v43 }
  0x2b   :  { %505 = vmatprep.mubr.f32.mxu1 %v3539_v7  ;;  %v183_v53 = vld [vmem:[%s5568_s2 + $0x3e8] sm:$0xff]  ;;  %v2980_v54 = vpack.c.bf16 %v169_v46, %v161_v45  ;;  %v160_v55 = vld [vmem:[%s5568_s2 + $0x330] sm:$0xff]  ;;  %v177_v57 = vld [vmem:[%s5568_s2 + $0x3b8] sm:$0xff]  ;;  %v2950_v59 = vpack.c.bf16 %v166_v50, %v158_v49 }
  0x2c   :  { %2931 = vmatpush1.bf16.msra.mxu0 %v2930_v61  ;;  %v168_v56 = vld [vmem:[%s5568_s2 + $0x370] sm:$0xff]  ;;  %v185_v58 = vld [vmem:[%s5568_s2 + $0x3f8] sm:$0xff]  ;;  %v2952_v60 = vpack.c.bf16 %v183_v53, %v175_v51  ;;  %v174_v61 = vld [vmem:[%s5568_s2 + $0x3a0] sm:$0xff] }
  0x2d   :  { %2933 = vmatprep.subr.bf16.mxu0 %v2932_v62  ;;  %2963 = vmatpush1.bf16.msra.mxu1 %v2962_v2  ;;  %v182_v62 = vld [vmem:[%s5568_s2 + $0x3e0] sm:$0xff]  ;;  %v2982_v63 = vpack.c.bf16 %v168_v56, %v160_v55  ;;  %v176_v0 = vld [vmem:[%s5568_s2 + $0x3b0] sm:$0xff]  ;;  %v2984_v1 = vpack.c.bf16 %v185_v58, %v177_v57  ;;  %v569_v6 = vld [vmem:[%s5570_s4 + $0x188] sm:$0xff] }
  0x2e   :  { %2965 = vmatprep.subr.bf16.mxu1 %v2964_v4  ;;  %v184_v2 = vld [vmem:[%s5568_s2 + $0x3f0] sm:$0xff]  ;;  %v536_v3 = vld [vmem:[%s5570_s4 + $0x80] sm:$0xff]  ;;  %v537_v4 = vld [vmem:[%s5570_s4 + $0x88] sm:$0xff]  ;;  %v2954_v8 = vpack.c.bf16 %v182_v62, %v174_v61 }
  0x2f   :  { %v568_v5 = vld [vmem:[%s5570_s4 + $0x180] sm:$0xff]  ;;  %v521_v12 = vld [vmem:[%s5570_s4 + $0x8] sm:$0xff]  ;;  %v538_v16 = vld [vmem:[%s5570_s4 + $0x90] sm:$0xff] }
  0x30   :  { %2935 = vmatpush1.bf16.msra.mxu0 %v2934_v10  ;;  %v520_v9 = vld [vmem:[%s5570_s4] sm:$0xff]  ;;  %v2986_v10 = vpack.c.bf16 %v184_v2, %v176_v0  ;;  %v553_v14 = vld [vmem:[%s5570_s4 + $0x108] sm:$0xff] }
  0x31   :  { %2937 = vmatprep.subr.bf16.mxu0 %v2936_v11  ;;  %2967 = vmatpush1.bf16.msra.mxu1 %v2966_v15  ;;  %v2988_v11 = vpack.c.bf16 %v537_v4, %v536_v3  ;;  %v552_v13 = vld [vmem:[%s5570_s4 + $0x100] sm:$0xff]  ;;  %v3020_v15 = vpack.c.bf16 %v569_v6, %v568_v5 }
  0x32   :  { %2969 = vmatprep.subr.bf16.mxu1 %v2968_v17  ;;  %v539_v17 = vld [vmem:[%s5570_s4 + $0x98] sm:$0xff] }
  0x34   :  { %2939 = vmatpush1.bf16.msra.mxu0 %v2938_v22 }
  0x35   :  { %2941 = vmatprep.subr.bf16.mxu0 %v2940_v23  ;;  %2971 = vmatpush1.bf16.msra.mxu1 %v2970_v27 }
  0x36   :  { %2973 = vmatprep.subr.bf16.mxu1 %v2972_v29 }
  0x38   :  { %2943 = vmatpush1.bf16.msra.mxu0 %v2942_v34 }
  0x39   :  { %2945 = vmatprep.subr.bf16.mxu0 %v2944_v35  ;;  %2975 = vmatpush1.bf16.msra.mxu1 %v2974_v40 }
  0x3a   :  { %2977 = vmatprep.subr.bf16.mxu1 %v2976_v42 }
  0x3c   :  { %2947 = vmatpush1.bf16.msra.mxu0 %v2946_v47 }
  0x3d   :  { %2949 = vmatprep.subr.bf16.mxu0 %v2948_v48  ;;  %2979 = vmatpush1.bf16.msra.mxu1 %v2978_v52 }
  0x3e   :  { %2981 = vmatprep.subr.bf16.mxu1 %v2980_v54 }
  0x40   :  { %2951 = vmatpush1.bf16.msra.mxu0 %v2950_v59 }
  0x41   :  { %2953 = vmatprep.subr.bf16.mxu0 %v2952_v60  ;;  %2983 = vmatpush1.bf16.msra.mxu1 %v2982_v63 }
  0x42   :  { %2985 = vmatprep.subr.bf16.mxu1 %v2984_v1 }
  0x43   :  { %22 = vsyncpa [#allocation3], 0  ;;  %v570_v18 = vld [vmem:[%s5570_s4 + $0x190] sm:$0xff]  ;;  %v571_v19 = vld [vmem:[%s5570_s4 + $0x198] sm:$0xff]  ;;  %v2990_v20 = vpack.c.bf16 %v521_v12, %v520_v9  ;;  %v3022_v21 = vpack.c.bf16 %v553_v14, %v552_v13  ;;  %v2992_v22 = vpack.c.bf16 %v539_v17, %v538_v16  ;;  %vm652_vm0 = vcmask 850944   ;;  %s5587_s18 = sld [smem:[#allocation6_spill]] }
  0x44   :  { %2955 = vmatpush1.bf16.msra.mxu0 %v2954_v8  ;;  %v522_v23 = vld [vmem:[%s5570_s4 + $0x10] sm:$0xff]  ;;  %v523_v24 = vld [vmem:[%s5570_s4 + $0x18] sm:$0xff]  ;;  %v3024_v26 = vpack.c.bf16 %v571_v19, %v570_v18  ;;  %v540_v28 = vld [vmem:[%s5570_s4 + $0xa0] sm:$0xff]  ;;  %vm961_vm1 = vcmask 130048   ;;  %vm3541_vm2 = vmmov 0   ;;  %vm1277_vm5 = vcmask 1045504  }
  0x45   :  { %2987 = vmatpush1.bf16.msra.mxu1 %v2986_v10  ;;  %2989 = vmatprep.subr.bf16.mxu0 %v2988_v11  ;;  %v554_v25 = vld [vmem:[%s5570_s4 + $0x110] sm:$0xff]  ;;  %v555_v27 = vld [vmem:[%s5570_s4 + $0x118] sm:$0xff]  ;;  %v541_v29 = vld [vmem:[%s5570_s4 + $0xa8] sm:$0xff]  ;;  %v2994_v32 = vpack.c.bf16 %v523_v24, %v522_v23  ;;  %vm3542_vm6 = vmmov 1   ;;  %vm1273_vm9 = vcmask 769024  }
  0x46   :  { %3021 = vmatprep.subr.bf16.mxu1 %v3020_v15  ;;  %v572_v30 = vld [vmem:[%s5570_s4 + $0x1a0] sm:$0xff]  ;;  %v573_v31 = vld [vmem:[%s5570_s4 + $0x1a8] sm:$0xff]  ;;  %v3026_v33 = vpack.c.bf16 %v555_v27, %v554_v25  ;;  %v2996_v34 = vpack.c.bf16 %v541_v29, %v540_v28  ;;  %v542_v40 = vld [vmem:[%s5570_s4 + $0xb0] sm:$0xff] }
  0x47   :  { %435 = vmatmul.mubr.f32.vlgmr.msra.gmra.mrb[2].mxu0 %v3843_v39  ;;  %v524_v35 = vld [vmem:[%s5570_s4 + $0x20] sm:$0xff]  ;;  %v525_v36 = vld [vmem:[%s5570_s4 + $0x28] sm:$0xff]  ;;  %v543_v41 = vld [vmem:[%s5570_s4 + $0xb8] sm:$0xff] }
  0x48   :  { %506 = vmatmul.mubr.f32.vlgmr.msra.gmra.mrb[2].mxu1 %v3843_v39  ;;  %2991 = vmatpush3.bf16.msra.mxu0 %v2990_v20  ;;  %v556_v37 = vld [vmem:[%s5570_s4 + $0x120] sm:$0xff]  ;;  %v3028_v39 = vpack.c.bf16 %v573_v31, %v572_v30  ;;  %v557_v38 = vld [vmem:[%s5570_s4 + $0x128] sm:$0xff]  ;;  %v574_v42 = vld [vmem:[%s5570_s4 + $0x1b0] sm:$0xff]  ;;  %v2998_v44 = vpack.c.bf16 %v525_v36, %v524_v35  ;;  %v3000_v46 = vpack.c.bf16 %v543_v41, %v542_v40 }
  0x49   :  { %3023 = vmatpush3.bf16.msra.mxu1 %v3022_v21  ;;  %2993 = vmatprep.subr.bf16.mxu0 %v2992_v22  ;;  %v575_v43 = vld [vmem:[%s5570_s4 + $0x1b8] sm:$0xff]  ;;  %v3030_v45 = vpack.c.bf16 %v557_v38, %v556_v37  ;;  %v526_v47 = vld [vmem:[%s5570_s4 + $0x30] sm:$0xff]  ;;  %v544_v52 = vld [vmem:[%s5570_s4 + $0xc0] sm:$0xff] }
  0x4a   :  { %3025 = vmatprep.subr.bf16.mxu1 %v3024_v26  ;;  %v527_v48 = vld [vmem:[%s5570_s4 + $0x38] sm:$0xff]  ;;  %v558_v49 = vld [vmem:[%s5570_s4 + $0x130] sm:$0xff]  ;;  %v3032_v50 = vpack.c.bf16 %v575_v43, %v574_v42  ;;  %v545_v53 = vld [vmem:[%s5570_s4 + $0xc8] sm:$0xff]  ;;  %v3540_v42 = vmov 0.0|0.0   ;;  %v188_v43 = vlaneseq }
  0x4b   :  { %v559_v51 = vld [vmem:[%s5570_s4 + $0x138] sm:$0xff]  ;;  %v576_v54 = vld [vmem:[%s5570_s4 + $0x1c0] sm:$0xff]  ;;  %v577_v55 = vld [vmem:[%s5570_s4 + $0x1c8] sm:$0xff]  ;;  %v3002_v56 = vpack.c.bf16 %v527_v48, %v526_v47  ;;  %v3004_v58 = vpack.c.bf16 %v545_v53, %v544_v52 }
  0x4c   :  { %2995 = vmatpush3.bf16.msra.mxu0 %v2994_v32  ;;  %v3034_v57 = vpack.c.bf16 %v559_v51, %v558_v49  ;;  %v528_v59 = vld [vmem:[%s5570_s4 + $0x40] sm:$0xff]  ;;  %v529_v60 = vld [vmem:[%s5570_s4 + $0x48] sm:$0xff]  ;;  %v3036_v62 = vpack.c.bf16 %v577_v55, %v576_v54  ;;  %v546_v0 = vld [vmem:[%s5570_s4 + $0xd0] sm:$0xff] }
  0x4d   :  { %3027 = vmatpush3.bf16.msra.mxu1 %v3026_v33  ;;  %2997 = vmatprep.subr.bf16.mxu0 %v2996_v34  ;;  %v560_v61 = vld [vmem:[%s5570_s4 + $0x140] sm:$0xff]  ;;  %v561_v63 = vld [vmem:[%s5570_s4 + $0x148] sm:$0xff]  ;;  %v547_v1 = vld [vmem:[%s5570_s4 + $0xd8] sm:$0xff]  ;;  %v3006_v4 = vpack.c.bf16 %v529_v60, %v528_v59 }
  0x4e   :  { %3029 = vmatprep.subr.bf16.mxu1 %v3028_v39  ;;  %v578_v2 = vld [vmem:[%s5570_s4 + $0x1d0] sm:$0xff]  ;;  %v579_v3 = vld [vmem:[%s5570_s4 + $0x1d8] sm:$0xff]  ;;  %v3038_v5 = vpack.c.bf16 %v561_v63, %v560_v61  ;;  %v3008_v6 = vpack.c.bf16 %v547_v1, %v546_v0  ;;  %v548_v13 = vld [vmem:[%s5570_s4 + $0xe0] sm:$0xff] }
  0x4f   :  { %v530_v8 = vld [vmem:[%s5570_s4 + $0x50] sm:$0xff]  ;;  %v531_v9 = vld [vmem:[%s5570_s4 + $0x58] sm:$0xff]  ;;  %v3040_v11 = vpack.c.bf16 %v579_v3, %v578_v2  ;;  %v549_v14 = vld [vmem:[%s5570_s4 + $0xe8] sm:$0xff] }
  0x50   :  { %2999 = vmatpush3.bf16.msra.mxu0 %v2998_v44  ;;  %v562_v10 = vld [vmem:[%s5570_s4 + $0x150] sm:$0xff]  ;;  %v563_v12 = vld [vmem:[%s5570_s4 + $0x158] sm:$0xff]  ;;  %v580_v15 = vld [vmem:[%s5570_s4 + $0x1e0] sm:$0xff]  ;;  %v3010_v17 = vpack.c.bf16 %v531_v9, %v530_v8  ;;  %v3012_v19 = vpack.c.bf16 %v549_v14, %v548_v13  ;;  %v4230_v44 = vshrl.u32 %v188_v43, 7 }
  0x51   :  { %3031 = vmatpush3.bf16.msra.mxu1 %v3030_v45  ;;  %3001 = vmatprep.subr.bf16.mxu0 %v3000_v46  ;;  %v581_v16 = vld [vmem:[%s5570_s4 + $0x1e8] sm:$0xff]  ;;  %v3042_v18 = vpack.c.bf16 %v563_v12, %v562_v10  ;;  %v532_v20 = vld [vmem:[%s5570_s4 + $0x60] sm:$0xff]  ;;  %v582_v27 = vld [vmem:[%s5570_s4 + $0x1f0] sm:$0xff] }
  0x52   :  { %3033 = vmatprep.subr.bf16.mxu1 %v3032_v50  ;;  %v533_v21 = vld [vmem:[%s5570_s4 + $0x68] sm:$0xff]  ;;  %v3044_v22 = vpack.c.bf16 %v581_v16, %v580_v15  ;;  %v564_v23 = vld [vmem:[%s5570_s4 + $0x160] sm:$0xff]  ;;  %v583_v28 = vld [vmem:[%s5570_s4 + $0x1f8] sm:$0xff]  ;;  %v4233_v45 = vsub.s32 0, %v4230_v44  ;;  %v4241_v47 = vsub.s32 2, %v4230_v44  ;;  %v4244_v48 = vsub.s32 1, %v4230_v44 }
  0x53   :  { %v565_v24 = vld [vmem:[%s5570_s4 + $0x168] sm:$0xff]  ;;  %v3014_v25 = vpack.c.bf16 %v533_v21, %v532_v20  ;;  %v550_v29 = vld [vmem:[%s5570_s4 + $0xf0] sm:$0xff]  ;;  %v551_v30 = vld [vmem:[%s5570_s4 + $0xf8] sm:$0xff]  ;;  %v3048_v31 = vpack.c.bf16 %v583_v28, %v582_v27  ;;  %v202_v49 = vsub.s32 3, %v4230_v44 }
  0x54   :  { %3003 = vmatpush3.bf16.msra.mxu0 %v3002_v56  ;;  %v3046_v26 = vpack.c.bf16 %v565_v24, %v564_v23  ;;  %v566_v32 = vld [vmem:[%s5570_s4 + $0x170] sm:$0xff]  ;;  %v3016_v33 = vpack.c.bf16 %v551_v30, %v550_v29  ;;  %v535_v35 = vld [vmem:[%s5570_s4 + $0x78] sm:$0xff]  ;;  %v600_v38 = vld [vmem:[%s5570_s4 + $0x280] sm:$0xff] }
  0x55   :  { %3035 = vmatpush3.bf16.msra.mxu1 %v3034_v57  ;;  %3005 = vmatprep.subr.bf16.mxu0 %v3004_v58  ;;  %v534_v34 = vld [vmem:[%s5570_s4 + $0x70] sm:$0xff]  ;;  %v567_v36 = vld [vmem:[%s5570_s4 + $0x178] sm:$0xff]  ;;  %v601_v40 = vld [vmem:[%s5570_s4 + $0x288] sm:$0xff] }
  0x56   :  { %3037 = vmatprep.subr.bf16.mxu1 %v3036_v62  ;;  %v3018_v37 = vpack.c.bf16 %v535_v35, %v534_v34  ;;  %v3050_v39 = vpack.c.bf16 %v567_v36, %v566_v32  ;;  %v3052_v41 = vpack.c.bf16 %v601_v40, %v600_v38  ;;  %v4238_v46 = vld [vmem:[%s5569_s3] sm:$0xff]  ;;  %v585_v59 = vld [vmem:[%s5570_s4 + $0x208] sm:$0xff]  ;;  %v602_v1 = vld [vmem:[%s5570_s4 + $0x290] sm:$0xff] }
  0x57   :  { %v191_v50 = vrot.slane %v4238_v46, %v4233_v45  ;;  %v199_v51 = vrot.slane %v4238_v46, %v4241_v47  ;;  %v195_v52 = vrot.slane %v4238_v46, %v4244_v48  ;;  %v203_v53 = vrot.slane %v4238_v46, %v202_v49  ;;  %v584_v58 = vld [vmem:[%s5570_s4 + $0x200] sm:$0xff]  ;;  %v617_v0 = vld [vmem:[%s5570_s4 + $0x308] sm:$0xff]  ;;  %v603_v2 = vld [vmem:[%s5570_s4 + $0x298] sm:$0xff] }
  0x58   :  { %3007 = vmatpush3.bf16.msra.mxu0 %v3006_v4  ;;  %v616_v60 = vld [vmem:[%s5570_s4 + $0x300] sm:$0xff]  ;;  %v3054_v8 = vpack.c.bf16 %v585_v59, %v584_v58  ;;  %v586_v12 = vld [vmem:[%s5570_s4 + $0x210] sm:$0xff]  ;;  %v587_v13 = vld [vmem:[%s5570_s4 + $0x218] sm:$0xff] }
  0x59   :  { %3039 = vmatpush3.bf16.msra.mxu1 %v3038_v5  ;;  %3009 = vmatprep.subr.bf16.mxu0 %v3008_v6  ;;  %v3085_v10 = vpack.c.bf16 %v617_v0, %v616_v60  ;;  %v618_v14 = vld [vmem:[%s5570_s4 + $0x310] sm:$0xff]  ;;  %v619_v15 = vld [vmem:[%s5570_s4 + $0x318] sm:$0xff]  ;;  %v604_v16 = vld [vmem:[%s5570_s4 + $0x2a0] sm:$0xff] }
  0x5a   :  { %3041 = vmatprep.subr.bf16.mxu1 %v3040_v11  ;;  %v3056_v11 = vpack.c.bf16 %v603_v2, %v602_v1  ;;  %v588_v21 = vld [vmem:[%s5570_s4 + $0x220] sm:$0xff]  ;;  %v621_v24 = vld [vmem:[%s5570_s4 + $0x328] sm:$0xff]  ;;  %v590_v30 = vld [vmem:[%s5570_s4 + $0x230] sm:$0xff]  ;;  %v206_v2 = vsub.s32 4, %v4230_v44 }
  0x5b   :  { %v620_v23 = vld [vmem:[%s5570_s4 + $0x320] sm:$0xff]  ;;  %v622_v32 = vld [vmem:[%s5570_s4 + $0x330] sm:$0xff]  ;;  %v609_v35 = vld [vmem:[%s5570_s4 + $0x2c8] sm:$0xff] }
  0x5c   :  { %3011 = vmatpush3.bf16.msra.mxu0 %v3010_v17  ;;  %v605_v17 = vld [vmem:[%s5570_s4 + $0x2a8] sm:$0xff]  ;;  %v3091_v28 = vpack.c.bf16 %v621_v24, %v620_v23  ;;  %v608_v34 = vld [vmem:[%s5570_s4 + $0x2c0] sm:$0xff]  ;;  %v610_v49 = vld [vmem:[%s5570_s4 + $0x2d0] sm:$0xff] }
  0x5d   :  { %3043 = vmatpush3.bf16.msra.mxu1 %v3042_v18  ;;  %3013 = vmatprep.subr.bf16.mxu0 %v3012_v19  ;;  %v3058_v18 = vpack.c.bf16 %v587_v13, %v586_v12  ;;  %v3088_v19 = vpack.c.bf16 %v619_v15, %v618_v14  ;;  %v3060_v20 = vpack.c.bf16 %v605_v17, %v604_v16  ;;  %v592_v38 = vld [vmem:[%s5570_s4 + $0x240] sm:$0xff]  ;;  %v593_v40 = vld [vmem:[%s5570_s4 + $0x248] sm:$0xff]  ;;  %v598_v13 = vld [vmem:[%s5570_s4 + $0x270] sm:$0xff] }
  0x5e   :  { %3045 = vmatprep.subr.bf16.mxu1 %v3044_v22  ;;  %v589_v22 = vld [vmem:[%s5570_s4 + $0x228] sm:$0xff]  ;;  %v612_v58 = vld [vmem:[%s5570_s4 + $0x2e0] sm:$0xff]  ;;  %v599_v14 = vld [vmem:[%s5570_s4 + $0x278] sm:$0xff] }
  0x5f   :  { %v3062_v27 = vpack.c.bf16 %v589_v22, %v588_v21  ;;  %v625_v43 = vld [vmem:[%s5570_s4 + $0x348] sm:$0xff]  ;;  %v628_v1 = vld [vmem:[%s5570_s4 + $0x360] sm:$0xff]  ;;  %v630_v15 = vld [vmem:[%s5570_s4 + $0x370] sm:$0xff]  ;;  %v3082_v22 = vpack.c.bf16 %v599_v14, %v598_v13 }
  0x60   :  { %3015 = vmatpush3.bf16.msra.mxu0 %v3014_v25  ;;  %v606_v25 = vld [vmem:[%s5570_s4 + $0x2b0] sm:$0xff]  ;;  %v613_v59 = vld [vmem:[%s5570_s4 + $0x2e8] sm:$0xff]  ;;  %v631_v17 = vld [vmem:[%s5570_s4 + $0x378] sm:$0xff] }
  0x61   :  { %3047 = vmatpush3.bf16.msra.mxu1 %v3046_v26  ;;  %3017 = vmatprep.subr.bf16.mxu0 %v3016_v33  ;;  %v607_v26 = vld [vmem:[%s5570_s4 + $0x2b8] sm:$0xff]  ;;  %v597_v0 = vld [vmem:[%s5570_s4 + $0x268] sm:$0xff]  ;;  %v642_v13 = vld [vmem:[%s5570_s4 + $0x3d0] sm:$0xff] }
  0x62   :  { %3049 = vmatprep.subr.bf16.mxu1 %v3048_v31  ;;  %v3064_v29 = vpack.c.bf16 %v607_v26, %v606_v25  ;;  %v591_v31 = vld [vmem:[%s5570_s4 + $0x238] sm:$0xff]  ;;  %v3106_v25 = vpack.c.bf16 %v631_v17, %v630_v15  ;;  %v1137_v17 = vld [vmem:[%s5574_s8 + $0x68] sm:$0xff]  ;;  %vm4901_vm7 = vmpackc.low %vm1277_vm5, %vm3542_vm6 }
  0x63   :  { %v623_v33 = vld [vmem:[%s5570_s4 + $0x338] sm:$0xff]  ;;  %v3066_v36 = vpack.c.bf16 %v591_v31, %v590_v30  ;;  %v632_v31 = vld [vmem:[%s5570_s4 + $0x380] sm:$0xff] }
  0x64   :  { %3019 = vmatpush3.bf16.msra.mxu0 %v3018_v37  ;;  %v3094_v37 = vpack.c.bf16 %v623_v33, %v622_v32  ;;  %v633_v32 = vld [vmem:[%s5570_s4 + $0x388] sm:$0xff]  ;;  %v643_v14 = vld [vmem:[%s5570_s4 + $0x3d8] sm:$0xff] }
  0x65   :  { %3051 = vmatpush3.bf16.msra.mxu1 %v3050_v39  ;;  %3053 = vmatprep.subr.bf16.mxu0 %v3052_v41  ;;  %v3068_v39 = vpack.c.bf16 %v609_v35, %v608_v34  ;;  %v624_v41 = vld [vmem:[%s5570_s4 + $0x340] sm:$0xff]  ;;  %v3124_v15 = vpack.c.bf16 %v643_v14, %v642_v13  ;;  %v1179_v13 = vld [vmem:[%s5574_s8 + $0x1b8] sm:$0xff]  ;;  %v1182_v14 = vld [vmem:[%s5574_s8 + $0x1d0] sm:$0xff] }
  0x66   :  { %3084 = vmatprep.subr.bf16.mxu1 %v3540_v42 }
  0xfa   :  { %v294_v54 = vpop.f32.mrb[0].mxu0 }
  0xfb   :  { %v295_v55 = vadd.f32 %v294_v54, %v191_v50  ;;  %v365_v56 = vpop.f32.mrb[0].mxu1  ;;  %v296_v57 = vpop.f32.mrb[1].mxu0  ;;  %v611_v50 = vld [vmem:[%s5570_s4 + $0x2d8] sm:$0xff]  ;;  %v594_v54 = vld [vmem:[%s5570_s4 + $0x250] sm:$0xff] }
  0xfc   :  { %v366_v61 = vadd.f32 %v365_v56, %v199_v51  ;;  %v297_v62 = vadd.f32 %v296_v57, %v195_v52  ;;  %v367_v63 = vpop.f32.mrb[1].mxu1  ;;  %v3070_v51 = vpack.c.bf16 %v593_v40, %v592_v38  ;;  %v3097_v52 = vpack.c.bf16 %v625_v43, %v624_v41  ;;  %v626_v56 = vld [vmem:[%s5570_s4 + $0x350] sm:$0xff]  ;;  %v627_v57 = vld [vmem:[%s5570_s4 + $0x358] sm:$0xff]  ;;  %v943_v41 = vld [vmem:[%s5572_s6 + $0x28] sm:$0xff] }
  0xfd   :  { %v512_v3 = vmax.f32 %v295_v55, 0.0  ;;  %v368_v4 = vadd.f32 %v367_v63, %v203_v53  ;;  %v3072_v53 = vpack.c.bf16 %v611_v50, %v610_v49  ;;  %v595_v55 = vld [vmem:[%s5570_s4 + $0x258] sm:$0xff]  ;;  %v596_v63 = vld [vmem:[%s5570_s4 + $0x260] sm:$0xff]  ;;  %v634_v38 = vld [vmem:[%s5570_s4 + $0x390] sm:$0xff] }
  0xfe   :  { %v514_v5 = vmax.f32 %v366_v61, 0.0  ;;  %v513_v6 = vmax.f32 %v297_v62, 0.0  ;;  %v3074_v60 = vpack.c.bf16 %v595_v55, %v594_v54  ;;  %v3100_v61 = vpack.c.bf16 %v627_v57, %v626_v56  ;;  %v940_v40 = vld [vmem:[%s5572_s6 + $0x10] sm:$0xff]  ;;  %v635_v49 = vld [vmem:[%s5570_s4 + $0x398] sm:$0xff]  ;;  %v1125_v50 = vld [vmem:[%s5574_s8 + $0x8] sm:$0xff] }
  0xff   :  { %v515_v9 = vmax.f32 %v368_v4, 0.0  ;;  %v3076_v62 = vpack.c.bf16 %v613_v59, %v612_v58  ;;  %v210_v4 = vsub.s32 5, %v4230_v44  ;;  %v3112_v54 = vpack.c.bf16 %v635_v49, %v634_v38  ;;  %v636_v55 = vld [vmem:[%s5570_s4 + $0x3a0] sm:$0xff]  ;;  %v1127_v58 = vld [vmem:[%s5574_s8 + $0x18] sm:$0xff]  ;;  %v637_v59 = vld [vmem:[%s5570_s4 + $0x3a8] sm:$0xff] }
 0x100   :  { %720 = vmatprep.mubr.f32.mxu0 %v513_v6  ;;  %v615_v6 = vld [vmem:[%s5570_s4 + $0x2f8] sm:$0xff]  ;;  %v1124_v57 = vld [vmem:[%s5574_s8] sm:$0xff]  ;;  %v1157_v38 = vld [vmem:[%s5574_s8 + $0x108] sm:$0xff] }
 0x101   :  { %790 = vmatprep.mubr.f32.mxu1 %v515_v9  ;;  %721 = vmatmul.mubr.f32.vlgmr.msra.gmra.mrb[4].mxu0 %v512_v3  ;;  %v629_v3 = vld [vmem:[%s5570_s4 + $0x368] sm:$0xff]  ;;  %v3078_v9 = vpack.c.bf16 %v597_v0, %v596_v63  ;;  %v211_v16 = vrot.slane %v4238_v46, %v210_v4  ;;  %v3115_v63 = vpack.c.bf16 %v637_v59, %v636_v55  ;;  %v639_v4 = vld [vmem:[%s5570_s4 + $0x3b8] sm:$0xff] }
 0x102   :  { %791 = vmatmul.mubr.f32.vlgmr.msra.gmra.mrb[4].mxu1 %v514_v5  ;;  %3055 = vmatpush3.bf16.msra.mxu0 %v3054_v8  ;;  %v614_v5 = vld [vmem:[%s5570_s4 + $0x2f0] sm:$0xff]  ;;  %v218_v8 = vsub.s32 7, %v4230_v44 }
 0x103   :  { %3086 = vmatpush1.bf16.msra.mxu1 %v3085_v10  ;;  %3057 = vmatprep.subr.bf16.mxu0 %v3056_v11  ;;  %v3103_v10 = vpack.c.bf16 %v629_v3, %v628_v1  ;;  %v207_v11 = vrot.slane %v4238_v46, %v206_v2  ;;  %v3080_v12 = vpack.c.bf16 %v615_v6, %v614_v5  ;;  %v1130_v1 = vld [vmem:[%s5574_s8 + $0x30] sm:$0xff]  ;;  %v1133_v2 = vld [vmem:[%s5574_s8 + $0x48] sm:$0xff] }
 0x104   :  { %3087 = vmatprep.subr.bf16.mxu1 %v3540_v42  ;;  %v638_v3 = vld [vmem:[%s5570_s4 + $0x3b0] sm:$0xff]  ;;  %v3139_v5 = vpack.c.bf16 %v1133_v2, %v1130_v1  ;;  %v1135_v1 = vld [vmem:[%s5574_s8 + $0x58] sm:$0xff] }
 0x105   :  { %v3118_v6 = vpack.c.bf16 %v639_v4, %v638_v3  ;;  %v1166_v3 = vld [vmem:[%s5574_s8 + $0x150] sm:$0xff]  ;;  %v1169_v4 = vld [vmem:[%s5574_s8 + $0x168] sm:$0xff] }
 0x106   :  { %3059 = vmatpush3.bf16.msra.mxu0 %v3058_v18  ;;  %v939_v18 = vld [vmem:[%s5572_s6 + $0x8] sm:$0xff] }
 0x107   :  { %3089 = vmatpush1.bf16.msra.mxu1 %v3088_v19  ;;  %3061 = vmatprep.subr.bf16.mxu0 %v3060_v20  ;;  %v942_v19 = vld [vmem:[%s5572_s6 + $0x20] sm:$0xff]  ;;  %v219_v20 = vrot.slane %v4238_v46, %v218_v8 }
 0x108   :  { %3090 = vmatprep.subr.bf16.mxu1 %v3540_v42  ;;  %v3126_v26 = vpack.c.bf16 %v942_v19, %v939_v18  ;;  %v640_v8 = vld [vmem:[%s5570_s4 + $0x3c0] sm:$0xff] }
 0x109   :  { %v1140_v18 = vld [vmem:[%s5574_s8 + $0x80] sm:$0xff] }
 0x10a   :  { %3063 = vmatpush3.bf16.msra.mxu0 %v3062_v27  ;;  %v938_v27 = vld [vmem:[%s5572_s6] sm:$0xff]  ;;  %v3141_v19 = vpack.c.bf16 %v1140_v18, %v1137_v17  ;;  %v1185_v18 = vld [vmem:[%s5574_s8 + $0x1e8] sm:$0xff] }
 0x10b   :  { %3092 = vmatpush1.bf16.msra.mxu1 %v3091_v28  ;;  %3065 = vmatprep.subr.bf16.mxu0 %v3064_v29  ;;  %v941_v28 = vld [vmem:[%s5572_s6 + $0x18] sm:$0xff] }
 0x10c   :  { %3093 = vmatprep.subr.bf16.mxu1 %v3540_v42 }
 0x10e   :  { %3067 = vmatpush3.bf16.msra.mxu0 %v3066_v36  ;;  %v3128_v36 = vpack.c.bf16 %v941_v28, %v938_v27  ;;  %v1145_v27 = vld [vmem:[%s5574_s8 + $0xa8] sm:$0xff] }
 0x10f   :  { %3095 = vmatpush1.bf16.msra.mxu1 %v3094_v37  ;;  %3069 = vmatprep.subr.bf16.mxu0 %v3068_v39  ;;  %v3109_v39 = vpack.c.bf16 %v633_v32, %v632_v31  ;;  %v1149_v28 = vld [vmem:[%s5574_s8 + $0xc8] sm:$0xff]  ;;  %v1148_v31 = vld [vmem:[%s5574_s8 + $0xc0] sm:$0xff]  ;;  %v1151_v32 = vld [vmem:[%s5574_s8 + $0xd8] sm:$0xff] }
 0x110   :  { %3096 = vmatprep.subr.bf16.mxu1 %v3540_v42 }
 0x112   :  { %3071 = vmatpush3.bf16.msra.mxu0 %v3070_v51  ;;  %v1128_v51 = vld [vmem:[%s5574_s8 + $0x20] sm:$0xff] }
 0x113   :  { %3098 = vmatpush1.bf16.msra.mxu1 %v3097_v52  ;;  %3073 = vmatprep.subr.bf16.mxu0 %v3072_v53  ;;  %v937_v52 = vld [vmem:[%s5587_s18] sm:$0x3]  ;;  %v3131_v53 = vpack.c.bf16 %v943_v41, %v940_v40  ;;  %v3133_v56 = vpack.c.bf16 %v1128_v51, %v1125_v50  ;;  %v1161_v40 = vld [vmem:[%s5574_s8 + $0x128] sm:$0xff]  ;;  %v1163_v51 = vld [vmem:[%s5574_s8 + $0x138] sm:$0xff] }
 0x114   :  { %3099 = vmatprep.subr.bf16.mxu1 %v3540_v42  ;;  %v1164_v41 = vld [vmem:[%s5574_s8 + $0x140] sm:$0xff] }
 0x115   :  { %v1160_v50 = vld [vmem:[%s5574_s8 + $0x120] sm:$0xff] }
 0x116   :  { %3075 = vmatpush3.bf16.msra.mxu0 %v3074_v60  ;;  %v1131_v60 = vld [vmem:[%s5574_s8 + $0x38] sm:$0xff] }
 0x117   :  { %3101 = vmatpush1.bf16.msra.mxu1 %v3100_v61  ;;  %3077 = vmatprep.subr.bf16.mxu0 %v3076_v62  ;;  %v1134_v61 = vld [vmem:[%s5574_s8 + $0x50] sm:$0xff]  ;;  %v3135_v62 = vpack.c.bf16 %v1127_v58, %v1124_v57  ;;  %v1129_v57 = vld [vmem:[%s5574_s8 + $0x28] sm:$0xff] }
 0x118   :  { %3102 = vmatprep.subr.bf16.mxu1 %v3540_v42  ;;  %v3137_v0 = vpack.c.bf16 %v1134_v61, %v1131_v60  ;;  %v1170_v58 = vld [vmem:[%s5574_s8 + $0x170] sm:$0xff]  ;;  %v1180_v60 = vld [vmem:[%s5574_s8 + $0x1c0] sm:$0xff]  ;;  %v1183_v61 = vld [vmem:[%s5574_s8 + $0x1d8] sm:$0xff] }
 0x11a   :  { %3079 = vmatpush3.bf16.msra.mxu0 %v3078_v9  ;;  %v436_v21 = vpop.f32.mrb[2].mxu0  ;;  %v641_v9 = vld [vmem:[%s5570_s4 + $0x3c8] sm:$0xff] }
 0x11b   :  { %3104 = vmatpush1.bf16.msra.mxu1 %v3103_v10  ;;  %v437_v23 = vadd.f32 %v436_v21, %v207_v11  ;;  %v438_v24 = vpop.f32.mrb[3].mxu0  ;;  %3081 = vmatprep.subr.bf16.mxu0 %v3080_v12  ;;  %v4416_v29 = vpop.f32.mrb[2].mxu1  ;;  %v214_v10 = vsub.s32 6, %v4230_v44  ;;  %v3121_v11 = vpack.c.bf16 %v641_v9, %v640_v8  ;;  %v1139_v21 = vld [vmem:[%s5574_s8 + $0x78] sm:$0xff]  ;;  %v1176_v8 = vld [vmem:[%s5574_s8 + $0x1a0] sm:$0xff]  ;;  %v3163_v9 = vpack.c.bf16 %v1169_v4, %v1166_v3 }
 0x11c   :  { %v439_v30 = vadd.f32 %v438_v24, %v211_v16  ;;  %3105 = vmatprep.subr.bf16.mxu1 %v3540_v42  ;;  %v509_v33 = vpop.f32.mrb[3].mxu1  ;;  %v1146_v24 = vld [vmem:[%s5574_s8 + $0xb0] sm:$0xff] }
 0x11d   :  { %v510_v34 = vadd.f32 %v509_v33, %v219_v20  ;;  %v516_v37 = vmax.f32 %v437_v23, 0.0  ;;  %v215_v12 = vrot.slane %v4238_v46, %v214_v10  ;;  %v644_v46 = vld [vmem:[%s5570_s4 + $0x3e0] sm:$0xff]  ;;  %v1143_v23 = vld [vmem:[%s5574_s8 + $0x98] sm:$0xff] }
 0x11e   :  { %v517_v35 = vmax.f32 %v439_v30, 0.0  ;;  %3083 = vmatpush3.bf16.msra.mxu0 %v3082_v22  ;;  %v1136_v20 = vld [vmem:[%s5574_s8 + $0x60] sm:$0xff] }
 0x11f   :  { %3107 = vmatpush1.bf16.msra.mxu1 %v3106_v25  ;;  %3127 = vmatprep.subr.bf16.mxu0 %v3126_v26  ;;  %v519_v43 = vmax.f32 %v510_v34, 0.0  ;;  %v508_v16 = vadd.f32 %v4416_v29, %v215_v12  ;;  %v3143_v22 = vpack.c.bf16 %v1139_v21, %v1136_v20  ;;  %v3145_v25 = vpack.c.bf16 %v1146_v24, %v1143_v23  ;;  %v1142_v26 = vld [vmem:[%s5574_s8 + $0x90] sm:$0xff]  ;;  %v1152_v30 = vld [vmem:[%s5574_s8 + $0xe0] sm:$0xff]  ;;  %v1155_v34 = vld [vmem:[%s5574_s8 + $0xf8] sm:$0xff] }
 0x120   :  { %860 = vmatprep.mubr.f32.mxu0 %v517_v35  ;;  %3108 = vmatprep.subr.bf16.mxu1 %v3540_v42  ;;  %v3147_v29 = vpack.c.bf16 %v1145_v27, %v1142_v26  ;;  %v3149_v33 = vpack.c.bf16 %v1152_v30, %v1149_v28  ;;  %v1158_v35 = vld [vmem:[%s5574_s8 + $0x110] sm:$0xff]  ;;  %v1175_v12 = vld [vmem:[%s5574_s8 + $0x198] sm:$0xff]  ;;  %v1184_v23 = vld [vmem:[%s5574_s8 + $0x1e0] sm:$0xff] }
 0x121   :  { %861 = vmatmul.mubr.f32.vlgmr.msra.gmra.mrb[6].mxu0 %v516_v37  ;;  %2440 = vmatprep.mubr.msk.f32.mxu1 %vm652_vm0, %v519_v43  ;;  %v518_v44 = vmax.f32 %v508_v16, 0.0  ;;  %v3153_v37 = vpack.c.bf16 %v1158_v35, %v1155_v34  ;;  %v1174_v43 = vld [vmem:[%s5574_s8 + $0x190] sm:$0xff]  ;;  %v3169_v16 = vpack.c.bf16 %v1182_v14, %v1179_v13  ;;  %v1187_v24 = vld [vmem:[%s5574_s8 + $0x1f8] sm:$0xff]  ;;  %v1141_v28 = vld [vmem:[%s5574_s8 + $0x88] sm:$0xff]  ;;  %vm2263_vm0 = vcmask 1041408  }
 0x122   :  { %3129 = vmatpush1.bf16.msra.mxu0 %v3128_v36  ;;  %1029 = vmatprep.mubr.f32.mxu0 %v3539_v7  ;;  %v3151_v36 = vpack.c.bf16 %v1151_v32, %v1148_v31  ;;  %v1186_v20 = vld [vmem:[%s5574_s8 + $0x1f0] sm:$0xff]  ;;  %v3175_v26 = vpack.c.bf16 %v1187_v24, %v1184_v23  ;;  %v1191_v30 = vld [vmem:[%s5574_s8 + $0x218] sm:$0xff]  ;;  %v1192_v32 = vld [vmem:[%s5574_s8 + $0x220] sm:$0xff] }
 0x123   :  { %3110 = vmatpush1.bf16.msra.mxu1 %v3109_v39  ;;  %3130 = vmatprep.subr.bf16.mxu0 %v3540_v42  ;;  %v1154_v39 = vld [vmem:[%s5574_s8 + $0xf0] sm:$0xff]  ;;  %v1195_v34 = vld [vmem:[%s5574_s8 + $0x238] sm:$0xff]  ;;  %v1213_v13 = vld [vmem:[%s5574_s8 + $0x2c8] sm:$0xff] }
 0x124   :  { %3111 = vmatprep.subr.bf16.mxu1 %v3540_v42  ;;  %v3155_v49 = vpack.c.bf16 %v1157_v38, %v1154_v39  ;;  %v1138_v27 = vld [vmem:[%s5574_s8 + $0x70] sm:$0xff]  ;;  %v1144_v38 = vld [vmem:[%s5574_s8 + $0xa0] sm:$0xff]  ;;  %v1219_v23 = vld [vmem:[%s5574_s8 + $0x2f8] sm:$0xff] }
 0x125   :  { %2441 = vmatmul.mubr.msk.f32.vlgmr.msra.gmra.mrb[8].mxu0 %vm961_vm1, %v937_v52  ;;  %v1194_v31 = vld [vmem:[%s5574_s8 + $0x230] sm:$0xff]  ;;  %v1208_v14 = vld [vmem:[%s5574_s8 + $0x2a0] sm:$0xff] }
 0x126   :  { %3132 = vmatpush3.bf16.msra.mxu0 %v3131_v53  ;;  %2742 = vmatprep.mubr.msk.f32.mxu0 %vm3541_vm2, %v3539_v7  ;;  %v3157_v53 = vpack.c.bf16 %v1164_v41, %v1161_v40  ;;  %v1190_v35 = vld [vmem:[%s5574_s8 + $0x210] sm:$0xff]  ;;  %v1147_v40 = vld [vmem:[%s5574_s8 + $0xb8] sm:$0xff] }
 0x127   :  { %3113 = vmatpush1.bf16.msra.mxu1 %v3112_v54  ;;  %3134 = vmatprep.subr.bf16.mxu0 %v3133_v56  ;;  %v1167_v54 = vld [vmem:[%s5574_s8 + $0x158] sm:$0xff]  ;;  %v1126_v56 = vld [vmem:[%s5574_s8 + $0x10] sm:$0xff]  ;;  %v3237_v41 = vpack.c.bf16 %v1147_v40, %v1144_v38 }
 0x128   :  { %3114 = vmatprep.subr.bf16.mxu1 %v3540_v42  ;;  %v3225_v59 = vpack.c.bf16 %v1129_v57, %v1126_v56  ;;  %v3161_v2 = vpack.c.bf16 %v1170_v58, %v1167_v54  ;;  %v1199_v54 = vld [vmem:[%s5574_s8 + $0x258] sm:$0xff]  ;;  %v1150_v57 = vld [vmem:[%s5574_s8 + $0xd0] sm:$0xff]  ;;  %v1153_v58 = vld [vmem:[%s5574_s8 + $0xe8] sm:$0xff] }
 0x129   :  { %2743 = vmatmul.mubr.msk.f32.vlgmr.msra.gmra.mrb[10].mxu0 %vm961_vm1, %v937_v52  ;;  %v1177_v52 = vld [vmem:[%s5574_s8 + $0x1a8] sm:$0xff]  ;;  %v1214_v24 = vld [vmem:[%s5574_s8 + $0x2d0] sm:$0xff]  ;;  %vm2259_vm1 = vcmask 408576  }
 0x12a   :  { %3136 = vmatpush1.bf16.msra.mxu0 %v3135_v62  ;;  %v3223_v55 = vpack.c.bf16 %v1177_v52, %v1174_v43  ;;  %v3227_v62 = vpack.c.bf16 %v1183_v61, %v1180_v60  ;;  %v1197_v43 = vld [vmem:[%s5574_s8 + $0x248] sm:$0xff]  ;;  %v1203_v60 = vld [vmem:[%s5574_s8 + $0x278] sm:$0xff]  ;;  %v1206_v61 = vld [vmem:[%s5574_s8 + $0x290] sm:$0xff] }
 0x12b   :  { %3116 = vmatpush1.bf16.msra.mxu1 %v3115_v63  ;;  %3138 = vmatprep.subr.bf16.mxu0 %v3137_v0  ;;  %v1132_v63 = vld [vmem:[%s5574_s8 + $0x40] sm:$0xff]  ;;  %v3159_v0 = vpack.c.bf16 %v1163_v51, %v1160_v50  ;;  %v1198_v50 = vld [vmem:[%s5574_s8 + $0x250] sm:$0xff]  ;;  %v1201_v52 = vld [vmem:[%s5574_s8 + $0x268] sm:$0xff] }
 0x12c   :  { %3117 = vmatprep.subr.bf16.mxu1 %v3540_v42 }
 0x12e   :  { %3140 = vmatpush1.bf16.msra.mxu0 %v3139_v5  ;;  %v3229_v5 = vpack.c.bf16 %v1135_v1, %v1132_v63  ;;  %v3185_v63 = vpack.c.bf16 %v1206_v61, %v1203_v60  ;;  %v1202_v1 = vld [vmem:[%s5574_s8 + $0x270] sm:$0xff] }
 0x12f   :  { %3119 = vmatpush1.bf16.msra.mxu1 %v3118_v6  ;;  %3142 = vmatprep.subr.bf16.mxu0 %v3141_v19  ;;  %v1173_v6 = vld [vmem:[%s5574_s8 + $0x188] sm:$0xff]  ;;  %v1188_v19 = vld [vmem:[%s5574_s8 + $0x200] sm:$0xff] }
 0x130   :  { %3120 = vmatprep.subr.bf16.mxu1 %v3540_v42  ;;  %v3165_v10 = vpack.c.bf16 %v1176_v8, %v1173_v6  ;;  %v3173_v21 = vpack.c.bf16 %v1188_v19, %v1185_v18  ;;  %v1159_v6 = vld [vmem:[%s5574_s8 + $0x118] sm:$0xff] }
 0x131   :  { %v1215_v19 = vld [vmem:[%s5574_s8 + $0x2d8] sm:$0xff] }
 0x132   :  { %3144 = vmatpush1.bf16.msra.mxu0 %v3143_v22  ;;  %v1189_v22 = vld [vmem:[%s5574_s8 + $0x208] sm:$0xff] }
 0x133   :  { %3122 = vmatpush1.bf16.msra.mxu1 %v3121_v11  ;;  %3146 = vmatprep.subr.bf16.mxu0 %v3145_v25  ;;  %v1172_v11 = vld [vmem:[%s5574_s8 + $0x180] sm:$0xff]  ;;  %v3231_v25 = vpack.c.bf16 %v1189_v22, %v1186_v20  ;;  %v1218_v20 = vld [vmem:[%s5574_s8 + $0x2f0] sm:$0xff] }
 0x134   :  { %3123 = vmatprep.subr.bf16.mxu1 %v3540_v42  ;;  %v3193_v22 = vpack.c.bf16 %v1218_v20, %v1215_v19  ;;  %v1229_v19 = vld [vmem:[%s5574_s8 + $0x348] sm:$0xff]  ;;  %v1228_v20 = vld [vmem:[%s5574_s8 + $0x340] sm:$0xff] }
 0x136   :  { %3148 = vmatpush1.bf16.msra.mxu0 %v3147_v29  ;;  %v3233_v29 = vpack.c.bf16 %v1141_v28, %v1138_v27  ;;  %v1168_v28 = vld [vmem:[%s5574_s8 + $0x160] sm:$0xff] }
 0x137   :  { %3125 = vmatpush1.bf16.msra.mxu1 %v3124_v15  ;;  %3150 = vmatprep.subr.bf16.mxu0 %v3149_v33  ;;  %v3167_v15 = vpack.c.bf16 %v1175_v12, %v1172_v11  ;;  %v3177_v33 = vpack.c.bf16 %v1194_v31, %v1191_v30  ;;  %v1210_v11 = vld [vmem:[%s5574_s8 + $0x2b0] sm:$0xff]  ;;  %v1221_v31 = vld [vmem:[%s5574_s8 + $0x308] sm:$0xff] }
 0x138   :  { %922 = vmatprep.subr.mxu1 %v3539_v7 }
 0x13a   :  { %3152 = vmatpush1.bf16.msra.mxu0 %v3151_v36  ;;  %v1193_v36 = vld [vmem:[%s5574_s8 + $0x228] sm:$0xff] }
 0x13b   :  { %923 = vmatpush1.msra.mxu1 %v644_v46  ;;  %3154 = vmatprep.subr.bf16.mxu0 %v3153_v37  ;;  %v1181_v46 = vld [vmem:[%s5574_s8 + $0x1c8] sm:$0xff]  ;;  %v3235_v37 = vpack.c.bf16 %v1195_v34, %v1192_v32  ;;  %v3179_v39 = vpack.c.bf16 %v1193_v36, %v1190_v35  ;;  %v1224_v32 = vld [vmem:[%s5574_s8 + $0x320] sm:$0xff] }
 0x13c   :  { %931 = vmatmul.mubr.f32.vlgmr.msra.gmra.mrb[6].mxu1 %v518_v44  ;;  %3224 = vmatprep.subr.bf16.mxu1 %v3223_v55  ;;  %v1178_v44 = vld [vmem:[%s5574_s8 + $0x1b0] sm:$0xff]  ;;  %v3239_v55 = vpack.c.bf16 %v1201_v52, %v1198_v50  ;;  %v2439_v35 = vld [vmem:[%s5571_s5] ss:$0 sm:$0xff]  ;;  %s3543_s5 = smov [#allocation2]  }
 0x13d   :  { %3226 = vmatpush3.bf16.msra.mxu1 %v3225_v59  ;;  %v3171_v17 = vpack.c.bf16 %v1181_v46, %v1178_v44  ;;  %v3241_v59 = vpack.c.bf16 %v1153_v58, %v1150_v57  ;;  %v1162_v46 = vld [vmem:[%s5574_s8 + $0x130] sm:$0xff] }
 0x13e   :  { %3156 = vmatpush1.bf16.msra.mxu0 %v3155_v49  ;;  %3228 = vmatprep.subr.bf16.mxu1 %v3227_v62  ;;  %v1200_v49 = vld [vmem:[%s5574_s8 + $0x260] sm:$0xff] }
 0x13f   :  { %3158 = vmatprep.subr.bf16.mxu0 %v3157_v53  ;;  %v3181_v51 = vpack.c.bf16 %v1200_v49, %v1197_v43  ;;  %v1196_v53 = vld [vmem:[%s5574_s8 + $0x240] sm:$0xff] }
 0x140   :  { %v3183_v56 = vpack.c.bf16 %v1199_v54, %v1196_v53  ;;  %v1204_v62 = vld [vmem:[%s5574_s8 + $0x280] sm:$0xff] }
 0x141   :  { %3230 = vmatpush3.bf16.msra.mxu1 %v3229_v5  ;;  %v1156_v5 = vld [vmem:[%s5574_s8 + $0x100] sm:$0xff] }
 0x142   :  { %3160 = vmatpush1.bf16.msra.mxu0 %v3159_v0  ;;  %3232 = vmatprep.subr.bf16.mxu1 %v3231_v25  ;;  %v1207_v0 = vld [vmem:[%s5574_s8 + $0x298] sm:$0xff]  ;;  %v3245_v8 = vpack.c.bf16 %v1159_v6, %v1156_v5  ;;  %v1217_v25 = vld [vmem:[%s5574_s8 + $0x2e8] sm:$0xff]  ;;  %v944_v49 = vld [vmem:[%s5573_s7] sm:$0x7]  ;;  %s2431_s7 = sshll.u32 %s3543_s5, 4  ;;  %s2432_s7 = int_to_ptr.vmem [resolvable:$true] %s2431_s7 }
 0x143   :  { %3162 = vmatprep.subr.bf16.mxu0 %v3161_v2  ;;  %v1205_v2 = vld [vmem:[%s5574_s8 + $0x288] sm:$0xff]  ;;  %v3243_v3 = vpack.c.bf16 %v1207_v0, %v1204_v62  ;;  %v3195_v27 = vpack.c.bf16 %v1217_v25, %v1214_v24  ;;  %v949_v52 = vrot.slane %v944_v49, %v4233_v45  ;;  %v953_v54 = vrot.slane %v944_v49, %v4244_v48  ;;  %v1223_v6 = vld [vmem:[%s5574_s8 + $0x318] sm:$0xff]  ;;  %v1236_v24 = vld [vmem:[%s5574_s8 + $0x380] sm:$0xff]  ;;  %p3520_p1 = scmp.lt.s32.totalorder %s2432_s7, %s2432_s7 }
 0x144   :  { %v3187_v4 = vpack.c.bf16 %v1205_v2, %v1202_v1  ;;  %v957_v2 = vrot.slane %v944_v49, %v4241_v47  ;;  %v1240_v49 = vld [vmem:[%s5574_s8 + $0x3a0] sm:$0xff] }
 0x145   :  { %3234 = vmatpush3.bf16.msra.mxu1 %v3233_v29  ;;  %v1171_v29 = vld [vmem:[%s5574_s8 + $0x178] sm:$0xff] }
 0x146   :  { %3164 = vmatpush1.bf16.msra.mxu0 %v3163_v9  ;;  %3236 = vmatprep.subr.bf16.mxu1 %v3235_v37  ;;  %v1209_v9 = vld [vmem:[%s5574_s8 + $0x2a8] sm:$0xff]  ;;  %v3253_v30 = vpack.c.bf16 %v1171_v29, %v1168_v28  ;;  %v1232_v29 = vld [vmem:[%s5574_s8 + $0x360] sm:$0xff] }
 0x147   :  { %3166 = vmatprep.subr.bf16.mxu0 %v3165_v10  ;;  %v1212_v10 = vld [vmem:[%s5574_s8 + $0x2c0] sm:$0xff] }
 0x148   :  { %v3189_v12 = vpack.c.bf16 %v1212_v10, %v1209_v9  ;;  %v1225_v9 = vld [vmem:[%s5574_s8 + $0x328] sm:$0xff] }
 0x149   :  { %3238 = vmatpush3.bf16.msra.mxu1 %v3237_v41 }
 0x14a   :  { %3168 = vmatpush1.bf16.msra.mxu0 %v3167_v15  ;;  %3240 = vmatprep.subr.bf16.mxu1 %v3239_v55  ;;  %v1211_v15 = vld [vmem:[%s5574_s8 + $0x2b8] sm:$0xff] }
 0x14b   :  { %3170 = vmatprep.subr.bf16.mxu0 %v3169_v16  ;;  %v3247_v16 = vpack.c.bf16 %v1213_v13, %v1210_v11  ;;  %v3191_v44 = vpack.c.bf16 %v1211_v15, %v1208_v14  ;;  %v1230_v13 = vld [vmem:[%s5574_s8 + $0x350] sm:$0xff] }
 0x14d   :  { %3242 = vmatpush3.bf16.msra.mxu1 %v3241_v59 }
 0x14e   :  { %3172 = vmatpush1.bf16.msra.mxu0 %v3171_v17  ;;  %3244 = vmatprep.subr.bf16.mxu1 %v3243_v3  ;;  %v1165_v17 = vld [vmem:[%s5574_s8 + $0x148] sm:$0xff]  ;;  %v1220_v3 = vld [vmem:[%s5574_s8 + $0x300] sm:$0xff] }
 0x14f   :  { %3174 = vmatprep.subr.bf16.mxu0 %v3173_v21  ;;  %v3249_v18 = vpack.c.bf16 %v1165_v17, %v1162_v46  ;;  %v1216_v21 = vld [vmem:[%s5574_s8 + $0x2e0] sm:$0xff]  ;;  %v3199_v15 = vpack.c.bf16 %v1223_v6, %v1220_v3 }
 0x150   :  { %v1252_v3 = vld [vmem:[%s5574_s8 + $0x400] sm:$0xff] }
 0x151   :  { %3246 = vmatpush3.bf16.msra.mxu1 %v3245_v8  ;;  %v1222_v8 = vld [vmem:[%s5574_s8 + $0x310] sm:$0xff] }
 0x152   :  { %3176 = vmatpush1.bf16.msra.mxu0 %v3175_v26  ;;  %3248 = vmatprep.subr.bf16.mxu1 %v3247_v16  ;;  %v3251_v26 = vpack.c.bf16 %v1219_v23, %v1216_v21  ;;  %v3256_v16 = vpack.c.bf16 %v1225_v9, %v1222_v8  ;;  %v1231_v21 = vld [vmem:[%s5574_s8 + $0x358] sm:$0xff]  ;;  %v1233_v23 = vld [vmem:[%s5574_s8 + $0x368] sm:$0xff]  ;;  %v1591_v9 = vld [vmem:[%s5576_s10 + $0x20] sm:$0xff] }
 0x153   :  { %3178 = vmatprep.subr.bf16.mxu0 %v3177_v33  ;;  %v3197_v33 = vpack.c.bf16 %v1224_v32, %v1221_v31  ;;  %v3259_v28 = vpack.c.bf16 %v1231_v21, %v1228_v20  ;;  %v3205_v32 = vpack.c.bf16 %v1236_v24, %v1233_v23  ;;  %v1588_v8 = vld [vmem:[%s5576_s10 + $0x8] sm:$0xff]  ;;  %v1603_v23 = vld [vmem:[%s5576_s10 + $0x80] sm:$0xff] }
 0x154   :  { %v1596_v20 = vld [vmem:[%s5576_s10 + $0x48] sm:$0xff] }
 0x155   :  { %3250 = vmatpush3.bf16.msra.mxu1 %v3249_v18 }
 0x156   :  { %3180 = vmatpush1.bf16.msra.mxu0 %v3179_v39  ;;  %3252 = vmatprep.subr.bf16.mxu1 %v3251_v26 }
 0x157   :  { %3182 = vmatprep.subr.bf16.mxu0 %v3181_v51 }
 0x159   :  { %3254 = vmatpush3.bf16.msra.mxu1 %v3253_v30 }
 0x15a   :  { %3184 = vmatpush1.bf16.msra.mxu0 %v3183_v56  ;;  %3255 = vmatprep.subr.bf16.mxu1 %v3540_v42 }
 0x15b   :  { %3186 = vmatprep.subr.bf16.mxu0 %v3185_v63 }
 0x15e   :  { %3188 = vmatpush1.bf16.msra.mxu0 %v3187_v4 }
 0x15f   :  { %3190 = vmatprep.subr.bf16.mxu0 %v3189_v12  ;;  %v1227_v12 = vld [vmem:[%s5574_s8 + $0x338] sm:$0xff] }
 0x160   :  { %v3201_v18 = vpack.c.bf16 %v1230_v13, %v1227_v12  ;;  %v3274_v13 = vpack.c.bf16 %v1591_v9, %v1588_v8  ;;  %v1589_v8 = vld [vmem:[%s5576_s10 + $0x10] sm:$0xff]  ;;  %v1592_v9 = vld [vmem:[%s5576_s10 + $0x28] sm:$0xff] }
 0x162   :  { %3192 = vmatpush1.bf16.msra.mxu0 %v3191_v44  ;;  %v1226_v44 = vld [vmem:[%s5574_s8 + $0x330] sm:$0xff] }
 0x163   :  { %3194 = vmatprep.subr.bf16.mxu0 %v3193_v22 }
 0x166   :  { %3196 = vmatpush1.bf16.msra.mxu0 %v3195_v27  ;;  %v3203_v27 = vpack.c.bf16 %v1229_v19, %v1226_v44  ;;  %v1594_v44 = vld [vmem:[%s5576_s10 + $0x38] sm:$0xff]  ;;  %v1593_v19 = vld [vmem:[%s5576_s10 + $0x30] sm:$0xff] }
 0x167   :  { %3198 = vmatprep.subr.bf16.mxu0 %v3197_v33  ;;  %v1235_v33 = vld [vmem:[%s5574_s8 + $0x378] sm:$0xff]  ;;  %v3280_v24 = vpack.c.bf16 %v1596_v20, %v1593_v19  ;;  %v1645_v19 = vld [vmem:[%s5576_s10 + $0x1d0] sm:$0xff] }
 0x1d4   :  { %v2502_v34 = vpop.f32.mrb[4].mxu0 }
 0x1d5   :  { %v2503_v36 = vpop.f32.mrb[5].mxu0  ;;  %v2537_v37 = vpop.f32.mrb[4].mxu1 }
 0x1d6   :  { %v2504_v39 = vadd.f32 %v2503_v36, %v2502_v34  ;;  %v2538_v38 = vpop.f32.mrb[5].mxu1  ;;  %v1234_v34 = vld [vmem:[%s5574_s8 + $0x370] sm:$0xff]  ;;  %v1239_v36 = vld [vmem:[%s5574_s8 + $0x398] sm:$0xff] }
 0x1d7   :  { %v2539_v40 = vadd.f32 %v2538_v38, %v2537_v37  ;;  %v1242_v37 = vld [vmem:[%s5574_s8 + $0x3b0] sm:$0xff] }
 0x1d8   :  { %v723_v41 = vadd.f32 %v2504_v39, %v2439_v35  ;;  %v1237_v35 = vld [vmem:[%s5574_s8 + $0x388] sm:$0xff]  ;;  %v3207_v39 = vpack.c.bf16 %v1235_v33, %v1232_v29  ;;  %v1609_v29 = vld [vmem:[%s5576_s10 + $0xb0] sm:$0xff] }
 0x1d9   :  { %v3262_v38 = vpack.c.bf16 %v1237_v35, %v1234_v34  ;;  %v1608_v33 = vld [vmem:[%s5576_s10 + $0xa8] sm:$0xff]  ;;  %v1615_v35 = vld [vmem:[%s5576_s10 + $0xe0] sm:$0xff] }
 0x1da   :  { %v793_v43 = vadd.f32 %v2539_v40, %v723_v41  ;;  %v1238_v40 = vld [vmem:[%s5574_s8 + $0x390] sm:$0xff]  ;;  %v3209_v41 = vpack.c.bf16 %v1242_v37, %v1239_v36  ;;  %v1612_v34 = vld [vmem:[%s5576_s10 + $0xc8] sm:$0xff] }
 0x1db   :  { %v3290_v37 = vpack.c.bf16 %v1615_v35, %v1612_v34  ;;  %v1647_v35 = vld [vmem:[%s5576_s10 + $0x1e0] sm:$0xff] }
 0x1f4   :  { %v2572_v50 = vpop.f32.mrb[6].mxu0 }
 0x1f5   :  { %v2573_v51 = vpop.f32.mrb[7].mxu0 }
 0x1f6   :  { %v2574_v53 = vadd.f32 %v2573_v51, %v2572_v50  ;;  %v1243_v50 = vld [vmem:[%s5574_s8 + $0x3b8] sm:$0xff]  ;;  %v1245_v51 = vld [vmem:[%s5574_s8 + $0x3c8] sm:$0xff] }
 0x1f8   :  { %v1031_v55 = vpop.f32.mrb[8].mxu0  ;;  %v863_v56 = vadd.f32 %v2574_v53, %v793_v43  ;;  %v1241_v43 = vld [vmem:[%s5574_s8 + $0x3a8] sm:$0xff] }
 0x1f9   :  { %v1032_v57 = vadd.f32 %v1031_v55, %v949_v52  ;;  %v1033_v58 = vpop.f32.mrb[9].mxu0  ;;  %v1248_v52 = vld [vmem:[%s5574_s8 + $0x3e0] sm:$0xff]  ;;  %v3211_v53 = vpack.c.bf16 %v1241_v43, %v1238_v40  ;;  %v1621_v43 = vld [vmem:[%s5576_s10 + $0x110] sm:$0xff] }
 0x1fa   :  { %v1034_v59 = vadd.f32 %v1033_v58, %v953_v54  ;;  %v3265_v54 = vpack.c.bf16 %v1243_v50, %v1240_v49  ;;  %v1244_v55 = vld [vmem:[%s5574_s8 + $0x3c0] sm:$0xff]  ;;  %v1246_v58 = vld [vmem:[%s5574_s8 + $0x3d0] sm:$0xff] }
 0x1fb   :  { %v1109_v60 = vmin.f32 %v1032_v57, 0.0  ;;  %vm1106_vm4 = vcmp.gt.f32.partialorder %v1032_v57, 0.0  ;;  %v1617_v50 = vld [vmem:[%s5576_s10 + $0xf0] sm:$0xff] }
 0x1fc   :  { %v1110_v61 = vmin.f32 %v1034_v59, 0.0  ;;  %v1102_v62 = vpop.f32.mrb[10].mxu0  ;;  %vm1107_vm3 = vcmp.gt.f32.partialorder %v1034_v59, 0.0 }
 0x1fd   :  { %v1112_v63 = vmul.f32 1.442695, %v1109_v60  ;;  %v2744_v0 = vpop.f32.mrb[11].mxu0  ;;  %v4790_v5 = vadd.f32 %v1102_v62, %v957_v2  ;;  %v1251_v60 = vld [vmem:[%s5574_s8 + $0x3f8] sm:$0xff]  ;;  %v1253_v2 = vld [vmem:[%s5574_s8 + $0x408] sm:$0x3f] }
 0x1fe   :  { %v1114_v1 = vmul.f32 1.442695, %v1110_v61  ;;  %v1254_v61 = vld [vmem:[%s5574_s8 + $0x410] sm:$0x3f] }
 0x1ff   :  { %3497 = vpow2.f32 %v1112_v63  ;;  %v1111_v46 = vmin.f32 %v4790_v5, 0.0  ;;  %v1250_v0 = vld [vmem:[%s5574_s8 + $0x3f0] sm:$0xff]  ;;  %vm1108_vm8 = vcmp.gt.f32.partialorder %v4790_v5, 0.0 }
 0x200   :  { %3499 = vpow2.f32 %v1114_v1  ;;  %v3217_v1 = vpack.c.bf16 %v1254_v61, %v1251_v60  ;;  %v1629_v61 = vld [vmem:[%s5576_s10 + $0x150] sm:$0xff] }
 0x201   :  { %v1116_v31 = vmul.f32 1.442695, %v1111_v46  ;;  %v1597_v46 = vld [vmem:[%s5576_s10 + $0x50] sm:$0xff] }
 0x203   :  { %3501 = vpow2.f32 %v1116_v31 }
 0x209   :  { %v3498_v4 = vpop.eup %3497 }
 0x20a   :  { %v3500_v10 = vpop.eup %3499  ;;  %v2443_v11 = vadd.f32 -1.0, %v3498_v4  ;;  %v1255_v4 = vld [vmem:[%s5574_s8 + $0x418] sm:$0x3f] }
 0x20b   :  { %v2444_v14 = vadd.f32 -1.0, %v3500_v10  ;;  %v3271_v12 = vpack.c.bf16 %v1255_v4, %v1252_v3  ;;  %v1639_v3 = vld [vmem:[%s5576_s10 + $0x1a0] sm:$0xff] }
 0x20c   :  { %v1121_v22 = vsel %vm1106_vm4, %v1032_v57, %v2443_v11  ;;  %v1247_v57 = vld [vmem:[%s5574_s8 + $0x3d8] sm:$0xff]  ;;  %v3220_v11 = vpack.c.bf16 %v1253_v2, %v1250_v0  ;;  %v1637_v0 = vld [vmem:[%s5576_s10 + $0x190] sm:$0xff]  ;;  %v1636_v2 = vld [vmem:[%s5576_s10 + $0x188] sm:$0xff] }
 0x20d   :  { %v1122_v17 = vsel %vm1107_vm3, %v1034_v59, %v2444_v14  ;;  %v1249_v59 = vld [vmem:[%s5574_s8 + $0x3e8] sm:$0xff]  ;;  %v3215_v62 = vpack.c.bf16 %v1247_v57, %v1244_v55  ;;  %v3502_v10 = vpop.eup %3501  ;;  %v1587_v14 = vld [vmem:[%s5576_s10] sm:$0xff]  ;;  %v1626_v57 = vld [vmem:[%s5576_s10 + $0x138] sm:$0xff] }
 0x20e   :  { %1351 = vmatprep.mubr.f32.mxu0 %v1122_v17  ;;  %1493 = vmatprep.mubr.f32.mxu1 %v1122_v17  ;;  %v3268_v63 = vpack.c.bf16 %v1249_v59, %v1246_v58  ;;  %v1623_v55 = vld [vmem:[%s5576_s10 + $0x120] sm:$0xff]  ;;  %v1630_v58 = vld [vmem:[%s5576_s10 + $0x158] sm:$0xff]  ;;  %v1633_v59 = vld [vmem:[%s5576_s10 + $0x170] sm:$0xff] }
 0x20f   :  { %v932_v25 = vpop.f32.mrb[6].mxu1  ;;  %1352 = vmatmul.mubr.f32.vlgmr.msra.gmra.mrb[12].mxu0 %v1121_v22  ;;  %1494 = vmatmul.mubr.f32.vlgmr.msra.gmra.mrb[8].mxu1 %v1121_v22  ;;  %v1600_v22 = vld [vmem:[%s5576_s10 + $0x68] sm:$0xff]  ;;  %v3300_v60 = vpack.c.bf16 %v1626_v57, %v1623_v55  ;;  %v1663_v57 = vld [vmem:[%s5576_s10 + $0x260] sm:$0xff] }
 0x210   :  { %v4826_v26 = vadd.f32 %v932_v25, %v863_v56  ;;  %3200 = vmatpush1.bf16.msra.mxu0 %v3199_v15  ;;  %3257 = vmatpush3.bf16.msra.mxu1 %v3256_v16  ;;  %v934_v30 = vpop.f32.mrb[7].mxu1  ;;  %v3213_v56 = vpack.c.bf16 %v1248_v52, %v1245_v51  ;;  %v1590_v15 = vld [vmem:[%s5576_s10 + $0x18] sm:$0xff]  ;;  %v2445_v16 = vadd.f32 -1.0, %v3502_v10  ;;  %v3282_v25 = vpack.c.bf16 %v1603_v23, %v1600_v22  ;;  %v1620_v51 = vld [vmem:[%s5576_s10 + $0x108] sm:$0xff] }
 0x211   :  { %3202 = vmatprep.subr.bf16.mxu0 %v3201_v18  ;;  %3258 = vmatprep.subr.bf16.mxu1 %v3540_v42  ;;  %v3276_v17 = vpack.c.bf16 %v1590_v15, %v1587_v14  ;;  %v3278_v18 = vpack.c.bf16 %v1597_v46, %v1594_v44  ;;  %v3296_v52 = vpack.c.bf16 %v1620_v51, %v1617_v50  ;;  %v1646_v14 = vld [vmem:[%s5576_s10 + $0x1d8] sm:$0xff]  ;;  %v1595_v46 = vld [vmem:[%s5576_s10 + $0x40] sm:$0xff]  ;;  %v1652_v22 = vld [vmem:[%s5576_s10 + $0x208] sm:$0xff] }
 0x212   :  { %1422 = vmatprep.mubr.f32.mxu0 %v3539_v7  ;;  %2769 = vmatprep.mubr.msk.f32.mxu1 %vm3541_vm2, %v3539_v7  ;;  %v1123_v21 = vsel %vm1108_vm8, %v4790_v5, %v2445_v16  ;;  %v1599_v5 = vld [vmem:[%s5576_s10 + $0x60] sm:$0xff]  ;;  %v3306_v15 = vpack.c.bf16 %v1639_v3, %v1636_v2  ;;  %v1638_v16 = vld [vmem:[%s5576_s10 + $0x198] sm:$0xff]  ;;  %v1656_v50 = vld [vmem:[%s5576_s10 + $0x228] sm:$0xff] }
 0x213   :  { %v1616_v2 = vld [vmem:[%s5576_s10 + $0xe8] sm:$0xff] }
 0x214   :  { %3204 = vmatpush1.bf16.msra.mxu0 %v3203_v27  ;;  %3260 = vmatpush3.bf16.msra.mxu1 %v3259_v28  ;;  %v1602_v27 = vld [vmem:[%s5576_s10 + $0x78] sm:$0xff] }
 0x215   :  { %3206 = vmatprep.subr.bf16.mxu0 %v3205_v32  ;;  %3261 = vmatprep.subr.bf16.mxu1 %v3540_v42  ;;  %v1606_v28 = vld [vmem:[%s5576_s10 + $0x98] sm:$0xff]  ;;  %v3284_v30 = vpack.c.bf16 %v1602_v27, %v1599_v5  ;;  %v1605_v32 = vld [vmem:[%s5576_s10 + $0x90] sm:$0xff]  ;;  %v1604_v5 = vld [vmem:[%s5576_s10 + $0x88] sm:$0xff] }
 0x216   :  { %v3286_v31 = vpack.c.bf16 %v1609_v29, %v1606_v28  ;;  %v3288_v36 = vpack.c.bf16 %v1608_v33, %v1605_v32  ;;  %v1641_v28 = vld [vmem:[%s5576_s10 + $0x1b0] sm:$0xff]  ;;  %v1644_v29 = vld [vmem:[%s5576_s10 + $0x1c8] sm:$0xff] }
 0x217   :  { %v3312_v33 = vpack.c.bf16 %v1644_v29, %v1641_v28  ;;  %v1678_v29 = vld [vmem:[%s5576_s10 + $0x2d8] sm:$0xff] }
 0x218   :  { %3208 = vmatpush1.bf16.msra.mxu0 %v3207_v39  ;;  %3263 = vmatpush3.bf16.msra.mxu1 %v3262_v38  ;;  %v1611_v39 = vld [vmem:[%s5576_s10 + $0xc0] sm:$0xff]  ;;  %v1614_v38 = vld [vmem:[%s5576_s10 + $0xd8] sm:$0xff] }
 0x219   :  { %3210 = vmatprep.subr.bf16.mxu0 %v3209_v41  ;;  %3264 = vmatprep.subr.bf16.mxu1 %v3540_v42  ;;  %v3292_v40 = vpack.c.bf16 %v1614_v38, %v1611_v39  ;;  %v1618_v41 = vld [vmem:[%s5576_s10 + $0xf8] sm:$0xff]  ;;  %v1657_v38 = vld [vmem:[%s5576_s10 + $0x230] sm:$0xff] }
 0x21a   :  { %v3294_v49 = vpack.c.bf16 %v1621_v43, %v1618_v41  ;;  %v1654_v39 = vld [vmem:[%s5576_s10 + $0x218] sm:$0xff] }
 0x21b   :  { %v3318_v41 = vpack.c.bf16 %v1657_v38, %v1654_v39  ;;  %v1658_v43 = vld [vmem:[%s5576_s10 + $0x238] sm:$0xff]  ;;  %v1631_v39 = vld [vmem:[%s5576_s10 + $0x160] sm:$0xff] }
 0x21c   :  { %3212 = vmatpush1.bf16.msra.mxu0 %v3211_v53  ;;  %3266 = vmatpush3.bf16.msra.mxu1 %v3265_v54  ;;  %v1624_v53 = vld [vmem:[%s5576_s10 + $0x128] sm:$0xff]  ;;  %v1627_v54 = vld [vmem:[%s5576_s10 + $0x140] sm:$0xff]  ;;  %v1634_v38 = vld [vmem:[%s5576_s10 + $0x178] sm:$0xff] }
 0x21d   :  { %3214 = vmatprep.subr.bf16.mxu0 %v3213_v56  ;;  %3267 = vmatprep.subr.bf16.mxu1 %v3540_v42  ;;  %v3298_v56 = vpack.c.bf16 %v1627_v54, %v1624_v53  ;;  %v1607_v53 = vld [vmem:[%s5576_s10 + $0xa0] sm:$0xff]  ;;  %v1610_v54 = vld [vmem:[%s5576_s10 + $0xb8] sm:$0xff] }
 0x21e   :  { %v3378_v55 = vpack.c.bf16 %v1610_v54, %v1607_v53  ;;  %v1256_v53 = vld [vmem:[%s5575_s9] sm:$0x7] }
 0x21f   :  { %v1269_v54 = vrot.slane %v1256_v53, %v4241_v47 }
 0x220   :  { %3216 = vmatpush1.bf16.msra.mxu0 %v3215_v62  ;;  %3269 = vmatpush3.bf16.msra.mxu1 %v3268_v63  ;;  %v3302_v62 = vpack.c.bf16 %v1633_v59, %v1630_v58  ;;  %v1632_v63 = vld [vmem:[%s5576_s10 + $0x168] sm:$0xff]  ;;  %v1661_v58 = vld [vmem:[%s5576_s10 + $0x250] sm:$0xff] }
 0x221   :  { %3219 = vmatprep.subr.msk.bf16.mxu0 %vm4901_vm7, %v3217_v1  ;;  %3270 = vmatprep.subr.bf16.mxu1 %v3540_v42  ;;  %v1640_v1 = vld [vmem:[%s5576_s10 + $0x1a8] sm:$0xff]  ;;  %v3304_v10 = vpack.c.bf16 %v1632_v63, %v1629_v61  ;;  %v1659_v61 = vld [vmem:[%s5576_s10 + $0x240] sm:$0xff] }
 0x222   :  { %v3364_v4 = vpack.c.bf16 %v1640_v1, %v1637_v0  ;;  %v1613_v1 = vld [vmem:[%s5576_s10 + $0xd0] sm:$0xff] }
 0x223   :  { %v3382_v3 = vpack.c.bf16 %v1616_v2, %v1613_v1 }
 0x224   :  { %3222 = vmatpush1.bf16.msk.msra.mxu0 %vm4901_vm7, %v3220_v11  ;;  %3273 = vmatpush3.bf16.msk.msra.mxu1 %vm4901_vm7, %v3271_v12  ;;  %v1635_v11 = vld [vmem:[%s5576_s10 + $0x180] sm:$0xff]  ;;  %v3366_v12 = vpack.c.bf16 %v1592_v9, %v1589_v8  ;;  %v1669_v8 = vld [vmem:[%s5576_s10 + $0x290] sm:$0xff] }
 0x225   :  { %3275 = vmatprep.subr.bf16.mxu1 %v3274_v13  ;;  %3365 = vmatprep.subr.bf16.mxu0 %v3364_v4  ;;  %v1643_v13 = vld [vmem:[%s5576_s10 + $0x1c0] sm:$0xff]  ;;  %v3308_v23 = vpack.c.bf16 %v1638_v16, %v1635_v11  ;;  %v1666_v4 = vld [vmem:[%s5576_s10 + $0x278] sm:$0xff] }
 0x226   :  { %v3368_v44 = vpack.c.bf16 %v1646_v14, %v1643_v13  ;;  %v1667_v9 = vld [vmem:[%s5576_s10 + $0x280] sm:$0xff]  ;;  %v1670_v11 = vld [vmem:[%s5576_s10 + $0x298] sm:$0xff]  ;;  %v1668_v13 = vld [vmem:[%s5576_s10 + $0x288] sm:$0xff] }
 0x227   :  { %2448 = vmatmul.mubr.msk.f32.vlgmr.msra.gmra.mrb[12].mxu0 %vm1273_vm9, %v1123_v21  ;;  %2770 = vmatmul.mubr.msk.f32.vlgmr.msra.gmra.mrb[10].mxu1 %vm1273_vm9, %v1123_v21  ;;  %v1649_v21 = vld [vmem:[%s5576_s10 + $0x1f0] sm:$0xff]  ;;  %v3384_v14 = vpack.c.bf16 %v1670_v11, %v1667_v9  ;;  %v1619_v16 = vld [vmem:[%s5576_s10 + $0x100] sm:$0xff] }
 0x228   :  { %3277 = vmatpush1.bf16.msra.mxu1 %v3276_v17  ;;  %v1598_v17 = vld [vmem:[%s5576_s10 + $0x58] sm:$0xff]  ;;  %3367 = vmatpush3.bf16.msra.mxu0 %v3366_v12  ;;  %v1665_v12 = vld [vmem:[%s5576_s10 + $0x270] sm:$0xff]  ;;  %v1683_v9 = vld [vmem:[%s5576_s10 + $0x300] sm:$0xff] }
 0x229   :  { %3279 = vmatprep.subr.bf16.mxu1 %v3278_v18  ;;  %v1642_v18 = vld [vmem:[%s5576_s10 + $0x1b8] sm:$0xff]  ;;  %v3370_v20 = vpack.c.bf16 %v1598_v17, %v1595_v46  ;;  %3369 = vmatprep.subr.bf16.mxu0 %v3368_v44  ;;  %v1672_v17 = vld [vmem:[%s5576_s10 + $0x2a8] sm:$0xff]  ;;  %v1685_v11 = vld [vmem:[%s5576_s10 + $0x310] sm:$0xff] }
 0x22a   :  { %v3310_v27 = vpack.c.bf16 %v1645_v19, %v1642_v18  ;;  %v1622_v44 = vld [vmem:[%s5576_s10 + $0x118] sm:$0xff]  ;;  %v1675_v18 = vld [vmem:[%s5576_s10 + $0x2c0] sm:$0xff]  ;;  %v1673_v19 = vld [vmem:[%s5576_s10 + $0x2b0] sm:$0xff] }
 0x22b   :  { %v3386_v46 = vpack.c.bf16 %v1622_v44, %v1619_v16  ;;  %v1693_v16 = vld [vmem:[%s5576_s10 + $0x350] sm:$0xff] }
 0x22c   :  { %3281 = vmatpush1.bf16.msra.mxu1 %v3280_v24  ;;  %v3372_v24 = vpack.c.bf16 %v1652_v22, %v1649_v21  ;;  %3371 = vmatpush3.bf16.msra.mxu0 %v3370_v20  ;;  %v3330_v20 = vpack.c.bf16 %v1675_v18, %v1672_v17  ;;  %v1676_v21 = vld [vmem:[%s5576_s10 + $0x2c8] sm:$0xff]  ;;  %v1671_v22 = vld [vmem:[%s5576_s10 + $0x2a0] sm:$0xff]  ;;  %v1689_v18 = vld [vmem:[%s5576_s10 + $0x330] sm:$0xff] }
 0x22d   :  { %3283 = vmatprep.subr.bf16.mxu1 %v3282_v25  ;;  %v1601_v25 = vld [vmem:[%s5576_s10 + $0x70] sm:$0xff] }
 0x22e   :  { %v3374_v32 = vpack.c.bf16 %v1604_v5, %v1601_v25  ;;  %3373 = vmatprep.subr.bf16.mxu0 %v3372_v24  ;;  %v3388_v24 = vpack.c.bf16 %v1676_v21, %v1673_v19  ;;  %v1625_v5 = vld [vmem:[%s5576_s10 + $0x130] sm:$0xff] }
 0x230   :  { %3285 = vmatpush1.bf16.msra.mxu1 %v3284_v30  ;;  %v1648_v30 = vld [vmem:[%s5576_s10 + $0x1e8] sm:$0xff]  ;;  %3375 = vmatpush3.bf16.msra.mxu0 %v3374_v32 }
 0x231   :  { %3287 = vmatprep.subr.bf16.mxu1 %v3286_v31  ;;  %v1651_v31 = vld [vmem:[%s5576_s10 + $0x200] sm:$0xff] }
 0x232   :  { %v3314_v34 = vpack.c.bf16 %v1651_v31, %v1648_v30  ;;  %v1681_v30 = vld [vmem:[%s5576_s10 + $0x2f0] sm:$0xff]  ;;  %v1679_v31 = vld [vmem:[%s5576_s10 + $0x2e0] sm:$0xff] }
 0x233   :  { %v3334_v32 = vpack.c.bf16 %v1681_v30, %v1678_v29  ;;  %v1695_v30 = vld [vmem:[%s5576_s10 + $0x360] sm:$0xff] }
 0x234   :  { %3289 = vmatpush1.bf16.msra.mxu1 %v3288_v36  ;;  %v1650_v36 = vld [vmem:[%s5576_s10 + $0x1f8] sm:$0xff] }
 0x235   :  { %3291 = vmatprep.subr.bf16.mxu1 %v3290_v37  ;;  %v3316_v37 = vpack.c.bf16 %v1650_v36, %v1647_v35  ;;  %v1680_v35 = vld [vmem:[%s5576_s10 + $0x2e8] sm:$0xff] }
 0x238   :  { %3293 = vmatpush1.bf16.msra.mxu1 %v3292_v40  ;;  %v1655_v40 = vld [vmem:[%s5576_s10 + $0x220] sm:$0xff] }
 0x239   :  { %3295 = vmatprep.subr.bf16.mxu1 %v3294_v49  ;;  %v1653_v49 = vld [vmem:[%s5576_s10 + $0x210] sm:$0xff]  ;;  %v3376_v51 = vpack.c.bf16 %v1658_v43, %v1655_v40  ;;  %v3394_v40 = vpack.c.bf16 %v1634_v38, %v1631_v39  ;;  %v1687_v43 = vld [vmem:[%s5576_s10 + $0x320] sm:$0xff] }
 0x23b   :  { %3377 = vmatprep.subr.bf16.mxu0 %v3376_v51 }
 0x23c   :  { %3297 = vmatpush1.bf16.msra.mxu1 %v3296_v52  ;;  %v3320_v52 = vpack.c.bf16 %v1656_v50, %v1653_v49  ;;  %3379 = vmatpush3.bf16.msra.mxu0 %v3378_v55  ;;  %v1261_v55 = vrot.slane %v1256_v53, %v4233_v45 }
 0x23d   :  { %3299 = vmatprep.subr.bf16.mxu1 %v3298_v56  ;;  %v1660_v56 = vld [vmem:[%s5576_s10 + $0x248] sm:$0xff] }
 0x23e   :  { %v3322_v59 = vpack.c.bf16 %v1663_v57, %v1660_v56  ;;  %v1265_v56 = vrot.slane %v1256_v53, %v4244_v48 }
 0x240   :  { %3301 = vmatpush1.bf16.msra.mxu1 %v3300_v60  ;;  %v1664_v60 = vld [vmem:[%s5576_s10 + $0x268] sm:$0xff] }
 0x241   :  { %3303 = vmatprep.subr.bf16.mxu1 %v3302_v62  ;;  %v1662_v62 = vld [vmem:[%s5576_s10 + $0x258] sm:$0xff]  ;;  %v3380_v63 = vpack.c.bf16 %v1664_v60, %v1661_v58 }
 0x242   :  { %v3324_v0 = vpack.c.bf16 %v1662_v62, %v1659_v61 }
 0x243   :  { %3381 = vmatprep.subr.bf16.mxu0 %v3380_v63 }
 0x244   :  { %3305 = vmatpush1.bf16.msra.mxu1 %v3304_v10  ;;  %3383 = vmatpush3.bf16.msra.mxu0 %v3382_v3  ;;  %v3326_v10 = vpack.c.bf16 %v1669_v8, %v1666_v4 }
 0x245   :  { %3307 = vmatprep.subr.bf16.mxu1 %v3306_v15  ;;  %v3328_v15 = vpack.c.bf16 %v1668_v13, %v1665_v12  ;;  %3385 = vmatprep.subr.bf16.mxu0 %v3384_v14  ;;  %v1688_v12 = vld [vmem:[%s5576_s10 + $0x328] sm:$0xff] }
 0x246   :  { %v3397_v17 = vpack.c.bf16 %v1688_v12, %v1685_v11 }
 0x248   :  { %3309 = vmatpush1.bf16.msra.mxu1 %v3308_v23  ;;  %3387 = vmatpush3.bf16.msra.mxu0 %v3386_v46  ;;  %v1674_v23 = vld [vmem:[%s5576_s10 + $0x2b8] sm:$0xff] }
 0x249   :  { %3311 = vmatprep.subr.bf16.mxu1 %v3310_v27  ;;  %v3332_v25 = vpack.c.bf16 %v1674_v23, %v1671_v22  ;;  %v1628_v27 = vld [vmem:[%s5576_s10 + $0x148] sm:$0xff]  ;;  %3389 = vmatprep.subr.bf16.mxu0 %v3388_v24  ;;  %v1691_v23 = vld [vmem:[%s5576_s10 + $0x340] sm:$0xff]  ;;  %v1694_v24 = vld [vmem:[%s5576_s10 + $0x358] sm:$0xff] }
 0x24a   :  { %v3390_v28 = vpack.c.bf16 %v1628_v27, %v1625_v5  ;;  %v1692_v22 = vld [vmem:[%s5576_s10 + $0x348] sm:$0xff]  ;;  %v1699_v27 = vld [vmem:[%s5576_s10 + $0x380] sm:$0xff]  ;;  %v3400_v29 = vpack.c.bf16 %v1694_v24, %v1691_v23 }
 0x24b   :  { %v1696_v5 = vld [vmem:[%s5576_s10 + $0x368] sm:$0xff]  ;;  %v2068_v24 = vld [vmem:[%s5578_s12 + $0xa0] sm:$0xff] }
 0x24c   :  { %3313 = vmatpush1.bf16.msra.mxu1 %v3312_v33  ;;  %3391 = vmatpush3.bf16.msra.mxu0 %v3390_v28  ;;  %v1682_v33 = vld [vmem:[%s5576_s10 + $0x2f8] sm:$0xff]  ;;  %v3344_v28 = vpack.c.bf16 %v1692_v22, %v1689_v18  ;;  %v2080_v22 = vld [vmem:[%s5578_s12 + $0x100] sm:$0xff]  ;;  %v2081_v23 = vld [vmem:[%s5578_s12 + $0x108] sm:$0xff] }
 0x24d   :  { %3315 = vmatprep.subr.bf16.mxu1 %v3314_v34  ;;  %v1677_v34 = vld [vmem:[%s5576_s10 + $0x2d0] sm:$0xff]  ;;  %v3392_v36 = vpack.c.bf16 %v1682_v33, %v1679_v31  ;;  %v1698_v33 = vld [vmem:[%s5576_s10 + $0x378] sm:$0xff] }
 0x24e   :  { %v3348_v39 = vpack.c.bf16 %v1698_v33, %v1695_v30  ;;  %v2053_v30 = vld [vmem:[%s5578_s12 + $0x28] sm:$0xff]  ;;  %v2083_v33 = vld [vmem:[%s5578_s12 + $0x118] sm:$0xff] }
 0x24f   :  { %3393 = vmatprep.subr.bf16.mxu0 %v3392_v36  ;;  %v1702_v36 = vld [vmem:[%s5576_s10 + $0x398] sm:$0xff] }
 0x250   :  { %3317 = vmatpush1.bf16.msra.mxu1 %v3316_v37  ;;  %v3336_v37 = vpack.c.bf16 %v1680_v35, %v1677_v34  ;;  %3395 = vmatpush3.bf16.msra.mxu0 %v3394_v40  ;;  %v1697_v34 = vld [vmem:[%s5576_s10 + $0x370] sm:$0xff]  ;;  %v1700_v35 = vld [vmem:[%s5576_s10 + $0x388] sm:$0xff] }
 0x251   :  { %3319 = vmatprep.subr.bf16.mxu1 %v3318_v41  ;;  %v1684_v41 = vld [vmem:[%s5576_s10 + $0x308] sm:$0xff]  ;;  %3396 = vmatprep.subr.bf16.mxu0 %v3540_v42  ;;  %v3403_v38 = vpack.c.bf16 %v1700_v35, %v1697_v34  ;;  %v1701_v40 = vld [vmem:[%s5576_s10 + $0x390] sm:$0xff] }
 0x252   :  { %v3338_v49 = vpack.c.bf16 %v1687_v43, %v1684_v41  ;;  %v1704_v43 = vld [vmem:[%s5576_s10 + $0x3a8] sm:$0xff]  ;;  %v2070_v35 = vld [vmem:[%s5578_s12 + $0xb0] sm:$0xff] }
 0x253   :  { %v3352_v53 = vpack.c.bf16 %v1704_v43, %v1701_v40  ;;  %v2085_v43 = vld [vmem:[%s5578_s12 + $0x128] sm:$0xff] }
 0x254   :  { %3321 = vmatpush1.bf16.msra.mxu1 %v3320_v52 }
 0x255   :  { %3323 = vmatprep.subr.bf16.mxu1 %v3322_v59 }
 0x258   :  { %3325 = vmatpush1.bf16.msra.mxu1 %v3324_v0 }
 0x259   :  { %3327 = vmatprep.subr.bf16.mxu1 %v3326_v10  ;;  %v1686_v10 = vld [vmem:[%s5576_s10 + $0x318] sm:$0xff] }
 0x25a   :  { %v3340_v46 = vpack.c.bf16 %v1686_v10, %v1683_v9 }
 0x25c   :  { %3329 = vmatpush1.bf16.msra.mxu1 %v3328_v15  ;;  %v1690_v15 = vld [vmem:[%s5576_s10 + $0x338] sm:$0xff] }
 0x25d   :  { %3331 = vmatprep.subr.bf16.mxu1 %v3330_v20  ;;  %v3342_v21 = vpack.c.bf16 %v1693_v16, %v1690_v15  ;;  %v2065_v15 = vld [vmem:[%s5578_s12 + $0x88] sm:$0xff]  ;;  %v2048_v16 = vld [vmem:[%s5578_s12] sm:$0xff] }
 0x260   :  { %3333 = vmatpush1.bf16.msra.mxu1 %v3332_v25 }
 0x261   :  { %3335 = vmatprep.subr.bf16.mxu1 %v3334_v32  ;;  %v3346_v32 = vpack.c.bf16 %v1699_v27, %v1696_v5  ;;  %v3448_v27 = vpack.c.bf16 %v2081_v23, %v2080_v22  ;;  %v1719_v22 = vld [vmem:[%s5577_s11] sm:$0x7] }
 0x262   :  { %v1732_v23 = vrot.slane %v1719_v22, %v4241_v47  ;;  %v2246_v47 = vld [vmem:[%s5580_s14 + $0x8] sm:$0xff] }
 0x264   :  { %3337 = vmatpush1.bf16.msra.mxu1 %v3336_v37  ;;  %v1705_v37 = vld [vmem:[%s5576_s10 + $0x3b0] sm:$0xff] }
 0x265   :  { %3339 = vmatprep.subr.bf16.mxu1 %v3338_v49  ;;  %v3350_v41 = vpack.c.bf16 %v1705_v37, %v1702_v36  ;;  %v1703_v49 = vld [vmem:[%s5576_s10 + $0x3a0] sm:$0xff]  ;;  %v2071_v36 = vld [vmem:[%s5578_s12 + $0xb8] sm:$0xff] }
 0x266   :  { %v3427_v37 = vpack.c.bf16 %v2071_v36, %v2070_v35 }
 0x2e2   :  { %v2610_v50 = vpop.f32.mrb[8].mxu1 }
 0x2e3   :  { %v2611_v51 = vpop.f32.mrb[9].mxu1 }
 0x2e4   :  { %v2612_v52 = vadd.f32 %v2611_v51, %v2610_v50  ;;  %v1706_v50 = vld [vmem:[%s5576_s10 + $0x3b8] sm:$0xff]  ;;  %v1708_v51 = vld [vmem:[%s5576_s10 + $0x3c8] sm:$0xff] }
 0x2e6   :  { %v1496_v57 = vadd.f32 %v2612_v52, %v1269_v54  ;;  %v1711_v52 = vld [vmem:[%s5576_s10 + $0x3e0] sm:$0xff]  ;;  %v3406_v54 = vpack.c.bf16 %v1706_v50, %v1703_v49 }
 0x2e7   :  { %v2072_v50 = vld [vmem:[%s5578_s12 + $0xc0] sm:$0xff] }
 0x2fa   :  { %v1424_v58 = vpop.f32.mrb[12].mxu0  ;;  %v1565_v59 = vpop.f32.mrb[10].mxu1 }
 0x2fb   :  { %v3484_v60 = vadd.f32 %v1424_v58, %v1261_v55  ;;  %v5217_v61 = vadd.f32 %v1565_v59, %v1496_v57  ;;  %v1426_v62 = vpop.f32.mrb[13].mxu0  ;;  %v2771_v63 = vpop.f32.mrb[11].mxu1  ;;  %v1707_v55 = vld [vmem:[%s5576_s10 + $0x3c0] sm:$0xff]  ;;  %v1710_v57 = vld [vmem:[%s5576_s10 + $0x3d8] sm:$0xff]  ;;  %v1709_v58 = vld [vmem:[%s5576_s10 + $0x3d0] sm:$0xff] }
 0x2fc   :  { %v3485_v0 = vadd.f32 %v1426_v62, %v1265_v56  ;;  %v3354_v56 = vpack.c.bf16 %v1711_v52, %v1708_v51  ;;  %v1712_v59 = vld [vmem:[%s5576_s10 + $0x3e8] sm:$0xff]  ;;  %v1717_v62 = vld [vmem:[%s5576_s10 + $0x410] sm:$0x3f]  ;;  %v3356_v63 = vpack.c.bf16 %v1710_v57, %v1707_v55  ;;  %v2087_v57 = vld [vmem:[%s5578_s12 + $0x138] sm:$0xff] }
 0x2fd   :  { %v1572_v1 = vmin.f32 %v3484_v60, 0.0  ;;  %vm1569_vm11 = vcmp.gt.f32.partialorder %v3484_v60, 0.0  ;;  %v1574_v19 = vmin.f32 %v5217_v61, 0.0  ;;  %vm1571_vm12 = vcmp.gt.f32.partialorder %v5217_v61, 0.0  ;;  %v2073_v51 = vld [vmem:[%s5578_s12 + $0xc8] sm:$0xff] }
 0x2fe   :  { %v1573_v2 = vmin.f32 %v3485_v0, 0.0  ;;  %vm1570_vm10 = vcmp.gt.f32.partialorder %v3485_v0, 0.0  ;;  %v3431_v52 = vpack.c.bf16 %v2073_v51, %v2072_v50 }
 0x2ff   :  { %v1575_v3 = vmul.f32 1.442695, %v1572_v1  ;;  %v1579_v31 = vmul.f32 1.442695, %v1574_v19  ;;  %v1713_v1 = vld [vmem:[%s5576_s10 + $0x3f0] sm:$0xff] }
 0x300   :  { %v1577_v4 = vmul.f32 1.442695, %v1573_v2 }
 0x301   :  { %3503 = vpow2.f32 %v1575_v3  ;;  %v1716_v3 = vld [vmem:[%s5576_s10 + $0x408] sm:$0x3f] }
 0x302   :  { %3505 = vpow2.f32 %v1577_v4  ;;  %v1715_v4 = vld [vmem:[%s5576_s10 + $0x400] sm:$0xff]  ;;  %v3361_v10 = vpack.c.bf16 %v1716_v3, %v1713_v1  ;;  %v2089_v3 = vld [vmem:[%s5578_s12 + $0x148] sm:$0xff] }
 0x303   :  { %3507 = vpow2.f32 %v1579_v31 }
 0x30b   :  { %v3504_v8 = vpop.eup %3503 }
 0x30c   :  { %v3506_v13 = vpop.eup %3505  ;;  %v2451_v14 = vadd.f32 -1.0, %v3504_v8  ;;  %v1718_v8 = vld [vmem:[%s5576_s10 + $0x418] sm:$0x3f] }
 0x30d   :  { %v2452_v44 = vadd.f32 -1.0, %v3506_v13  ;;  %v3508_v9 = vpop.eup %3507  ;;  %v3412_v11 = vpack.c.bf16 %v1718_v8, %v1715_v4  ;;  %v2076_v8 = vld [vmem:[%s5578_s12 + $0xe0] sm:$0xff] }
 0x30e   :  { %v1584_v25 = vsel %vm1569_vm11, %v3484_v60, %v2451_v14  ;;  %v1714_v60 = vld [vmem:[%s5576_s10 + $0x3f8] sm:$0xff]  ;;  %v2453_v12 = vadd.f32 -1.0, %v3508_v9  ;;  %v2064_v14 = vld [vmem:[%s5578_s12 + $0x80] sm:$0xff]  ;;  %v2077_v9 = vld [vmem:[%s5578_s12 + $0xe8] sm:$0xff] }
 0x30f   :  { %v1585_v20 = vsel %vm1570_vm10, %v3485_v0, %v2452_v44  ;;  %v3409_v0 = vpack.c.bf16 %v1712_v59, %v1709_v58  ;;  %v3358_v2 = vpack.c.bf16 %v1717_v62, %v1714_v60  ;;  %v2049_v44 = vld [vmem:[%s5578_s12 + $0x8] sm:$0xff]  ;;  %v2074_v59 = vld [vmem:[%s5578_s12 + $0xd0] sm:$0xff]  ;;  %v2075_v60 = vld [vmem:[%s5578_s12 + $0xd8] sm:$0xff] }
 0x310   :  { %1812 = vmatprep.mubr.f32.mxu1 %v1585_v20  ;;  %1954 = vmatprep.mubr.f32.mxu0 %v1585_v20  ;;  %v1586_v13 = vsel %vm1571_vm12, %v5217_v61, %v2453_v12  ;;  %v3415_v61 = vpack.c.bf16 %v2065_v15, %v2064_v14  ;;  %v3417_v18 = vpack.c.bf16 %v2049_v44, %v2048_v16  ;;  %v2050_v20 = vld [vmem:[%s5578_s12 + $0x10] sm:$0xff]  ;;  %v2061_v12 = vld [vmem:[%s5578_s12 + $0x68] sm:$0xff]  ;;  %v2091_v15 = vld [vmem:[%s5578_s12 + $0x158] sm:$0x3f] }
 0x311   :  { %1813 = vmatmul.mubr.f32.vlgmr.msra.gmra.mrb[12].mxu1 %v1584_v25  ;;  %1955 = vmatmul.mubr.f32.vlgmr.msra.gmra.mrb[14].mxu0 %v1584_v25  ;;  %v2069_v25 = vld [vmem:[%s5578_s12 + $0xa8] sm:$0xff]  ;;  %v3435_v62 = vpack.c.bf16 %v2075_v60, %v2074_v59  ;;  %v2090_v14 = vld [vmem:[%s5578_s12 + $0x150] sm:$0xff]  ;;  %v2079_v44 = vld [vmem:[%s5578_s12 + $0xf8] sm:$0xff] }
 0x312   :  { %3341 = vmatpush1.bf16.msra.mxu1 %v3340_v46  ;;  %3398 = vmatpush3.bf16.msra.mxu0 %v3397_v17  ;;  %v2066_v46 = vld [vmem:[%s5578_s12 + $0x90] sm:$0xff]  ;;  %v2067_v17 = vld [vmem:[%s5578_s12 + $0x98] sm:$0xff]  ;;  %v3463_v16 = vpack.c.bf16 %v2091_v15, %v2090_v14  ;;  %v2462_v14 = vld [vmem:[%s5579_s13] ss:$0 sm:$0xff]  ;;  %s3515_s13 = scalar_lea.vmem %s2432_s7, 32 }
 0x313   :  { %3343 = vmatprep.subr.bf16.mxu1 %v3342_v21  ;;  %3399 = vmatprep.subr.bf16.mxu0 %v3540_v42  ;;  %v3419_v19 = vpack.c.bf16 %v2067_v17, %v2066_v46  ;;  %v2051_v21 = vld [vmem:[%s5578_s12 + $0x18] sm:$0xff]  ;;  %v2062_v17 = vld [vmem:[%s5578_s12 + $0x70] sm:$0xff]  ;;  %p3516_p0 = scmp.ne.s32.totalorder %s2432_s7, %s3515_s13  ;;  %p3521_p2 = scmp.lt.s32.totalorder %s3515_s13, %s3515_s13 }
 0x314   :  { %1883 = vmatprep.mubr.f32.mxu1 %v3539_v7  ;;  %2796 = vmatprep.mubr.msk.f32.mxu0 %vm3541_vm2, %v3539_v7  ;;  %v3421_v5 = vpack.c.bf16 %v2051_v21, %v2050_v20 }
 0x315   :  { %p3522_p3 = por %p3521_p2, %p3520_p1 }
 0x316   :  { %3345 = vmatpush1.bf16.msra.mxu1 %v3344_v28  ;;  %3401 = vmatpush3.bf16.msra.mxu0 %v3400_v29  ;;  %v3423_v28 = vpack.c.bf16 %v2069_v25, %v2068_v24  ;;  %v2052_v29 = vld [vmem:[%s5578_s12 + $0x20] sm:$0xff]  ;;  %v1724_v24 = vrot.slane %v1719_v22, %v4233_v45  ;;  %v1728_v25 = vrot.slane %v1719_v22, %v4244_v48 }
 0x317   :  { %3347 = vmatprep.subr.bf16.mxu1 %v3346_v32  ;;  %3402 = vmatprep.subr.bf16.mxu0 %v3540_v42  ;;  %v3425_v31 = vpack.c.bf16 %v2053_v30, %v2052_v29  ;;  %v2082_v32 = vld [vmem:[%s5578_s12 + $0x110] sm:$0xff]  ;;  %v2245_v45 = vld [vmem:[%s5580_s14] sm:$0xff]  ;;  %p3523_p4 = pnand %p3522_p3, %p3516_p0 }
 0x318   :  { %v3451_v34 = vpack.c.bf16 %v2083_v33, %v2082_v32  ;;  %v3476_v51 = vpack.c.bf16 %v2246_v47, %v2245_v45 }
 0x31a   :  { %3349 = vmatpush1.bf16.msra.mxu1 %v3348_v39  ;;  %3404 = vmatpush3.bf16.msra.mxu0 %v3403_v38  ;;  %v2054_v39 = vld [vmem:[%s5578_s12 + $0x30] sm:$0xff]  ;;  %v2055_v38 = vld [vmem:[%s5578_s12 + $0x38] sm:$0xff] }
 0x31b   :  { %3351 = vmatprep.subr.bf16.mxu1 %v3350_v41  ;;  %3405 = vmatprep.subr.bf16.mxu0 %v3540_v42  ;;  %v3429_v40 = vpack.c.bf16 %v2055_v38, %v2054_v39  ;;  %v2084_v41 = vld [vmem:[%s5578_s12 + $0x120] sm:$0xff] }
 0x31c   :  { %v3454_v49 = vpack.c.bf16 %v2085_v43, %v2084_v41  ;;  %v2252_v41 = vld [vmem:[%s5581_s15] sm:$0xff]  ;;  %v2253_v43 = vld [vmem:[%s5581_s15 + $0x8] sm:$0xff] }
 0x31e   :  { %3353 = vmatpush1.bf16.msra.mxu1 %v3352_v53  ;;  %3407 = vmatpush3.bf16.msra.mxu0 %v3406_v54  ;;  %v2056_v53 = vld [vmem:[%s5578_s12 + $0x40] sm:$0xff]  ;;  %v2057_v54 = vld [vmem:[%s5578_s12 + $0x48] sm:$0xff] }
 0x31f   :  { %3355 = vmatprep.subr.bf16.mxu1 %v3354_v56  ;;  %3408 = vmatprep.subr.bf16.mxu0 %v3540_v42  ;;  %v3433_v55 = vpack.c.bf16 %v2057_v54, %v2056_v53  ;;  %v2086_v56 = vld [vmem:[%s5578_s12 + $0x130] sm:$0xff] }
 0x320   :  { %v3457_v58 = vpack.c.bf16 %v2087_v57, %v2086_v56  ;;  %v2247_v54 = vld [vmem:[%s5580_s14 + $0x10] sm:$0xff]  ;;  %v3467_v57 = vpack.c.bf16 %v2253_v43, %v2252_v41 }
 0x322   :  { %3357 = vmatpush1.bf16.msra.mxu1 %v3356_v63  ;;  %3410 = vmatpush3.bf16.msra.mxu0 %v3409_v0  ;;  %v2058_v63 = vld [vmem:[%s5578_s12 + $0x50] sm:$0xff]  ;;  %v2059_v0 = vld [vmem:[%s5578_s12 + $0x58] sm:$0xff] }
 0x323   :  { %3360 = vmatprep.subr.msk.bf16.mxu1 %vm4901_vm7, %v3358_v2  ;;  %3411 = vmatprep.subr.bf16.mxu0 %v3540_v42  ;;  %v3437_v1 = vpack.c.bf16 %v2059_v0, %v2058_v63  ;;  %v2088_v2 = vld [vmem:[%s5578_s12 + $0x140] sm:$0xff]  ;;  %v2250_v63 = vld [vmem:[%s5580_s14 + $0x28] sm:$0xff] }
 0x324   :  { %v3460_v4 = vpack.c.bf16 %v2089_v3, %v2088_v2  ;;  %v936_v2 = vmax.f32 %v4826_v26, 0.0  ;;  %v2254_v3 = vld [vmem:[%s5581_s15 + $0x10] sm:$0xff]  ;;  %v2256_v26 = vld [vmem:[%s5581_s15 + $0x20] sm:$0xff] }
 0x326   :  { %3363 = vmatpush1.bf16.msk.msra.mxu1 %vm4901_vm7, %v3361_v10  ;;  %3414 = vmatpush3.bf16.msk.msra.mxu0 %vm4901_vm7, %v3412_v11  ;;  %v3439_v10 = vpack.c.bf16 %v2077_v9, %v2076_v8  ;;  %v2060_v11 = vld [vmem:[%s5578_s12 + $0x60] sm:$0xff]  ;;  %v2257_v9 = vld [vmem:[%s5581_s15 + $0x28] sm:$0xff] }
 0x327   :  { %3447 = vmatprep.subr.bf16.mxu1 %v3540_v42  ;;  %3416 = vmatprep.subr.bf16.mxu0 %v3415_v61  ;;  %v2078_v61 = vld [vmem:[%s5578_s12 + $0xf0] sm:$0xff] }
 0x328   :  { %v3443_v46 = vpack.c.bf16 %v2079_v44, %v2078_v61 }
 0x329   :  { %2456 = vmatmul.mubr.msk.f32.vlgmr.msra.gmra.mrb[12].mxu1 %vm1273_vm9, %v1586_v13  ;;  %2797 = vmatmul.mubr.msk.f32.vlgmr.msra.gmra.mrb[16].mxu0 %vm1273_vm9, %v1586_v13  ;;  %v3441_v13 = vpack.c.bf16 %v2061_v12, %v2060_v11  ;;  %v2258_v11 = vld [vmem:[%s5581_s15 + $0x30] sm:$0x3] }
 0x32a   :  { %2823 = vmatprep.mubr.msk.f32.mxu1 %vm3541_vm2, %v3539_v7  ;;  %3418 = vmatpush3.bf16.msra.mxu0 %v3417_v18  ;;  %v2063_v18 = vld [vmem:[%s5578_s12 + $0x78] sm:$0xff] }
 0x32b   :  { %3420 = vmatprep.subr.bf16.mxu0 %v3419_v19  ;;  %3449 = vmatpush3.bf16.msra.mxu1 %v3448_v27  ;;  %v3445_v19 = vpack.c.bf16 %v2063_v18, %v2062_v17  ;;  %v2469_v18 = vld [vmem:[%s5582_s16] ss:$0 sm:$0xff] }
 0x32c   :  { %3450 = vmatprep.subr.bf16.mxu1 %v3540_v42 }
 0x32e   :  { %3422 = vmatpush3.bf16.msra.mxu0 %v3421_v5 }
 0x32f   :  { %3424 = vmatprep.subr.bf16.mxu0 %v3423_v28  ;;  %3452 = vmatpush3.bf16.msra.mxu1 %v3451_v34 }
 0x330   :  { %3453 = vmatprep.subr.bf16.mxu1 %v3540_v42 }
 0x332   :  { %3426 = vmatpush3.bf16.msra.mxu0 %v3425_v31 }
 0x333   :  { %3428 = vmatprep.subr.bf16.mxu0 %v3427_v37  ;;  %3455 = vmatpush3.bf16.msra.mxu1 %v3454_v49 }
 0x334   :  { %3456 = vmatprep.subr.bf16.mxu1 %v3540_v42 }
 0x336   :  { %3430 = vmatpush3.bf16.msra.mxu0 %v3429_v40 }
 0x337   :  { %3432 = vmatprep.subr.bf16.mxu0 %v3431_v52  ;;  %3458 = vmatpush3.bf16.msra.mxu1 %v3457_v58 }
 0x338   :  { %3459 = vmatprep.subr.bf16.mxu1 %v3540_v42 }
 0x33a   :  { %3434 = vmatpush3.bf16.msra.mxu0 %v3433_v55  ;;  %v2248_v55 = vld [vmem:[%s5580_s14 + $0x18] sm:$0xff] }
 0x33b   :  { %3436 = vmatprep.subr.bf16.mxu0 %v3435_v62  ;;  %3461 = vmatpush3.bf16.msra.mxu1 %v3460_v4  ;;  %v3479_v60 = vpack.c.bf16 %v2248_v55, %v2247_v54  ;;  %v2249_v62 = vld [vmem:[%s5580_s14 + $0x20] sm:$0xff]  ;;  %v2255_v4 = vld [vmem:[%s5581_s15 + $0x18] sm:$0xff] }
 0x33c   :  { %3462 = vmatprep.subr.bf16.mxu1 %v3540_v42  ;;  %v3482_v0 = vpack.c.bf16 %v2250_v63, %v2249_v62  ;;  %v3470_v8 = vpack.c.bf16 %v2255_v4, %v2254_v3 }
 0x33e   :  { %3438 = vmatpush3.bf16.msra.mxu0 %v3437_v1  ;;  %v2251_v1 = vld [vmem:[%s5580_s14 + $0x30] sm:$0x3] }
 0x33f   :  { %3440 = vmatprep.subr.bf16.mxu0 %v3439_v10  ;;  %3465 = vmatpush3.bf16.msk.msra.mxu1 %vm4901_vm7, %v3463_v16  ;;  %v3473_v10 = vpack.c.bf16 %v2257_v9, %v2256_v26 }
 0x340   :  { %3475 = vmatprep.subr.bf16.mxu1 %v3540_v42 }
 0x342   :  { %3442 = vmatpush3.bf16.msra.mxu0 %v3441_v13 }
 0x343   :  { %3444 = vmatprep.subr.bf16.mxu0 %v3443_v46 }
 0x346   :  { %3446 = vmatpush3.bf16.msra.mxu0 %v3445_v19 }
 0x347   :  { %3466 = vmatprep.subr.bf16.mxu0 %v3540_v42 }
 0x3e4   :  { %v2658_v20 = vpop.f32.mrb[14].mxu0 }
 0x3e5   :  { %v2659_v21 = vpop.f32.mrb[15].mxu0 }
 0x3e6   :  { %v2660_v6 = vadd.f32 %v2659_v21, %v2658_v20 }
 0x3e8   :  { %v1957_v5 = vadd.f32 %v2660_v6, %v1732_v23 }
 0x3fc   :  { %v1885_v27 = vpop.f32.mrb[12].mxu1  ;;  %v2026_v28 = vpop.f32.mrb[16].mxu0 }
 0x3fd   :  { %v3486_v29 = vadd.f32 %v1885_v27, %v1724_v24  ;;  %v2027_v30 = vadd.f32 %v2026_v28, %v1957_v5  ;;  %v1887_v31 = vpop.f32.mrb[13].mxu1  ;;  %v2798_v32 = vpop.f32.mrb[17].mxu0 }
 0x3fe   :  { %v3487_v33 = vadd.f32 %v1887_v31, %v1728_v25 }
 0x3ff   :  { %v2033_v34 = vmin.f32 %v3486_v29, 0.0  ;;  %v2035_v35 = vmin.f32 %v2027_v30, 0.0  ;;  %vm2032_vm13 = vcmp.gt.f32.partialorder %v2027_v30, 0.0  ;;  %vm2030_vm15 = vcmp.gt.f32.partialorder %v3486_v29, 0.0 }
 0x400   :  { %v2034_v36 = vmin.f32 %v3487_v33, 0.0  ;;  %vm2031_vm14 = vcmp.gt.f32.partialorder %v3487_v33, 0.0 }
 0x401   :  { %v2036_v37 = vmul.f32 1.442695, %v2033_v34  ;;  %v2040_v39 = vmul.f32 1.442695, %v2035_v35 }
 0x402   :  { %v2038_v38 = vmul.f32 1.442695, %v2034_v36 }
 0x403   :  { %3509 = vpow2.f32 %v2036_v37 }
 0x404   :  { %3511 = vpow2.f32 %v2040_v39 }
 0x405   :  { %3513 = vpow2.f32 %v2038_v38 }
 0x40d   :  { %v3510_v48 = vpop.eup %3509 }
 0x40e   :  { %v3512_v40 = vpop.eup %3511  ;;  %v2459_v52 = vadd.f32 -1.0, %v3510_v48 }
 0x40f   :  { %v3514_v49 = vpop.eup %3513  ;;  %v2461_v50 = vadd.f32 -1.0, %v3512_v40 }
 0x410   :  { %v2460_v53 = vadd.f32 -1.0, %v3514_v49  ;;  %v2045_v59 = vsel %vm2030_vm15, %v3486_v29, %v2459_v52 }
 0x411   :  { %v2047_v56 = vsel %vm2032_vm13, %v2027_v30, %v2461_v50 }
 0x412   :  { %2824 = vmatmul.mubr.msk.f32.vlgmr.msra.gmra.mrb[14].mxu1 %vm1273_vm9, %v2047_v56  ;;  %v2046_v58 = vsel %vm2031_vm14, %v3487_v33, %v2460_v53 }
 0x413   :  { %3477 = vmatpush3.bf16.msra.mxu1 %v3476_v51  ;;  %2169 = vmatprep.mubr.f32.mxu0 %v2046_v58 }
 0x414   :  { %2170 = vmatmul.mubr.f32.vlgmr.msra.gmra.mrb[18].mxu0 %v2045_v59  ;;  %3478 = vmatprep.subr.bf16.mxu1 %v3540_v42 }
 0x415   :  { %2857 = vmatprep.mubr.msk.f32.mxu1 %vm3541_vm2, %v3539_v7  ;;  %3468 = vmatpush3.bf16.msra.mxu0 %v3467_v57 }
 0x416   :  { %3469 = vmatprep.subr.bf16.mxu0 %v3540_v42  ;;  %2840 = vmatprep.mubr.msk.f32.mxu0 %vm3541_vm2, %v3539_v7  ;;  %vm2423_vm2 = vcmask 41984  }
 0x417   :  { %3480 = vmatpush3.bf16.msra.mxu1 %v3479_v60 }
 0x418   :  { %3481 = vmatprep.subr.bf16.mxu1 %v3540_v42 }
 0x419   :  { %3471 = vmatpush3.bf16.msra.mxu0 %v3470_v8 }
 0x41a   :  { %3472 = vmatprep.subr.bf16.mxu0 %v3540_v42 }
 0x41b   :  { %3483 = vmatpush3.bf16.msra.mxu1 %v3482_v0 }
 0x41c   :  { %2855 = vmatprep.subr.mxu1 %v3539_v7 }
 0x41d   :  { %3474 = vmatpush3.bf16.msra.mxu0 %v3473_v10 }
 0x41e   :  { %2838 = vmatprep.subr.mxu0 %v3539_v7 }
 0x41f   :  { %2856 = vmatpush3.msk.msra.mxu1 %vm2263_vm0, %v2251_v1 }
 0x420   :  { %2858 = vmatmul.mubr.msk.f32.vlgmr.msra.gmra.mrb[16].mxu1 %vm2259_vm1, %v936_v2 }
 0x421   :  { %2839 = vmatpush3.msk.msra.mxu0 %vm2263_vm0, %v2258_v11 }
 0x4e5   :  { %v2241_v12 = vpop.f32.mrb[14].mxu1 }
 0x4e6   :  { %v2825_v42 = vpop.f32.mrb[15].mxu1 }
 0x4e7   :  { %v2706_v13 = vpop.f32.mrb[18].mxu0 }
 0x4e8   :  { %v2707_v15 = vpop.f32.mrb[19].mxu0 }
 0x4e9   :  { %v2708_v16 = vadd.f32 %v2707_v15, %v2706_v13 }
 0x4eb   :  { %v2172_v61 = vadd.f32 %v2708_v16, %v2462_v14 }
 0x4ed   :  { %v2242_v44 = vadd.f32 %v2241_v12, %v2172_v61 }
 0x4ef   :  { %2841 = vmatmul.mubr.msk.f32.vlgmr.msra.gmra.mrb[20].mxu0 %vm2259_vm1, %v2242_v44 }
 0x4f3   :  { %v2409_v7 = vpop.f32.mrb[16].mxu1 }
 0x4f4   :  { %v2859_v46 = vpop.f32.mrb[17].mxu1 }
 0x5c2   :  { %v2333_v17 = vpop.f32.mrb[20].mxu0 }
 0x5c3   :  { %v2410_v19 = vadd.f32 %v2409_v7, %v2333_v17  ;;  %v2842_v20 = vpop.f32.mrb[21].mxu0 }
 0x5c5   :  { %v2420_v21 = vadd.f32 %v2469_v18, %v2410_v19 }
 0x5c7   :  { %v2421_v6 = vmax.f32 %v2420_v21, 0.0 }
 0x5c9   :  { %v2422_v22 = vmin.f32 %v2421_v6, 110.0 }
 0x5cb   :  { %2424 = vst.msk [vmem:[#allocation2] sm:$0x3] %vm2423_vm2, %v2422_v22 }
 0x5cc   :  { %3526 = shalt.err (!%p3523_p4)
}
 0x5cd   :  { %s3527_s16 = scalar_lea.hbm %s5583_s17, 32 }
 0x5ce   :  { %p3528_p5 = scmp.ne.s32.totalorder %s5583_s17, %s3527_s16  ;;  %p3531_p6 = scmp.lt.u32.totalorder %s3527_s16, %s5583_s17 }
 0x5d0   :  { %p3533_p7 = pnand %p3531_p6, %p3528_p5 }
 0x5d2   :  { %3536 = shalt.err (!%p3533_p7)
}
 0x5d3   :  { %2434 = dma.vmem_to_hbm [thread:$0]  %s2432_s7, 32, %s5583_s17, [#allocation3]  }
 0x5d4   :  { %3537 = dma.done.wait [#allocation3], 32  }
 0x5d5   :  { %3538 = vsyncadd [#allocation3], 4294967264 }
 0x5d6   :  { %2438 = vsyncpa [#allocation3], 1 }

</bundles_post_ra>
